<compile_context>
chip_gen: v7x
topology: tpu7x:2x2x1
jax: 0.10.0
libtpu: 0.0.40
codegen_flags: <defaults>
</compile_context>

<pallas_src>
import functools

import jax
import jax.numpy as jnp
from jax.experimental import pallas as pl
from jax.experimental.pallas import tpu as pltpu

# Forward-consistent small shapes (CSV feature count unknown -> pick 6).
INPUT_SIZE = 6
HIDDEN_SIZE = 40
OUTPUT_SIZE = 1
SEQ_LEN = 8

# Padded TPU-friendly dims.
INP = 8       # input features padded to a sublane multiple
HP = 128      # hidden padded to lane width
OUTP = 128    # output padded to lane width

# Packed gate order [i, f, o, g]; source PyTorch chunk order is [i, f, g, o].
_GATE_SRC = (0, 1, 3, 2)


# --------------------------------------------------------------------------- #
# Pallas kernel
# --------------------------------------------------------------------------- #
def _sigmoid(x):
    # EUP exp + approximate EUP reciprocal (well inside the 1e-2 tolerance).
    return pl.reciprocal(1.0 + jnp.exp(-x), approx=True)


def _cell(gates, c):
    """LSTM elementwise math on (1, 4*HP) f32 pre-activations, layout [i|f|o|g].

    Padded lanes of h/c stay exactly 0: g_pad = tanh(0) = 0 and c starts at 0,
    so c_pad = f_pad*0 + i_pad*0 = 0 and h_pad = o_pad*tanh(0) = 0.
    """
    sig = _sigmoid(gates[:, :3 * HP])            # i, f, o in one wide op
    i = sig[:, 0 * HP:1 * HP]
    f = sig[:, 1 * HP:2 * HP]
    o = sig[:, 2 * HP:3 * HP]
    g = jnp.tanh(gates[:, 3 * HP:4 * HP])
    c_new = f * c + i * g
    h_new = o * jnp.tanh(c_new)
    return h_new, c_new


def lstm_kernel(x_ref, wih1_ref, wfused_ref, misc_ref, out_ref, *, seq_len):
    # Hoist only the small biases; the fused weight stays in VMEM and is read
    # at each use inside the unrolled loop (avoids vreg spills).
    b1 = misc_ref[0:1, :]                        # (1, 4*HP) f32
    b2 = misc_ref[1:2, :]                        # (1, 4*HP) f32

    # Layer-1 input projection for ALL timesteps: one MXU matmul, off the
    # recurrence's critical path.
    xw1 = (jnp.dot(x_ref[...].astype(jnp.bfloat16), wih1_ref[...],
                   preferred_element_type=jnp.float32) + b1)   # (T, 4*HP) f32

    # Register-carried state (never touches VMEM scratch).
    c1 = jnp.zeros((1, HP), jnp.float32)
    h2 = jnp.zeros((1, HP), jnp.float32)
    c2 = jnp.zeros((1, HP), jnp.float32)

    # Software pipeline: h1(-1) == 0, so layer-1's step-0 pre-activation is
    # just xw1[0] -- no prologue matmul needed.
    gates1 = xw1[0:1, :]

    for t in range(seq_len):
        # Layer-1 cell, step t.
        h1, c1 = _cell(gates1, c1)

        # ONE fused matmul: same LHS rows serve (a) layer-1 recurrence for
        # step t+1 and (b) layer-2 gates for step t.  h2 here is h2(t-1).
        hcat = jnp.concatenate([h1, h2], axis=1).astype(jnp.bfloat16)  # (1,2HP)
        fused = jnp.dot(hcat, wfused_ref[...],
                        preferred_element_type=jnp.float32)            # (1,8HP)

        # Layer-2 cell, step t.
        gates2 = fused[:, 4 * HP:] + b2
        h2, c2 = _cell(gates2, c2)

        # Layer-1 pre-activation for step t+1 (epilogue: unused on last step).
        if t + 1 < seq_len:
            gates1 = xw1[t + 1:t + 2, :] + fused[:, :4 * HP]

    # Linear head on the *final* hx2 only: VPU multiply + lane reduce, no MXU.
    wlin_row = misc_ref[2:3, 0:HP]               # (1, HP) f32
    head = jnp.sum(h2 * wlin_row, axis=-1, keepdims=True)    # (1, 1)
    # misc row 3 holds b_lin in lane 0 and zeros elsewhere -> lane 0 is output.
    out_ref[...] = head + misc_ref[3:4, 0:OUTP]


# --------------------------------------------------------------------------- #
# Wrapper
# --------------------------------------------------------------------------- #
def lstm_cell_model_forward(x, packed_params):
    """x: (T, INPUT_SIZE) float32 -> (OUTPUT_SIZE,) float32."""
    T = x.shape[0]
    x_p = jnp.zeros((T, INP), jnp.float32).at[:, :INPUT_SIZE].set(x)

    wih1, wfused, misc = packed_params

    vmem = pl.BlockSpec(memory_space=pltpu.MemorySpace.VMEM)
    out = pl.pallas_call(
        functools.partial(lstm_kernel, seq_len=T),
        out_shape=jax.ShapeDtypeStruct((1, OUTP), jnp.float32),
        in_specs=[vmem] * 4,
        out_specs=vmem,
    )(x_p, wih1, wfused, misc)

    return out[0, :OUTPUT_SIZE]


# --------------------------------------------------------------------------- #
# Deterministic parameter init (PyTorch-style layout) + packing for the kernel
# --------------------------------------------------------------------------- #
def init_raw_params(key):
    H, IN, OUT = HIDDEN_SIZE, INPUT_SIZE, OUTPUT_SIZE
    ks = jax.random.split(key, 10)
    std = 1.0 / float(jnp.sqrt(jnp.float32(H)))

    def u(k, shape):
        return jax.random.uniform(k, shape, jnp.float32, -std, std)

    w_ih1 = u(ks[0], (4 * H, IN));  w_hh1 = u(ks[1], (4 * H, H))
    b_ih1 = u(ks[2], (4 * H,));     b_hh1 = u(ks[3], (4 * H,))
    w_ih2 = u(ks[4], (4 * H, H));   w_hh2 = u(ks[5], (4 * H, H))
    b_ih2 = u(ks[6], (4 * H,));     b_hh2 = u(ks[7], (4 * H,))
    w_lin = u(ks[8], (OUT, H));     b_lin = u(ks[9], (OUT,))
    return (w_ih1, w_hh1, b_ih1, b_hh1,
            w_ih2, w_hh2, b_ih2, b_hh2,
            w_lin, b_lin)


def _pack_lstm(w_ih, w_hh, b_ih, b_hh, in_dim, in_pad):
    """PyTorch (4H,in)/(4H,H)/(4H,) -> padded (in_pad,4HP)/(HP,4HP)/(1,4HP),
    gate order [i, f, o, g], zero padding everywhere else."""
    H = HIDDEN_SIZE
    wih_p = jnp.zeros((in_pad, 4 * HP), jnp.float32)
    whh_p = jnp.zeros((HP, 4 * HP), jnp.float32)
    b_p = jnp.zeros((1, 4 * HP), jnp.float32)
    b = b_ih + b_hh
    for pos, src in enumerate(_GATE_SRC):
        wih_p = wih_p.at[:in_dim, pos * HP:pos * HP + H].set(
            w_ih[src * H:(src + 1) * H, :].T)
        whh_p = whh_p.at[:H, pos * HP:pos * HP + H].set(
            w_hh[src * H:(src + 1) * H, :].T)
        b_p = b_p.at[0, pos * HP:pos * HP + H].set(b[src * H:(src + 1) * H])
    return wih_p, whh_p, b_p


def pack_params(raw):
    (w_ih1, w_hh1, b_ih1, b_hh1,
     w_ih2, w_hh2, b_ih2, b_hh2,
     w_lin, b_lin) = raw
    wih1, whh1, b1 = _pack_lstm(w_ih1, w_hh1, b_ih1, b_hh1, INPUT_SIZE, INP)
    wih2, whh2, b2 = _pack_lstm(w_ih2, w_hh2, b_ih2, b_hh2, HIDDEN_SIZE, HP)

    # Fused per-step weight: with LHS = [h1(t), h2(t-1)] the product is
    # [h1@whh1 | h1@wih2 + h2@whh2].  The lower-left block is EXACT zero so
    # h2 never leaks into layer-1 gates.
    wfused = jnp.zeros((2 * HP, 8 * HP), jnp.float32)
    wfused = wfused.at[:HP, :4 * HP].set(whh1)
    wfused = wfused.at[:HP, 4 * HP:].set(wih2)
    wfused = wfused.at[HP:, 4 * HP:].set(whh2)

    # misc rows: 0 = b1, 1 = b2, 2 = linear-head weight row (first HP lanes),
    # 3 = b_lin in lane 0.  Padded lanes are exactly zero.
    misc = jnp.zeros((8, 4 * HP), jnp.float32)
    misc = misc.at[0, :].set(b1[0])
    misc = misc.at[1, :].set(b2[0])
    misc = misc.at[2, :HIDDEN_SIZE].set(w_lin[0, :])
    misc = misc.at[3, 0].set(b_lin[0])

    # MXU operands in bf16; everything elementwise stays f32.
    return (wih1.astype(jnp.bfloat16), wfused.astype(jnp.bfloat16), misc)


# --------------------------------------------------------------------------- #
# Pure-JAX reference (exact PyTorch semantics) for a sanity check
# --------------------------------------------------------------------------- #
def reference_forward(x, raw):
    (w_ih1, w_hh1, b_ih1, b_hh1,
     w_ih2, w_hh2, b_ih2, b_hh2,
     w_lin, b_lin) = raw
    H = HIDDEN_SIZE

    def cell(x_t, h, c, w_ih, w_hh, b_ih, b_hh):
        gates = w_ih @ x_t + b_ih + w_hh @ h + b_hh
        i = jax.nn.sigmoid(gates[0:H])
        f = jax.nn.sigmoid(gates[H:2 * H])
        g = jnp.tanh(gates[2 * H:3 * H])
        o = jax.nn.sigmoid(gates[3 * H:4 * H])
        c_new = f * c + i * g
        h_new = o * jnp.tanh(c_new)
        return h_new, c_new

    h1 = jnp.zeros(H); c1 = jnp.zeros(H)
    h2 = jnp.zeros(H); c2 = jnp.zeros(H)
    for t in range(x.shape[0]):
        h1, c1 = cell(x[t], h1, c1, w_ih1, w_hh1, b_ih1, b_hh1)
        h2, c2 = cell(h1, h2, c2, w_ih2, w_hh2, b_ih2, b_hh2)
    return w_lin @ h2 + b_lin


# --------------------------------------------------------------------------- #
if __name__ == "__main__":
    key = jax.random.PRNGKey(0)
    k_x, k_p = jax.random.split(key)

    x = jax.random.normal(k_x, (SEQ_LEN, INPUT_SIZE), jnp.float32)
    raw_params = init_raw_params(k_p)
    packed = pack_params(raw_params)

    out = lstm_cell_model_forward(x, packed)
    out = jax.block_until_ready(out)

    ref = jax.block_until_ready(reference_forward(x, raw_params))

    assert out.shape == (OUTPUT_SIZE,), out.shape
    # Tolerance budget: bf16 matmul operands re-quantized each step plus the
    # approximate-reciprocal sigmoid over an 8-step recurrence at H=40.
    max_err = float(jnp.max(jnp.abs(out - ref)))
    assert max_err < 2e-2, f"mismatch vs reference: {max_err}"

    print("KERNEL_OK")
</pallas_src>

<mosaic_0001>
module attributes {stable_mosaic.version = 11 : i64} {
  func.func @lstm_kernel(%arg0: memref<8x8xf32, #tpu.memory_space<vmem>>, %arg1: memref<8x512xbf16, #tpu.memory_space<vmem>>, %arg2: memref<256x1024xbf16, #tpu.memory_space<vmem>>, %arg3: memref<8x512xf32, #tpu.memory_space<vmem>>, %arg4: memref<1x128xf32, #tpu.memory_space<vmem>>) attributes {dimension_semantics = [], scalar_prefetch = 0 : i64, scratch_operands = 0 : i64, tpu.core_type = #tpu.core_type<tc>} {
    %c0 = arith.constant 0 : index
    %c0_0 = arith.constant 0 : index
    %0 = vector.load %arg3[%c0, %c0_0] : memref<8x512xf32, #tpu.memory_space<vmem>>, vector<1x512xf32>
    %c1 = arith.constant 1 : index
    %c0_1 = arith.constant 0 : index
    %1 = vector.load %arg3[%c1, %c0_1] : memref<8x512xf32, #tpu.memory_space<vmem>>, vector<1x512xf32>
    %c0_2 = arith.constant 0 : index
    %c0_3 = arith.constant 0 : index
    %2 = vector.load %arg0[%c0_2, %c0_3] : memref<8x8xf32, #tpu.memory_space<vmem>>, vector<8x8xf32>
    %3 = arith.truncf %2 : vector<8x8xf32> to vector<8x8xbf16>
    %c0_4 = arith.constant 0 : index
    %c0_5 = arith.constant 0 : index
    %4 = vector.load %arg1[%c0_4, %c0_5] : memref<8x512xbf16, #tpu.memory_space<vmem>>, vector<8x512xbf16>
    %cst = arith.constant dense<0.000000e+00> : vector<8x512xf32>
    %5 = tpu.matmul %3, %4, %cst {dimension_numbers = #tpu.dot_dimension_numbers<[1], [0], [0], [1], [0, 0, 1, 1], [], []>} : vector<8x8xbf16>, vector<8x512xbf16>, vector<8x512xf32> -> vector<8x512xf32>
    %6 = vector.broadcast %0 : vector<1x512xf32> to vector<8x512xf32>
    %7 = arith.addf %5, %6 : vector<8x512xf32>
    %cst_6 = arith.constant 0.000000e+00 : f32
    %8 = vector.broadcast %cst_6 : f32 to vector<1x128xf32>
    %cst_7 = arith.constant 0.000000e+00 : f32
    %9 = vector.broadcast %cst_7 : f32 to vector<1x128xf32>
    %cst_8 = arith.constant 0.000000e+00 : f32
    %10 = vector.broadcast %cst_8 : f32 to vector<1x128xf32>
    %11 = vector.extract_strided_slice %7 {offsets = [0, 0], sizes = [1, 512], strides = [1, 1]} : vector<8x512xf32> to vector<1x512xf32>
    %12 = vector.extract_strided_slice %11 {offsets = [0, 0], sizes = [1, 384], strides = [1, 1]} : vector<1x512xf32> to vector<1x384xf32>
    %cst_9 = arith.constant 0.000000e+00 : f32
    %13 = vector.broadcast %cst_9 : f32 to vector<1x384xf32>
    %14 = arith.subf %13, %12 : vector<1x384xf32>
    %15 = math.exp %14 : vector<1x384xf32>
    %cst_10 = arith.constant 1.000000e+00 : f32
    %16 = vector.broadcast %cst_10 : f32 to vector<1x384xf32>
    %17 = arith.addf %16, %15 : vector<1x384xf32>
    %18 = tpu.reciprocal %17 {approx = true} : vector<1x384xf32> -> vector<1x384xf32>
    %19 = vector.extract_strided_slice %18 {offsets = [0, 0], sizes = [1, 128], strides = [1, 1]} : vector<1x384xf32> to vector<1x128xf32>
    %20 = vector.extract_strided_slice %18 {offsets = [0, 128], sizes = [1, 128], strides = [1, 1]} : vector<1x384xf32> to vector<1x128xf32>
    %21 = vector.extract_strided_slice %18 {offsets = [0, 256], sizes = [1, 128], strides = [1, 1]} : vector<1x384xf32> to vector<1x128xf32>
    %22 = vector.extract_strided_slice %11 {offsets = [0, 384], sizes = [1, 128], strides = [1, 1]} : vector<1x512xf32> to vector<1x128xf32>
    %23 = math.tanh %22 : vector<1x128xf32>
    %24 = arith.mulf %20, %8 : vector<1x128xf32>
    %25 = arith.mulf %19, %23 : vector<1x128xf32>
    %26 = arith.addf %24, %25 : vector<1x128xf32>
    %27 = math.tanh %26 : vector<1x128xf32>
    %28 = arith.mulf %21, %27 : vector<1x128xf32>
    %29 = tpu.concatenate %28, %9 in 1 : vector<1x128xf32>, vector<1x128xf32> -> vector<1x256xf32>
    %30 = arith.truncf %29 : vector<1x256xf32> to vector<1x256xbf16>
    %c0_11 = arith.constant 0 : index
    %c0_12 = arith.constant 0 : index
    %31 = vector.load %arg2[%c0_11, %c0_12] : memref<256x1024xbf16, #tpu.memory_space<vmem>>, vector<256x1024xbf16>
    %cst_13 = arith.constant dense<0.000000e+00> : vector<1x1024xf32>
    %32 = tpu.matmul %30, %31, %cst_13 {dimension_numbers = #tpu.dot_dimension_numbers<[1], [0], [0], [1], [0, 0, 1, 1], [], []>} : vector<1x256xbf16>, vector<256x1024xbf16>, vector<1x1024xf32> -> vector<1x1024xf32>
    %33 = vector.extract_strided_slice %32 {offsets = [0, 512], sizes = [1, 512], strides = [1, 1]} : vector<1x1024xf32> to vector<1x512xf32>
    %34 = arith.addf %33, %1 : vector<1x512xf32>
    %35 = vector.extract_strided_slice %34 {offsets = [0, 0], sizes = [1, 384], strides = [1, 1]} : vector<1x512xf32> to vector<1x384xf32>
    %cst_14 = arith.constant 0.000000e+00 : f32
    %36 = vector.broadcast %cst_14 : f32 to vector<1x384xf32>
    %37 = arith.subf %36, %35 : vector<1x384xf32>
    %38 = math.exp %37 : vector<1x384xf32>
    %cst_15 = arith.constant 1.000000e+00 : f32
    %39 = vector.broadcast %cst_15 : f32 to vector<1x384xf32>
    %40 = arith.addf %39, %38 : vector<1x384xf32>
    %41 = tpu.reciprocal %40 {approx = true} : vector<1x384xf32> -> vector<1x384xf32>
    %42 = vector.extract_strided_slice %41 {offsets = [0, 0], sizes = [1, 128], strides = [1, 1]} : vector<1x384xf32> to vector<1x128xf32>
    %43 = vector.extract_strided_slice %41 {offsets = [0, 128], sizes = [1, 128], strides = [1, 1]} : vector<1x384xf32> to vector<1x128xf32>
    %44 = vector.extract_strided_slice %41 {offsets = [0, 256], sizes = [1, 128], strides = [1, 1]} : vector<1x384xf32> to vector<1x128xf32>
    %45 = vector.extract_strided_slice %34 {offsets = [0, 384], sizes = [1, 128], strides = [1, 1]} : vector<1x512xf32> to vector<1x128xf32>
    %46 = math.tanh %45 : vector<1x128xf32>
    %47 = arith.mulf %43, %10 : vector<1x128xf32>
    %48 = arith.mulf %42, %46 : vector<1x128xf32>
    %49 = arith.addf %47, %48 : vector<1x128xf32>
    %50 = math.tanh %49 : vector<1x128xf32>
    %51 = arith.mulf %44, %50 : vector<1x128xf32>
    %52 = vector.extract_strided_slice %7 {offsets = [1, 0], sizes = [1, 512], strides = [1, 1]} : vector<8x512xf32> to vector<1x512xf32>
    %53 = vector.extract_strided_slice %32 {offsets = [0, 0], sizes = [1, 512], strides = [1, 1]} : vector<1x1024xf32> to vector<1x512xf32>
    %54 = arith.addf %52, %53 : vector<1x512xf32>
    %55 = vector.extract_strided_slice %54 {offsets = [0, 0], sizes = [1, 384], strides = [1, 1]} : vector<1x512xf32> to vector<1x384xf32>
    %cst_16 = arith.constant 0.000000e+00 : f32
    %56 = vector.broadcast %cst_16 : f32 to vector<1x384xf32>
    %57 = arith.subf %56, %55 : vector<1x384xf32>
    %58 = math.exp %57 : vector<1x384xf32>
    %cst_17 = arith.constant 1.000000e+00 : f32
    %59 = vector.broadcast %cst_17 : f32 to vector<1x384xf32>
    %60 = arith.addf %59, %58 : vector<1x384xf32>
    %61 = tpu.reciprocal %60 {approx = true} : vector<1x384xf32> -> vector<1x384xf32>
    %62 = vector.extract_strided_slice %61 {offsets = [0, 0], sizes = [1, 128], strides = [1, 1]} : vector<1x384xf32> to vector<1x128xf32>
    %63 = vector.extract_strided_slice %61 {offsets = [0, 128], sizes = [1, 128], strides = [1, 1]} : vector<1x384xf32> to vector<1x128xf32>
    %64 = vector.extract_strided_slice %61 {offsets = [0, 256], sizes = [1, 128], strides = [1, 1]} : vector<1x384xf32> to vector<1x128xf32>
    %65 = vector.extract_strided_slice %54 {offsets = [0, 384], sizes = [1, 128], strides = [1, 1]} : vector<1x512xf32> to vector<1x128xf32>
    %66 = math.tanh %65 : vector<1x128xf32>
    %67 = arith.mulf %63, %26 : vector<1x128xf32>
    %68 = arith.mulf %62, %66 : vector<1x128xf32>
    %69 = arith.addf %67, %68 : vector<1x128xf32>
    %70 = math.tanh %69 : vector<1x128xf32>
    %71 = arith.mulf %64, %70 : vector<1x128xf32>
    %72 = tpu.concatenate %71, %51 in 1 : vector<1x128xf32>, vector<1x128xf32> -> vector<1x256xf32>
    %73 = arith.truncf %72 : vector<1x256xf32> to vector<1x256xbf16>
    %c0_18 = arith.constant 0 : index
    %c0_19 = arith.constant 0 : index
    %74 = vector.load %arg2[%c0_18, %c0_19] : memref<256x1024xbf16, #tpu.memory_space<vmem>>, vector<256x1024xbf16>
    %cst_20 = arith.constant dense<0.000000e+00> : vector<1x1024xf32>
    %75 = tpu.matmul %73, %74, %cst_20 {dimension_numbers = #tpu.dot_dimension_numbers<[1], [0], [0], [1], [0, 0, 1, 1], [], []>} : vector<1x256xbf16>, vector<256x1024xbf16>, vector<1x1024xf32> -> vector<1x1024xf32>
    %76 = vector.extract_strided_slice %75 {offsets = [0, 512], sizes = [1, 512], strides = [1, 1]} : vector<1x1024xf32> to vector<1x512xf32>
    %77 = arith.addf %76, %1 : vector<1x512xf32>
    %78 = vector.extract_strided_slice %77 {offsets = [0, 0], sizes = [1, 384], strides = [1, 1]} : vector<1x512xf32> to vector<1x384xf32>
    %cst_21 = arith.constant 0.000000e+00 : f32
    %79 = vector.broadcast %cst_21 : f32 to vector<1x384xf32>
    %80 = arith.subf %79, %78 : vector<1x384xf32>
    %81 = math.exp %80 : vector<1x384xf32>
    %cst_22 = arith.constant 1.000000e+00 : f32
    %82 = vector.broadcast %cst_22 : f32 to vector<1x384xf32>
    %83 = arith.addf %82, %81 : vector<1x384xf32>
    %84 = tpu.reciprocal %83 {approx = true} : vector<1x384xf32> -> vector<1x384xf32>
    %85 = vector.extract_strided_slice %84 {offsets = [0, 0], sizes = [1, 128], strides = [1, 1]} : vector<1x384xf32> to vector<1x128xf32>
    %86 = vector.extract_strided_slice %84 {offsets = [0, 128], sizes = [1, 128], strides = [1, 1]} : vector<1x384xf32> to vector<1x128xf32>
    %87 = vector.extract_strided_slice %84 {offsets = [0, 256], sizes = [1, 128], strides = [1, 1]} : vector<1x384xf32> to vector<1x128xf32>
    %88 = vector.extract_strided_slice %77 {offsets = [0, 384], sizes = [1, 128], strides = [1, 1]} : vector<1x512xf32> to vector<1x128xf32>
    %89 = math.tanh %88 : vector<1x128xf32>
    %90 = arith.mulf %86, %49 : vector<1x128xf32>
    %91 = arith.mulf %85, %89 : vector<1x128xf32>
    %92 = arith.addf %90, %91 : vector<1x128xf32>
    %93 = math.tanh %92 : vector<1x128xf32>
    %94 = arith.mulf %87, %93 : vector<1x128xf32>
    %95 = vector.extract_strided_slice %7 {offsets = [2, 0], sizes = [1, 512], strides = [1, 1]} : vector<8x512xf32> to vector<1x512xf32>
    %96 = vector.extract_strided_slice %75 {offsets = [0, 0], sizes = [1, 512], strides = [1, 1]} : vector<1x1024xf32> to vector<1x512xf32>
    %97 = arith.addf %95, %96 : vector<1x512xf32>
    %98 = vector.extract_strided_slice %97 {offsets = [0, 0], sizes = [1, 384], strides = [1, 1]} : vector<1x512xf32> to vector<1x384xf32>
    %cst_23 = arith.constant 0.000000e+00 : f32
    %99 = vector.broadcast %cst_23 : f32 to vector<1x384xf32>
    %100 = arith.subf %99, %98 : vector<1x384xf32>
    %101 = math.exp %100 : vector<1x384xf32>
    %cst_24 = arith.constant 1.000000e+00 : f32
    %102 = vector.broadcast %cst_24 : f32 to vector<1x384xf32>
    %103 = arith.addf %102, %101 : vector<1x384xf32>
    %104 = tpu.reciprocal %103 {approx = true} : vector<1x384xf32> -> vector<1x384xf32>
    %105 = vector.extract_strided_slice %104 {offsets = [0, 0], sizes = [1, 128], strides = [1, 1]} : vector<1x384xf32> to vector<1x128xf32>
    %106 = vector.extract_strided_slice %104 {offsets = [0, 128], sizes = [1, 128], strides = [1, 1]} : vector<1x384xf32> to vector<1x128xf32>
    %107 = vector.extract_strided_slice %104 {offsets = [0, 256], sizes = [1, 128], strides = [1, 1]} : vector<1x384xf32> to vector<1x128xf32>
    %108 = vector.extract_strided_slice %97 {offsets = [0, 384], sizes = [1, 128], strides = [1, 1]} : vector<1x512xf32> to vector<1x128xf32>
    %109 = math.tanh %108 : vector<1x128xf32>
    %110 = arith.mulf %106, %69 : vector<1x128xf32>
    %111 = arith.mulf %105, %109 : vector<1x128xf32>
    %112 = arith.addf %110, %111 : vector<1x128xf32>
    %113 = math.tanh %112 : vector<1x128xf32>
    %114 = arith.mulf %107, %113 : vector<1x128xf32>
    %115 = tpu.concatenate %114, %94 in 1 : vector<1x128xf32>, vector<1x128xf32> -> vector<1x256xf32>
    %116 = arith.truncf %115 : vector<1x256xf32> to vector<1x256xbf16>
    %c0_25 = arith.constant 0 : index
    %c0_26 = arith.constant 0 : index
    %117 = vector.load %arg2[%c0_25, %c0_26] : memref<256x1024xbf16, #tpu.memory_space<vmem>>, vector<256x1024xbf16>
    %cst_27 = arith.constant dense<0.000000e+00> : vector<1x1024xf32>
    %118 = tpu.matmul %116, %117, %cst_27 {dimension_numbers = #tpu.dot_dimension_numbers<[1], [0], [0], [1], [0, 0, 1, 1], [], []>} : vector<1x256xbf16>, vector<256x1024xbf16>, vector<1x1024xf32> -> vector<1x1024xf32>
    %119 = vector.extract_strided_slice %118 {offsets = [0, 512], sizes = [1, 512], strides = [1, 1]} : vector<1x1024xf32> to vector<1x512xf32>
    %120 = arith.addf %119, %1 : vector<1x512xf32>
    %121 = vector.extract_strided_slice %120 {offsets = [0, 0], sizes = [1, 384], strides = [1, 1]} : vector<1x512xf32> to vector<1x384xf32>
    %cst_28 = arith.constant 0.000000e+00 : f32
    %122 = vector.broadcast %cst_28 : f32 to vector<1x384xf32>
    %123 = arith.subf %122, %121 : vector<1x384xf32>
    %124 = math.exp %123 : vector<1x384xf32>
    %cst_29 = arith.constant 1.000000e+00 : f32
    %125 = vector.broadcast %cst_29 : f32 to vector<1x384xf32>
    %126 = arith.addf %125, %124 : vector<1x384xf32>
    %127 = tpu.reciprocal %126 {approx = true} : vector<1x384xf32> -> vector<1x384xf32>
    %128 = vector.extract_strided_slice %127 {offsets = [0, 0], sizes = [1, 128], strides = [1, 1]} : vector<1x384xf32> to vector<1x128xf32>
    %129 = vector.extract_strided_slice %127 {offsets = [0, 128], sizes = [1, 128], strides = [1, 1]} : vector<1x384xf32> to vector<1x128xf32>
    %130 = vector.extract_strided_slice %127 {offsets = [0, 256], sizes = [1, 128], strides = [1, 1]} : vector<1x384xf32> to vector<1x128xf32>
    %131 = vector.extract_strided_slice %120 {offsets = [0, 384], sizes = [1, 128], strides = [1, 1]} : vector<1x512xf32> to vector<1x128xf32>
    %132 = math.tanh %131 : vector<1x128xf32>
    %133 = arith.mulf %129, %92 : vector<1x128xf32>
    %134 = arith.mulf %128, %132 : vector<1x128xf32>
    %135 = arith.addf %133, %134 : vector<1x128xf32>
    %136 = math.tanh %135 : vector<1x128xf32>
    %137 = arith.mulf %130, %136 : vector<1x128xf32>
    %138 = vector.extract_strided_slice %7 {offsets = [3, 0], sizes = [1, 512], strides = [1, 1]} : vector<8x512xf32> to vector<1x512xf32>
    %139 = vector.extract_strided_slice %118 {offsets = [0, 0], sizes = [1, 512], strides = [1, 1]} : vector<1x1024xf32> to vector<1x512xf32>
    %140 = arith.addf %138, %139 : vector<1x512xf32>
    %141 = vector.extract_strided_slice %140 {offsets = [0, 0], sizes = [1, 384], strides = [1, 1]} : vector<1x512xf32> to vector<1x384xf32>
    %cst_30 = arith.constant 0.000000e+00 : f32
    %142 = vector.broadcast %cst_30 : f32 to vector<1x384xf32>
    %143 = arith.subf %142, %141 : vector<1x384xf32>
    %144 = math.exp %143 : vector<1x384xf32>
    %cst_31 = arith.constant 1.000000e+00 : f32
    %145 = vector.broadcast %cst_31 : f32 to vector<1x384xf32>
    %146 = arith.addf %145, %144 : vector<1x384xf32>
    %147 = tpu.reciprocal %146 {approx = true} : vector<1x384xf32> -> vector<1x384xf32>
    %148 = vector.extract_strided_slice %147 {offsets = [0, 0], sizes = [1, 128], strides = [1, 1]} : vector<1x384xf32> to vector<1x128xf32>
    %149 = vector.extract_strided_slice %147 {offsets = [0, 128], sizes = [1, 128], strides = [1, 1]} : vector<1x384xf32> to vector<1x128xf32>
    %150 = vector.extract_strided_slice %147 {offsets = [0, 256], sizes = [1, 128], strides = [1, 1]} : vector<1x384xf32> to vector<1x128xf32>
    %151 = vector.extract_strided_slice %140 {offsets = [0, 384], sizes = [1, 128], strides = [1, 1]} : vector<1x512xf32> to vector<1x128xf32>
    %152 = math.tanh %151 : vector<1x128xf32>
    %153 = arith.mulf %149, %112 : vector<1x128xf32>
    %154 = arith.mulf %148, %152 : vector<1x128xf32>
    %155 = arith.addf %153, %154 : vector<1x128xf32>
    %156 = math.tanh %155 : vector<1x128xf32>
    %157 = arith.mulf %150, %156 : vector<1x128xf32>
    %158 = tpu.concatenate %157, %137 in 1 : vector<1x128xf32>, vector<1x128xf32> -> vector<1x256xf32>
    %159 = arith.truncf %158 : vector<1x256xf32> to vector<1x256xbf16>
    %c0_32 = arith.constant 0 : index
    %c0_33 = arith.constant 0 : index
    %160 = vector.load %arg2[%c0_32, %c0_33] : memref<256x1024xbf16, #tpu.memory_space<vmem>>, vector<256x1024xbf16>
    %cst_34 = arith.constant dense<0.000000e+00> : vector<1x1024xf32>
    %161 = tpu.matmul %159, %160, %cst_34 {dimension_numbers = #tpu.dot_dimension_numbers<[1], [0], [0], [1], [0, 0, 1, 1], [], []>} : vector<1x256xbf16>, vector<256x1024xbf16>, vector<1x1024xf32> -> vector<1x1024xf32>
    %162 = vector.extract_strided_slice %161 {offsets = [0, 512], sizes = [1, 512], strides = [1, 1]} : vector<1x1024xf32> to vector<1x512xf32>
    %163 = arith.addf %162, %1 : vector<1x512xf32>
    %164 = vector.extract_strided_slice %163 {offsets = [0, 0], sizes = [1, 384], strides = [1, 1]} : vector<1x512xf32> to vector<1x384xf32>
    %cst_35 = arith.constant 0.000000e+00 : f32
    %165 = vector.broadcast %cst_35 : f32 to vector<1x384xf32>
    %166 = arith.subf %165, %164 : vector<1x384xf32>
    %167 = math.exp %166 : vector<1x384xf32>
    %cst_36 = arith.constant 1.000000e+00 : f32
    %168 = vector.broadcast %cst_36 : f32 to vector<1x384xf32>
    %169 = arith.addf %168, %167 : vector<1x384xf32>
    %170 = tpu.reciprocal %169 {approx = true} : vector<1x384xf32> -> vector<1x384xf32>
    %171 = vector.extract_strided_slice %170 {offsets = [0, 0], sizes = [1, 128], strides = [1, 1]} : vector<1x384xf32> to vector<1x128xf32>
    %172 = vector.extract_strided_slice %170 {offsets = [0, 128], sizes = [1, 128], strides = [1, 1]} : vector<1x384xf32> to vector<1x128xf32>
    %173 = vector.extract_strided_slice %170 {offsets = [0, 256], sizes = [1, 128], strides = [1, 1]} : vector<1x384xf32> to vector<1x128xf32>
    %174 = vector.extract_strided_slice %163 {offsets = [0, 384], sizes = [1, 128], strides = [1, 1]} : vector<1x512xf32> to vector<1x128xf32>
    %175 = math.tanh %174 : vector<1x128xf32>
    %176 = arith.mulf %172, %135 : vector<1x128xf32>
    %177 = arith.mulf %171, %175 : vector<1x128xf32>
    %178 = arith.addf %176, %177 : vector<1x128xf32>
    %179 = math.tanh %178 : vector<1x128xf32>
    %180 = arith.mulf %173, %179 : vector<1x128xf32>
    %181 = vector.extract_strided_slice %7 {offsets = [4, 0], sizes = [1, 512], strides = [1, 1]} : vector<8x512xf32> to vector<1x512xf32>
    %182 = vector.extract_strided_slice %161 {offsets = [0, 0], sizes = [1, 512], strides = [1, 1]} : vector<1x1024xf32> to vector<1x512xf32>
    %183 = arith.addf %181, %182 : vector<1x512xf32>
    %184 = vector.extract_strided_slice %183 {offsets = [0, 0], sizes = [1, 384], strides = [1, 1]} : vector<1x512xf32> to vector<1x384xf32>
    %cst_37 = arith.constant 0.000000e+00 : f32
    %185 = vector.broadcast %cst_37 : f32 to vector<1x384xf32>
    %186 = arith.subf %185, %184 : vector<1x384xf32>
    %187 = math.exp %186 : vector<1x384xf32>
    %cst_38 = arith.constant 1.000000e+00 : f32
    %188 = vector.broadcast %cst_38 : f32 to vector<1x384xf32>
    %189 = arith.addf %188, %187 : vector<1x384xf32>
    %190 = tpu.reciprocal %189 {approx = true} : vector<1x384xf32> -> vector<1x384xf32>
    %191 = vector.extract_strided_slice %190 {offsets = [0, 0], sizes = [1, 128], strides = [1, 1]} : vector<1x384xf32> to vector<1x128xf32>
    %192 = vector.extract_strided_slice %190 {offsets = [0, 128], sizes = [1, 128], strides = [1, 1]} : vector<1x384xf32> to vector<1x128xf32>
    %193 = vector.extract_strided_slice %190 {offsets = [0, 256], sizes = [1, 128], strides = [1, 1]} : vector<1x384xf32> to vector<1x128xf32>
    %194 = vector.extract_strided_slice %183 {offsets = [0, 384], sizes = [1, 128], strides = [1, 1]} : vector<1x512xf32> to vector<1x128xf32>
    %195 = math.tanh %194 : vector<1x128xf32>
    %196 = arith.mulf %192, %155 : vector<1x128xf32>
    %197 = arith.mulf %191, %195 : vector<1x128xf32>
    %198 = arith.addf %196, %197 : vector<1x128xf32>
    %199 = math.tanh %198 : vector<1x128xf32>
    %200 = arith.mulf %193, %199 : vector<1x128xf32>
    %201 = tpu.concatenate %200, %180 in 1 : vector<1x128xf32>, vector<1x128xf32> -> vector<1x256xf32>
    %202 = arith.truncf %201 : vector<1x256xf32> to vector<1x256xbf16>
    %c0_39 = arith.constant 0 : index
    %c0_40 = arith.constant 0 : index
    %203 = vector.load %arg2[%c0_39, %c0_40] : memref<256x1024xbf16, #tpu.memory_space<vmem>>, vector<256x1024xbf16>
    %cst_41 = arith.constant dense<0.000000e+00> : vector<1x1024xf32>
    %204 = tpu.matmul %202, %203, %cst_41 {dimension_numbers = #tpu.dot_dimension_numbers<[1], [0], [0], [1], [0, 0, 1, 1], [], []>} : vector<1x256xbf16>, vector<256x1024xbf16>, vector<1x1024xf32> -> vector<1x1024xf32>
    %205 = vector.extract_strided_slice %204 {offsets = [0, 512], sizes = [1, 512], strides = [1, 1]} : vector<1x1024xf32> to vector<1x512xf32>
    %206 = arith.addf %205, %1 : vector<1x512xf32>
    %207 = vector.extract_strided_slice %206 {offsets = [0, 0], sizes = [1, 384], strides = [1, 1]} : vector<1x512xf32> to vector<1x384xf32>
    %cst_42 = arith.constant 0.000000e+00 : f32
    %208 = vector.broadcast %cst_42 : f32 to vector<1x384xf32>
    %209 = arith.subf %208, %207 : vector<1x384xf32>
    %210 = math.exp %209 : vector<1x384xf32>
    %cst_43 = arith.constant 1.000000e+00 : f32
    %211 = vector.broadcast %cst_43 : f32 to vector<1x384xf32>
    %212 = arith.addf %211, %210 : vector<1x384xf32>
    %213 = tpu.reciprocal %212 {approx = true} : vector<1x384xf32> -> vector<1x384xf32>
    %214 = vector.extract_strided_slice %213 {offsets = [0, 0], sizes = [1, 128], strides = [1, 1]} : vector<1x384xf32> to vector<1x128xf32>
    %215 = vector.extract_strided_slice %213 {offsets = [0, 128], sizes = [1, 128], strides = [1, 1]} : vector<1x384xf32> to vector<1x128xf32>
    %216 = vector.extract_strided_slice %213 {offsets = [0, 256], sizes = [1, 128], strides = [1, 1]} : vector<1x384xf32> to vector<1x128xf32>
    %217 = vector.extract_strided_slice %206 {offsets = [0, 384], sizes = [1, 128], strides = [1, 1]} : vector<1x512xf32> to vector<1x128xf32>
    %218 = math.tanh %217 : vector<1x128xf32>
    %219 = arith.mulf %215, %178 : vector<1x128xf32>
    %220 = arith.mulf %214, %218 : vector<1x128xf32>
    %221 = arith.addf %219, %220 : vector<1x128xf32>
    %222 = math.tanh %221 : vector<1x128xf32>
    %223 = arith.mulf %216, %222 : vector<1x128xf32>
    %224 = vector.extract_strided_slice %7 {offsets = [5, 0], sizes = [1, 512], strides = [1, 1]} : vector<8x512xf32> to vector<1x512xf32>
    %225 = vector.extract_strided_slice %204 {offsets = [0, 0], sizes = [1, 512], strides = [1, 1]} : vector<1x1024xf32> to vector<1x512xf32>
    %226 = arith.addf %224, %225 : vector<1x512xf32>
    %227 = vector.extract_strided_slice %226 {offsets = [0, 0], sizes = [1, 384], strides = [1, 1]} : vector<1x512xf32> to vector<1x384xf32>
    %cst_44 = arith.constant 0.000000e+00 : f32
    %228 = vector.broadcast %cst_44 : f32 to vector<1x384xf32>
    %229 = arith.subf %228, %227 : vector<1x384xf32>
    %230 = math.exp %229 : vector<1x384xf32>
    %cst_45 = arith.constant 1.000000e+00 : f32
    %231 = vector.broadcast %cst_45 : f32 to vector<1x384xf32>
    %232 = arith.addf %231, %230 : vector<1x384xf32>
    %233 = tpu.reciprocal %232 {approx = true} : vector<1x384xf32> -> vector<1x384xf32>
    %234 = vector.extract_strided_slice %233 {offsets = [0, 0], sizes = [1, 128], strides = [1, 1]} : vector<1x384xf32> to vector<1x128xf32>
    %235 = vector.extract_strided_slice %233 {offsets = [0, 128], sizes = [1, 128], strides = [1, 1]} : vector<1x384xf32> to vector<1x128xf32>
    %236 = vector.extract_strided_slice %233 {offsets = [0, 256], sizes = [1, 128], strides = [1, 1]} : vector<1x384xf32> to vector<1x128xf32>
    %237 = vector.extract_strided_slice %226 {offsets = [0, 384], sizes = [1, 128], strides = [1, 1]} : vector<1x512xf32> to vector<1x128xf32>
    %238 = math.tanh %237 : vector<1x128xf32>
    %239 = arith.mulf %235, %198 : vector<1x128xf32>
    %240 = arith.mulf %234, %238 : vector<1x128xf32>
    %241 = arith.addf %239, %240 : vector<1x128xf32>
    %242 = math.tanh %241 : vector<1x128xf32>
    %243 = arith.mulf %236, %242 : vector<1x128xf32>
    %244 = tpu.concatenate %243, %223 in 1 : vector<1x128xf32>, vector<1x128xf32> -> vector<1x256xf32>
    %245 = arith.truncf %244 : vector<1x256xf32> to vector<1x256xbf16>
    %c0_46 = arith.constant 0 : index
    %c0_47 = arith.constant 0 : index
    %246 = vector.load %arg2[%c0_46, %c0_47] : memref<256x1024xbf16, #tpu.memory_space<vmem>>, vector<256x1024xbf16>
    %cst_48 = arith.constant dense<0.000000e+00> : vector<1x1024xf32>
    %247 = tpu.matmul %245, %246, %cst_48 {dimension_numbers = #tpu.dot_dimension_numbers<[1], [0], [0], [1], [0, 0, 1, 1], [], []>} : vector<1x256xbf16>, vector<256x1024xbf16>, vector<1x1024xf32> -> vector<1x1024xf32>
    %248 = vector.extract_strided_slice %247 {offsets = [0, 512], sizes = [1, 512], strides = [1, 1]} : vector<1x1024xf32> to vector<1x512xf32>
    %249 = arith.addf %248, %1 : vector<1x512xf32>
    %250 = vector.extract_strided_slice %249 {offsets = [0, 0], sizes = [1, 384], strides = [1, 1]} : vector<1x512xf32> to vector<1x384xf32>
    %cst_49 = arith.constant 0.000000e+00 : f32
    %251 = vector.broadcast %cst_49 : f32 to vector<1x384xf32>
    %252 = arith.subf %251, %250 : vector<1x384xf32>
    %253 = math.exp %252 : vector<1x384xf32>
    %cst_50 = arith.constant 1.000000e+00 : f32
    %254 = vector.broadcast %cst_50 : f32 to vector<1x384xf32>
    %255 = arith.addf %254, %253 : vector<1x384xf32>
    %256 = tpu.reciprocal %255 {approx = true} : vector<1x384xf32> -> vector<1x384xf32>
    %257 = vector.extract_strided_slice %256 {offsets = [0, 0], sizes = [1, 128], strides = [1, 1]} : vector<1x384xf32> to vector<1x128xf32>
    %258 = vector.extract_strided_slice %256 {offsets = [0, 128], sizes = [1, 128], strides = [1, 1]} : vector<1x384xf32> to vector<1x128xf32>
    %259 = vector.extract_strided_slice %256 {offsets = [0, 256], sizes = [1, 128], strides = [1, 1]} : vector<1x384xf32> to vector<1x128xf32>
    %260 = vector.extract_strided_slice %249 {offsets = [0, 384], sizes = [1, 128], strides = [1, 1]} : vector<1x512xf32> to vector<1x128xf32>
    %261 = math.tanh %260 : vector<1x128xf32>
    %262 = arith.mulf %258, %221 : vector<1x128xf32>
    %263 = arith.mulf %257, %261 : vector<1x128xf32>
    %264 = arith.addf %262, %263 : vector<1x128xf32>
    %265 = math.tanh %264 : vector<1x128xf32>
    %266 = arith.mulf %259, %265 : vector<1x128xf32>
    %267 = vector.extract_strided_slice %7 {offsets = [6, 0], sizes = [1, 512], strides = [1, 1]} : vector<8x512xf32> to vector<1x512xf32>
    %268 = vector.extract_strided_slice %247 {offsets = [0, 0], sizes = [1, 512], strides = [1, 1]} : vector<1x1024xf32> to vector<1x512xf32>
    %269 = arith.addf %267, %268 : vector<1x512xf32>
    %270 = vector.extract_strided_slice %269 {offsets = [0, 0], sizes = [1, 384], strides = [1, 1]} : vector<1x512xf32> to vector<1x384xf32>
    %cst_51 = arith.constant 0.000000e+00 : f32
    %271 = vector.broadcast %cst_51 : f32 to vector<1x384xf32>
    %272 = arith.subf %271, %270 : vector<1x384xf32>
    %273 = math.exp %272 : vector<1x384xf32>
    %cst_52 = arith.constant 1.000000e+00 : f32
    %274 = vector.broadcast %cst_52 : f32 to vector<1x384xf32>
    %275 = arith.addf %274, %273 : vector<1x384xf32>
    %276 = tpu.reciprocal %275 {approx = true} : vector<1x384xf32> -> vector<1x384xf32>
    %277 = vector.extract_strided_slice %276 {offsets = [0, 0], sizes = [1, 128], strides = [1, 1]} : vector<1x384xf32> to vector<1x128xf32>
    %278 = vector.extract_strided_slice %276 {offsets = [0, 128], sizes = [1, 128], strides = [1, 1]} : vector<1x384xf32> to vector<1x128xf32>
    %279 = vector.extract_strided_slice %276 {offsets = [0, 256], sizes = [1, 128], strides = [1, 1]} : vector<1x384xf32> to vector<1x128xf32>
    %280 = vector.extract_strided_slice %269 {offsets = [0, 384], sizes = [1, 128], strides = [1, 1]} : vector<1x512xf32> to vector<1x128xf32>
    %281 = math.tanh %280 : vector<1x128xf32>
    %282 = arith.mulf %278, %241 : vector<1x128xf32>
    %283 = arith.mulf %277, %281 : vector<1x128xf32>
    %284 = arith.addf %282, %283 : vector<1x128xf32>
    %285 = math.tanh %284 : vector<1x128xf32>
    %286 = arith.mulf %279, %285 : vector<1x128xf32>
    %287 = tpu.concatenate %286, %266 in 1 : vector<1x128xf32>, vector<1x128xf32> -> vector<1x256xf32>
    %288 = arith.truncf %287 : vector<1x256xf32> to vector<1x256xbf16>
    %c0_53 = arith.constant 0 : index
    %c0_54 = arith.constant 0 : index
    %289 = vector.load %arg2[%c0_53, %c0_54] : memref<256x1024xbf16, #tpu.memory_space<vmem>>, vector<256x1024xbf16>
    %cst_55 = arith.constant dense<0.000000e+00> : vector<1x1024xf32>
    %290 = tpu.matmul %288, %289, %cst_55 {dimension_numbers = #tpu.dot_dimension_numbers<[1], [0], [0], [1], [0, 0, 1, 1], [], []>} : vector<1x256xbf16>, vector<256x1024xbf16>, vector<1x1024xf32> -> vector<1x1024xf32>
    %291 = vector.extract_strided_slice %290 {offsets = [0, 512], sizes = [1, 512], strides = [1, 1]} : vector<1x1024xf32> to vector<1x512xf32>
    %292 = arith.addf %291, %1 : vector<1x512xf32>
    %293 = vector.extract_strided_slice %292 {offsets = [0, 0], sizes = [1, 384], strides = [1, 1]} : vector<1x512xf32> to vector<1x384xf32>
    %cst_56 = arith.constant 0.000000e+00 : f32
    %294 = vector.broadcast %cst_56 : f32 to vector<1x384xf32>
    %295 = arith.subf %294, %293 : vector<1x384xf32>
    %296 = math.exp %295 : vector<1x384xf32>
    %cst_57 = arith.constant 1.000000e+00 : f32
    %297 = vector.broadcast %cst_57 : f32 to vector<1x384xf32>
    %298 = arith.addf %297, %296 : vector<1x384xf32>
    %299 = tpu.reciprocal %298 {approx = true} : vector<1x384xf32> -> vector<1x384xf32>
    %300 = vector.extract_strided_slice %299 {offsets = [0, 0], sizes = [1, 128], strides = [1, 1]} : vector<1x384xf32> to vector<1x128xf32>
    %301 = vector.extract_strided_slice %299 {offsets = [0, 128], sizes = [1, 128], strides = [1, 1]} : vector<1x384xf32> to vector<1x128xf32>
    %302 = vector.extract_strided_slice %299 {offsets = [0, 256], sizes = [1, 128], strides = [1, 1]} : vector<1x384xf32> to vector<1x128xf32>
    %303 = vector.extract_strided_slice %292 {offsets = [0, 384], sizes = [1, 128], strides = [1, 1]} : vector<1x512xf32> to vector<1x128xf32>
    %304 = math.tanh %303 : vector<1x128xf32>
    %305 = arith.mulf %301, %264 : vector<1x128xf32>
    %306 = arith.mulf %300, %304 : vector<1x128xf32>
    %307 = arith.addf %305, %306 : vector<1x128xf32>
    %308 = math.tanh %307 : vector<1x128xf32>
    %309 = arith.mulf %302, %308 : vector<1x128xf32>
    %310 = vector.extract_strided_slice %7 {offsets = [7, 0], sizes = [1, 512], strides = [1, 1]} : vector<8x512xf32> to vector<1x512xf32>
    %311 = vector.extract_strided_slice %290 {offsets = [0, 0], sizes = [1, 512], strides = [1, 1]} : vector<1x1024xf32> to vector<1x512xf32>
    %312 = arith.addf %310, %311 : vector<1x512xf32>
    %313 = vector.extract_strided_slice %312 {offsets = [0, 0], sizes = [1, 384], strides = [1, 1]} : vector<1x512xf32> to vector<1x384xf32>
    %cst_58 = arith.constant 0.000000e+00 : f32
    %314 = vector.broadcast %cst_58 : f32 to vector<1x384xf32>
    %315 = arith.subf %314, %313 : vector<1x384xf32>
    %316 = math.exp %315 : vector<1x384xf32>
    %cst_59 = arith.constant 1.000000e+00 : f32
    %317 = vector.broadcast %cst_59 : f32 to vector<1x384xf32>
    %318 = arith.addf %317, %316 : vector<1x384xf32>
    %319 = tpu.reciprocal %318 {approx = true} : vector<1x384xf32> -> vector<1x384xf32>
    %320 = vector.extract_strided_slice %319 {offsets = [0, 0], sizes = [1, 128], strides = [1, 1]} : vector<1x384xf32> to vector<1x128xf32>
    %321 = vector.extract_strided_slice %319 {offsets = [0, 128], sizes = [1, 128], strides = [1, 1]} : vector<1x384xf32> to vector<1x128xf32>
    %322 = vector.extract_strided_slice %319 {offsets = [0, 256], sizes = [1, 128], strides = [1, 1]} : vector<1x384xf32> to vector<1x128xf32>
    %323 = vector.extract_strided_slice %312 {offsets = [0, 384], sizes = [1, 128], strides = [1, 1]} : vector<1x512xf32> to vector<1x128xf32>
    %324 = math.tanh %323 : vector<1x128xf32>
    %325 = arith.mulf %321, %284 : vector<1x128xf32>
    %326 = arith.mulf %320, %324 : vector<1x128xf32>
    %327 = arith.addf %325, %326 : vector<1x128xf32>
    %328 = math.tanh %327 : vector<1x128xf32>
    %329 = arith.mulf %322, %328 : vector<1x128xf32>
    %330 = tpu.concatenate %329, %309 in 1 : vector<1x128xf32>, vector<1x128xf32> -> vector<1x256xf32>
    %331 = arith.truncf %330 : vector<1x256xf32> to vector<1x256xbf16>
    %c0_60 = arith.constant 0 : index
    %c0_61 = arith.constant 0 : index
    %332 = vector.load %arg2[%c0_60, %c0_61] : memref<256x1024xbf16, #tpu.memory_space<vmem>>, vector<256x1024xbf16>
    %cst_62 = arith.constant dense<0.000000e+00> : vector<1x1024xf32>
    %333 = tpu.matmul %331, %332, %cst_62 {dimension_numbers = #tpu.dot_dimension_numbers<[1], [0], [0], [1], [0, 0, 1, 1], [], []>} : vector<1x256xbf16>, vector<256x1024xbf16>, vector<1x1024xf32> -> vector<1x1024xf32>
    %334 = vector.extract_strided_slice %333 {offsets = [0, 512], sizes = [1, 512], strides = [1, 1]} : vector<1x1024xf32> to vector<1x512xf32>
    %335 = arith.addf %334, %1 : vector<1x512xf32>
    %336 = vector.extract_strided_slice %335 {offsets = [0, 0], sizes = [1, 384], strides = [1, 1]} : vector<1x512xf32> to vector<1x384xf32>
    %cst_63 = arith.constant 0.000000e+00 : f32
    %337 = vector.broadcast %cst_63 : f32 to vector<1x384xf32>
    %338 = arith.subf %337, %336 : vector<1x384xf32>
    %339 = math.exp %338 : vector<1x384xf32>
    %cst_64 = arith.constant 1.000000e+00 : f32
    %340 = vector.broadcast %cst_64 : f32 to vector<1x384xf32>
    %341 = arith.addf %340, %339 : vector<1x384xf32>
    %342 = tpu.reciprocal %341 {approx = true} : vector<1x384xf32> -> vector<1x384xf32>
    %343 = vector.extract_strided_slice %342 {offsets = [0, 0], sizes = [1, 128], strides = [1, 1]} : vector<1x384xf32> to vector<1x128xf32>
    %344 = vector.extract_strided_slice %342 {offsets = [0, 128], sizes = [1, 128], strides = [1, 1]} : vector<1x384xf32> to vector<1x128xf32>
    %345 = vector.extract_strided_slice %342 {offsets = [0, 256], sizes = [1, 128], strides = [1, 1]} : vector<1x384xf32> to vector<1x128xf32>
    %346 = vector.extract_strided_slice %335 {offsets = [0, 384], sizes = [1, 128], strides = [1, 1]} : vector<1x512xf32> to vector<1x128xf32>
    %347 = math.tanh %346 : vector<1x128xf32>
    %348 = arith.mulf %344, %307 : vector<1x128xf32>
    %349 = arith.mulf %343, %347 : vector<1x128xf32>
    %350 = arith.addf %348, %349 : vector<1x128xf32>
    %351 = math.tanh %350 : vector<1x128xf32>
    %352 = arith.mulf %345, %351 : vector<1x128xf32>
    %c2 = arith.constant 2 : index
    %c0_65 = arith.constant 0 : index
    %353 = vector.load %arg3[%c2, %c0_65] : memref<8x512xf32, #tpu.memory_space<vmem>>, vector<1x128xf32>
    %354 = arith.mulf %352, %353 : vector<1x128xf32>
    %cst_66 = arith.constant dense<0.000000e+00> : vector<1xf32>
    %355 = vector.multi_reduction <add>, %354, %cst_66 [1] : vector<1x128xf32> to vector<1xf32>
    %356 = vector.shape_cast %355 : vector<1xf32> to vector<1x1xf32>
    %c3 = arith.constant 3 : index
    %c0_67 = arith.constant 0 : index
    %357 = vector.load %arg3[%c3, %c0_67] : memref<8x512xf32, #tpu.memory_space<vmem>>, vector<1x128xf32>
    %358 = vector.broadcast %356 : vector<1x1xf32> to vector<1x128xf32>
    %359 = arith.addf %358, %357 : vector<1x128xf32>
    %c0_68 = arith.constant 0 : index
    %c0_69 = arith.constant 0 : index
    %360 = vector.load %arg4[%c0_68, %c0_69] : memref<1x128xf32, #tpu.memory_space<vmem>>, vector<1x128xf32>
    tpu.vector_store %arg4[%c0_68, %c0_69], %359 {strides = array<i32>} : memref<1x128xf32, #tpu.memory_space<vmem>>, vector<1x128xf32>,
    return
  }
}

</mosaic_0001>

<bundles_post_ra>
// kernel: tpu_custom_call.1
= control target key start
LH: loop header
LB: loop body
LE: loop exit
PB: predicated region body
PF: predicated region fallthrough
CT: control target
= control target key end

     0   :  { %9 = vsyncpa [#allocation3], 0  ;;  %s4881_s0 = inlined_call_operand.hbm [shape: f32[8,8], index: 0, kind: input, shape index: {}]   ;;  %s4882_s1 = inlined_call_operand.hbm [shape: bf16[8,512], index: 1, kind: input, shape index: {}]   ;;  %s4883_s2 = inlined_call_operand.hbm [shape: bf16[256,1024], index: 2, kind: input, shape index: {}]   ;;  %s4884_s3 = inlined_call_operand.hbm [shape: f32[8,512], index: 3, kind: input, shape index: {}]   ;;  %s4885_s4 = inlined_call_operand.hbm [shape: f32[1,128], index: 4, kind: output, shape index: {}]  }
   0x1   :  { %10 = vsyncpa [#allocation6], 0 }
   0x2   :  { %11 = vsyncpa [#allocation9], 0 }
   0x3   :  { %12 = vsyncpa [#allocation4], 0  ;;  %s3367_s15 = smov [#allocation5]   ;;  %s3368_s17 = smov [#allocation2]  }
   0x4   :  { %s29_s16 = sshll.u32 %s3367_s15, 4  ;;  %s19_s18 = sshll.u32 %s3368_s17, 4  ;;  %s30_s16 = int_to_ptr.vmem [resolvable:$true] %s29_s16  ;;  %s20_s18 = int_to_ptr.vmem [resolvable:$true] %s19_s18 }
   0x5   :  { %s3249_s21 = scalar_lea.hbm %s4882_s1, 256 }
   0x6   :  { %p3250_p0 = scmp.ne.s32.totalorder %s4882_s1, %s3249_s21  ;;  %p3253_p1 = scmp.lt.u32.totalorder %s3249_s21, %s4882_s1 }
   0x8   :  { %p3255_p2 = pnand %p3253_p1, %p3250_p0 }
   0xa   :  { %3258 = shalt.err (!%p3255_p2)
}
   0xb   :  { %s3259_s26 = scalar_lea.vmem %s30_s16, 256  ;;  %p3264_p4 = scmp.lt.s32.totalorder %s30_s16, %s30_s16 }
   0xc   :  { %p3260_p3 = scmp.ne.s32.totalorder %s30_s16, %s3259_s26  ;;  %p3265_p5 = scmp.lt.s32.totalorder %s3259_s26, %s3259_s26 }
   0xe   :  { %p3266_p6 = por %p3265_p5, %p3264_p4 }
  0x10   :  { %p3267_p7 = pnand %p3266_p6, %p3260_p3 }
  0x12   :  { %3270 = shalt.err (!%p3267_p7)
}
  0x13   :  { %32 = dma.hbm_to_vmem [thread:$0]  %s4882_s1, 256, %s30_s16, [#allocation6]  }
  0x14   :  { %s3271_s5 = scalar_lea.hbm %s4881_s0, 128 }
  0x15   :  { %p3272_p8 = scmp.ne.s32.totalorder %s4881_s0, %s3271_s5  ;;  %p3275_p9 = scmp.lt.u32.totalorder %s3271_s5, %s4881_s0 }
  0x17   :  { %p3277_p10 = pnand %p3275_p9, %p3272_p8 }
  0x19   :  { %3280 = shalt.err (!%p3277_p10)
}
  0x1a   :  { %s3281_s10 = scalar_lea.vmem %s20_s18, 128  ;;  %p3286_p12 = scmp.lt.s32.totalorder %s20_s18, %s20_s18 }
  0x1b   :  { %p3282_p11 = scmp.ne.s32.totalorder %s20_s18, %s3281_s10  ;;  %p3287_p13 = scmp.lt.s32.totalorder %s3281_s10, %s3281_s10 }
  0x1d   :  { %p3288_p0 = por %p3287_p13, %p3286_p12 }
  0x1f   :  { %p3289_p1 = pnand %p3288_p0, %p3282_p11 }
  0x21   :  { %3292 = shalt.err (!%p3289_p1)
}
  0x22   :  { %22 = dma.hbm_to_vmem [thread:$0]  %s4881_s0, 128, %s20_s18, [#allocation3]  }
  0x23   :  { %s3369_s12 = smov [#allocation7]   ;;  %s3293_s16 = scalar_lea.hbm %s4883_s2, 16384 }
  0x24   :  { %s38_s13 = sshll.u32 %s3369_s12, 4  ;;  %p3294_p2 = scmp.ne.s32.totalorder %s4883_s2, %s3293_s16  ;;  %s39_s13 = int_to_ptr.vmem [resolvable:$true] %s38_s13 }
  0x25   :  { %p3297_p3 = scmp.lt.u32.totalorder %s3293_s16, %s4883_s2 }
  0x27   :  { %p3299_p4 = pnand %p3297_p3, %p3294_p2 }
  0x29   :  { %3302 = shalt.err (!%p3299_p4)
}
  0x2a   :  { %s3303_s22 = scalar_lea.vmem %s39_s13, 16384  ;;  %p3308_p6 = scmp.lt.s32.totalorder %s39_s13, %s39_s13 }
  0x2b   :  { %p3304_p5 = scmp.ne.s32.totalorder %s39_s13, %s3303_s22  ;;  %p3309_p7 = scmp.lt.s32.totalorder %s3303_s22, %s3303_s22 }
  0x2d   :  { %p3310_p8 = por %p3309_p7, %p3308_p6 }
  0x2f   :  { %p3311_p9 = pnand %p3310_p8, %p3304_p5 }
  0x31   :  { %3314 = shalt.err (!%p3311_p9)
}
  0x32   :  { %s3370_s0 = smov 512   ;;  %s3371_s18 = smov 32  }
  0x33   :  { %44 = dma.hbm_to_vmem [thread:$0]  %s4883_s2, 16384, %s39_s13, [#allocation6], %s3370_s0, %s3370_s0, %s3371_s18  }
  0x34   :  { %s3372_s25 = smov [#allocation8]   ;;  %s3315_s29 = scalar_lea.hbm %s4884_s3, 512 }
  0x35   :  { %s51_s26 = sshll.u32 %s3372_s25, 4  ;;  %p3316_p10 = scmp.ne.s32.totalorder %s4884_s3, %s3315_s29  ;;  %s52_s26 = int_to_ptr.vmem [resolvable:$true] %s51_s26 }
  0x36   :  { %p3319_p11 = scmp.lt.u32.totalorder %s3315_s29, %s4884_s3 }
  0x38   :  { %p3321_p12 = pnand %p3319_p11, %p3316_p10 }
  0x3a   :  { %3324 = shalt.err (!%p3321_p12)
}
  0x3b   :  { %s3325_s8 = scalar_lea.vmem %s52_s26, 512  ;;  %p3330_p0 = scmp.lt.s32.totalorder %s52_s26, %s52_s26 }
  0x3c   :  { %p3326_p13 = scmp.ne.s32.totalorder %s52_s26, %s3325_s8  ;;  %p3331_p1 = scmp.lt.s32.totalorder %s3325_s8, %s3325_s8 }
  0x3e   :  { %p3332_p2 = por %p3331_p1, %p3330_p0 }
  0x40   :  { %p3333_p3 = pnand %p3332_p2, %p3326_p13 }
  0x42   :  { %3336 = shalt.err (!%p3333_p3)
}
  0x43   :  { %54 = dma.hbm_to_vmem [thread:$0]  %s4884_s3, 512, %s52_s26, [#allocation9]  }
  0x44   :  { %3359 = dma.done.wait [#allocation3], 128  }
  0x45   :  { %3360 = vsyncadd [#allocation3], 4294967168 }
  0x46   :  { %3361 = dma.done.wait [#allocation6], 16640  }
  0x47   :  { %3362 = vsyncadd [#allocation6], 4294950656 }
  0x48   :  { %3363 = dma.done.wait [#allocation9], 512  }
  0x49   :  { %3364 = vsyncadd [#allocation9], 4294966784  ;;  %v3373_v0 = vmov 0   ;;  %v73_v1 = vld [vmem:[#allocation5] sm:$0xff]  ;;  %vm110_vm0 = vcmask 1043456   ;;  %v71_v2 = vld [vmem:[#allocation2] sm:$0xff] }
  0x4a   :  { %155 = vmatprep.mubr.bf16.mxu0 %v3373_v0  ;;  %196 = vmatprep.mubr.bf16.mxu1 %v3373_v0  ;;  %v74_v3 = vld [vmem:[#allocation5 + $0x8] sm:$0xff]  ;;  %v2845_v4 = vcombine.high %v73_v1, %v73_v1  ;;  %v2844_v5 = vcombine.low %v73_v1, %v73_v1  ;;  %v228_v7 = vld [vmem:[#allocation7] sm:$0xff]  ;;  %v229_v9 = vld [vmem:[#allocation7 + $0x8] sm:$0xff]  ;;  %v72_v16 = vpack.c.bf16 %v71_v2, %v71_v2  ;;  %vm106_vm1 = vcmask 64512   ;;  %s3375_s3 = smov [#allocation10]  }
  0x4b   :  { %v2847_v6 = vcombine.high %v74_v3, %v74_v3  ;;  %v232_v8 = vld [vmem:[#allocation7 + $0x20] sm:$0xff]  ;;  %v2846_v10 = vcombine.low %v74_v3, %v74_v3  ;;  %v233_v12 = vld [vmem:[#allocation7 + $0x28] sm:$0xff]  ;;  %vm2820_vm2 = vcmask 1040384   ;;  %s2833_s10 = sshll.u32 %s3375_s3, 4  ;;  %s2834_s10 = int_to_ptr.vmem [resolvable:$true] %s2833_s10 }
  0x4c   :  { %v3449_v11 = vcombine.high %v228_v7, %v232_v8  ;;  %v236_v13 = vld [vmem:[#allocation7 + $0x40] sm:$0xff]  ;;  %2848 = vmatprep.subr.msk.bf16.mxu0 %vm110_vm0, %v2845_v4  ;;  %v112_v15 = vsel %vm110_vm0, %v2844_v5, 0  ;;  %v3454_v17 = vcombine.high %v229_v9, %v233_v12  ;;  %v237_v18 = vld [vmem:[#allocation7 + $0x48] sm:$0xff]  ;;  %v3457_v21 = vcombine.low %v228_v7, %v232_v8  ;;  %s3337_s1 = scalar_lea.vmem %s2834_s10, 16  ;;  %s3341_s11 = scalar_lea.vmem %s2834_s10, 32 }
  0x4d   :  { %v240_v14 = vld [vmem:[#allocation7 + $0x60] sm:$0xff]  ;;  %2850 = vmatprep.subr.msk.bf16.mxu1 %vm110_vm0, %v2847_v6  ;;  %v241_v19 = vld [vmem:[#allocation7 + $0x68] sm:$0xff]  ;;  %124 = vmatpush1.bf16.msra.mxu0 %v112_v15  ;;  %v118_v20 = vsel %vm110_vm0, %v2846_v10, 0  ;;  %v3460_v22 = vcombine.low %v229_v9, %v233_v12  ;;  %v4886_v8 = vmov 0.0|0.0   ;;  %p3338_p4 = scmp.ne.s32.totalorder %s2834_s10, %s3337_s1  ;;  %p3342_p5 = scmp.lt.s32.totalorder %s2834_s10, %s2834_s10 }
  0x4e   :  { %5189 = vst [vmem:[#allocation15_spill] sm:$0xff] %v3449_v11  ;;  %5190 = vst [vmem:[#allocation16_spill] sm:$0xff] %v3454_v17  ;;  %165 = vmatpush1.bf16.msra.mxu1 %v118_v20  ;;  %996 = vmatprep.subr.bf16.mxu0 %v3449_v11  ;;  %v3462_v23 = vcombine.high %v236_v13, %v240_v14  ;;  %v3465_v24 = vcombine.high %v237_v18, %v241_v19  ;;  %v244_v25 = vld [vmem:[#allocation7 + $0x80] sm:$0xff]  ;;  %v245_v27 = vld [vmem:[#allocation7 + $0x88] sm:$0xff]  ;;  %p3343_p6 = scmp.lt.s32.totalorder %s3341_s11, %s3337_s1 }
  0x4f   :  { %5191 = vst [vmem:[#allocation17_spill] sm:$0xff] %v3457_v21  ;;  %5192 = vst [vmem:[#allocation18_spill] sm:$0xff] %v3460_v22  ;;  %1037 = vmatprep.subr.bf16.mxu1 %v3454_v17  ;;  %v248_v26 = vld [vmem:[#allocation7 + $0xa0] sm:$0xff]  ;;  %v249_v28 = vld [vmem:[#allocation7 + $0xa8] sm:$0xff]  ;;  %v3468_v29 = vcombine.low %v236_v13, %v240_v14  ;;  %v3472_v30 = vcombine.low %v237_v18, %v241_v19 }
  0x50   :  { %5193 = vst [vmem:[#allocation19_spill] sm:$0xff] %v3462_v23  ;;  %5194 = vst [vmem:[#allocation20_spill] sm:$0xff] %v3465_v24  ;;  %2849 = vmatmul.mubr.msk.bf16.vlgmr.msra.gmra.mrb[0].mxu0 %vm106_vm1, %v72_v16  ;;  %v3474_v31 = vcombine.high %v244_v25, %v248_v26  ;;  %v3477_v32 = vcombine.high %v245_v27, %v249_v28  ;;  %v252_v33 = vld [vmem:[#allocation7 + $0xc0] sm:$0xff]  ;;  %v253_v35 = vld [vmem:[#allocation7 + $0xc8] sm:$0xff]  ;;  %v3480_v37 = vcombine.low %v244_v25, %v248_v26  ;;  %p3344_p7 = por %p3343_p6, %p3342_p5 }
  0x51   :  { %2851 = vmatmul.mubr.msk.bf16.vlgmr.msra.gmra.mrb[0].mxu1 %vm106_vm1, %v72_v16  ;;  %997 = vmatpush1.bf16.msra.mxu0 %v3457_v21  ;;  %5195 = vst [vmem:[#allocation21_spill] sm:$0xff] %v3468_v29  ;;  %5196 = vst [vmem:[#allocation22_spill] sm:$0xff] %v3472_v30  ;;  %v256_v34 = vld [vmem:[#allocation7 + $0xe0] sm:$0xff]  ;;  %v257_v36 = vld [vmem:[#allocation7 + $0xe8] sm:$0xff]  ;;  %v3484_v38 = vcombine.low %v245_v27, %v249_v28 }
  0x52   :  { %1038 = vmatpush1.bf16.msra.mxu1 %v3460_v22  ;;  %998 = vmatprep.subr.bf16.mxu0 %v3462_v23  ;;  %5197 = vst [vmem:[#allocation23_spill] sm:$0xff] %v3474_v31  ;;  %5198 = vst [vmem:[#allocation24_spill] sm:$0xff] %v3477_v32  ;;  %v3486_v39 = vcombine.high %v252_v33, %v256_v34  ;;  %v3489_v40 = vcombine.high %v253_v35, %v257_v36  ;;  %v260_v43 = vld [vmem:[#allocation7 + $0x100] sm:$0xff]  ;;  %v261_v45 = vld [vmem:[#allocation7 + $0x108] sm:$0xff]  ;;  %p3345_p8 = pnand %p3344_p7, %p3338_p4 }
  0x53   :  { %1039 = vmatprep.subr.bf16.mxu1 %v3465_v24  ;;  %5199 = vst [vmem:[#allocation25_spill] sm:$0xff] %v3480_v37  ;;  %5200 = vst [vmem:[#allocation26_spill] sm:$0xff] %v3484_v38  ;;  %v3492_v41 = vcombine.low %v252_v33, %v256_v34  ;;  %v3496_v42 = vcombine.low %v253_v35, %v257_v36  ;;  %v264_v44 = vld [vmem:[#allocation7 + $0x120] sm:$0xff]  ;;  %v265_v47 = vld [vmem:[#allocation7 + $0x128] sm:$0xff]  ;;  %1028 = vmatprep.mubr.bf16.mxu0 %v4886_v8 }
  0x54   :  { %5201 = vst [vmem:[#allocation27_spill] sm:$0xff] %v3486_v39  ;;  %5202 = vst [vmem:[#allocation28_spill] sm:$0xff] %v3489_v40  ;;  %v3501_v46 = vcombine.high %v260_v43, %v264_v44  ;;  %v3503_v48 = vcombine.high %v261_v45, %v265_v47  ;;  %v3505_v49 = vcombine.low %v260_v43, %v264_v44  ;;  %v268_v51 = vld [vmem:[#allocation7 + $0x140] sm:$0xff]  ;;  %v269_v53 = vld [vmem:[#allocation7 + $0x148] sm:$0xff]  ;;  %1069 = vmatprep.mubr.bf16.mxu1 %v4886_v8 }
  0x55   :  { %999 = vmatpush1.bf16.msra.mxu0 %v3468_v29  ;;  %5203 = vst [vmem:[#allocation29_spill] sm:$0xff] %v3492_v41  ;;  %5204 = vst [vmem:[#allocation30_spill] sm:$0xff] %v3496_v42  ;;  %v3507_v50 = vcombine.low %v261_v45, %v265_v47  ;;  %v272_v52 = vld [vmem:[#allocation7 + $0x160] sm:$0xff]  ;;  %v273_v55 = vld [vmem:[#allocation7 + $0x168] sm:$0xff] }
  0x56   :  { %1040 = vmatpush1.bf16.msra.mxu1 %v3472_v30  ;;  %1000 = vmatprep.subr.bf16.mxu0 %v3474_v31  ;;  %5205 = vst [vmem:[#allocation31_spill] sm:$0xff] %v3501_v46  ;;  %5206 = vst [vmem:[#allocation32_spill] sm:$0xff] %v3503_v48  ;;  %v3513_v54 = vcombine.high %v268_v51, %v272_v52  ;;  %v3515_v56 = vcombine.high %v269_v53, %v273_v55  ;;  %v276_v59 = vld [vmem:[#allocation7 + $0x180] sm:$0xff]  ;;  %v277_v61 = vld [vmem:[#allocation7 + $0x188] sm:$0xff] }
  0x57   :  { %1041 = vmatprep.subr.bf16.mxu1 %v3477_v32  ;;  %5207 = vst [vmem:[#allocation33_spill] sm:$0xff] %v3505_v49  ;;  %5208 = vst [vmem:[#allocation34_spill] sm:$0xff] %v3507_v50  ;;  %v3517_v57 = vcombine.low %v268_v51, %v272_v52  ;;  %v3519_v58 = vcombine.low %v269_v53, %v273_v55  ;;  %v280_v60 = vld [vmem:[#allocation7 + $0x1a0] sm:$0xff]  ;;  %v281_v63 = vld [vmem:[#allocation7 + $0x1a8] sm:$0xff] }
  0x58   :  { %5209 = vst [vmem:[#allocation35_spill] sm:$0xff] %v3513_v54  ;;  %5210 = vst [vmem:[#allocation36_spill] sm:$0xff] %v3515_v56  ;;  %v3525_v62 = vcombine.high %v276_v59, %v280_v60  ;;  %v3527_v0 = vcombine.low %v276_v59, %v280_v60  ;;  %v284_v1 = vld [vmem:[#allocation7 + $0x1c0] sm:$0xff]  ;;  %v3529_v3 = vcombine.high %v277_v61, %v281_v63  ;;  %v285_v5 = vld [vmem:[#allocation7 + $0x1c8] sm:$0xff] }
  0x59   :  { %1001 = vmatpush1.bf16.msra.mxu0 %v3480_v37  ;;  %5211 = vst [vmem:[#allocation37_spill] sm:$0xff] %v3517_v57  ;;  %5212 = vst [vmem:[#allocation38_spill] sm:$0xff] %v3519_v58  ;;  %v288_v2 = vld [vmem:[#allocation7 + $0x1e0] sm:$0xff]  ;;  %v3531_v4 = vcombine.low %v277_v61, %v281_v63  ;;  %v289_v6 = vld [vmem:[#allocation7 + $0x1e8] sm:$0xff] }
  0x5a   :  { %1042 = vmatpush1.bf16.msra.mxu1 %v3484_v38  ;;  %1002 = vmatprep.subr.bf16.mxu0 %v3486_v39  ;;  %5213 = vst [vmem:[#allocation39_spill] sm:$0xff] %v3525_v62  ;;  %5214 = vst [vmem:[#allocation40_spill] sm:$0xff] %v3527_v0  ;;  %v292_v7 = vld [vmem:[#allocation7 + $0x200] sm:$0xff]  ;;  %v3535_v9 = vcombine.high %v284_v1, %v288_v2  ;;  %v3537_v10 = vcombine.high %v285_v5, %v289_v6  ;;  %v293_v13 = vld [vmem:[#allocation7 + $0x208] sm:$0xff] }
  0x5b   :  { %1043 = vmatprep.subr.bf16.mxu1 %v3489_v40  ;;  %5215 = vst [vmem:[#allocation41_spill] sm:$0xff] %v3529_v3  ;;  %5216 = vst [vmem:[#allocation42_spill] sm:$0xff] %v3531_v4  ;;  %v296_v12 = vld [vmem:[#allocation7 + $0x220] sm:$0xff]  ;;  %v297_v14 = vld [vmem:[#allocation7 + $0x228] sm:$0xff]  ;;  %v3541_v15 = vcombine.low %v284_v1, %v288_v2  ;;  %v3545_v16 = vcombine.low %v285_v5, %v289_v6 }
  0x5c   :  { %5217 = vst [vmem:[#allocation43_spill] sm:$0xff] %v3535_v9  ;;  %5218 = vst [vmem:[#allocation44_spill] sm:$0xff] %v3537_v10  ;;  %v3547_v18 = vcombine.high %v292_v7, %v296_v12  ;;  %v3550_v19 = vcombine.high %v293_v13, %v297_v14  ;;  %v300_v20 = vld [vmem:[#allocation7 + $0x240] sm:$0xff]  ;;  %v301_v26 = vld [vmem:[#allocation7 + $0x248] sm:$0xff]  ;;  %v3554_v28 = vcombine.low %v292_v7, %v296_v12 }
  0x5d   :  { %1003 = vmatpush1.bf16.msra.mxu0 %v3492_v41  ;;  %5219 = vst [vmem:[#allocation45_spill] sm:$0xff] %v3541_v15  ;;  %5220 = vst [vmem:[#allocation46_spill] sm:$0xff] %v3545_v16  ;;  %v304_v25 = vld [vmem:[#allocation7 + $0x260] sm:$0xff]  ;;  %v305_v27 = vld [vmem:[#allocation7 + $0x268] sm:$0xff]  ;;  %v3558_v33 = vcombine.low %v293_v13, %v297_v14 }
  0x5e   :  { %1044 = vmatpush1.bf16.msra.mxu1 %v3496_v42  ;;  %1004 = vmatprep.subr.bf16.mxu0 %v3501_v46  ;;  %5221 = vst [vmem:[#allocation47_spill] sm:$0xff] %v3547_v18  ;;  %5222 = vst [vmem:[#allocation48_spill] sm:$0xff] %v3550_v19  ;;  %v3560_v34 = vcombine.high %v300_v20, %v304_v25  ;;  %v3563_v35 = vcombine.high %v301_v26, %v305_v27  ;;  %v308_v36 = vld [vmem:[#allocation7 + $0x280] sm:$0xff]  ;;  %v309_v44 = vld [vmem:[#allocation7 + $0x288] sm:$0xff] }
  0x5f   :  { %1045 = vmatprep.subr.bf16.mxu1 %v3503_v48  ;;  %5223 = vst [vmem:[#allocation49_spill] sm:$0xff] %v3554_v28  ;;  %5224 = vst [vmem:[#allocation50_spill] sm:$0xff] %v3558_v33  ;;  %v312_v43 = vld [vmem:[#allocation7 + $0x2a0] sm:$0xff]  ;;  %v313_v45 = vld [vmem:[#allocation7 + $0x2a8] sm:$0xff]  ;;  %v3566_v47 = vcombine.low %v300_v20, %v304_v25  ;;  %v3570_v51 = vcombine.low %v301_v26, %v305_v27 }
  0x60   :  { %5225 = vst [vmem:[#allocation51_spill] sm:$0xff] %v3560_v34  ;;  %5226 = vst [vmem:[#allocation52_spill] sm:$0xff] %v3563_v35  ;;  %v3572_v52 = vcombine.high %v308_v36, %v312_v43  ;;  %v3575_v53 = vcombine.high %v309_v44, %v313_v45  ;;  %v316_v55 = vld [vmem:[#allocation7 + $0x2c0] sm:$0xff]  ;;  %v317_v60 = vld [vmem:[#allocation7 + $0x2c8] sm:$0xff]  ;;  %v3578_v63 = vcombine.low %v308_v36, %v312_v43 }
  0x61   :  { %1005 = vmatpush1.bf16.msra.mxu0 %v3505_v49  ;;  %5227 = vst [vmem:[#allocation53_spill] sm:$0xff] %v3566_v47  ;;  %5228 = vst [vmem:[#allocation54_spill] sm:$0xff] %v3570_v51  ;;  %v320_v59 = vld [vmem:[#allocation7 + $0x2e0] sm:$0xff]  ;;  %v321_v61 = vld [vmem:[#allocation7 + $0x2e8] sm:$0xff]  ;;  %v3582_v1 = vcombine.low %v309_v44, %v313_v45 }
  0x62   :  { %1046 = vmatpush1.bf16.msra.mxu1 %v3507_v50  ;;  %1006 = vmatprep.subr.bf16.mxu0 %v3513_v54  ;;  %5229 = vst [vmem:[#allocation55_spill] sm:$0xff] %v3572_v52  ;;  %5230 = vst [vmem:[#allocation56_spill] sm:$0xff] %v3575_v53  ;;  %v3584_v2 = vcombine.high %v316_v55, %v320_v59  ;;  %v3587_v5 = vcombine.high %v317_v60, %v321_v61  ;;  %v324_v6 = vld [vmem:[#allocation7 + $0x300] sm:$0xff]  ;;  %v325_v12 = vld [vmem:[#allocation7 + $0x308] sm:$0xff] }
  0x63   :  { %1047 = vmatprep.subr.bf16.mxu1 %v3515_v56  ;;  %5231 = vst [vmem:[#allocation57_spill] sm:$0xff] %v3578_v63  ;;  %5232 = vst [vmem:[#allocation58_spill] sm:$0xff] %v3582_v1  ;;  %v328_v7 = vld [vmem:[#allocation7 + $0x320] sm:$0xff]  ;;  %v329_v13 = vld [vmem:[#allocation7 + $0x328] sm:$0xff]  ;;  %v3590_v14 = vcombine.low %v316_v55, %v320_v59  ;;  %v3594_v20 = vcombine.low %v317_v60, %v321_v61 }
  0x64   :  { %5233 = vst [vmem:[#allocation59_spill] sm:$0xff] %v3584_v2  ;;  %5234 = vst [vmem:[#allocation60_spill] sm:$0xff] %v3587_v5  ;;  %v3596_v25 = vcombine.high %v324_v6, %v328_v7  ;;  %v3599_v26 = vcombine.high %v325_v12, %v329_v13  ;;  %v332_v27 = vld [vmem:[#allocation7 + $0x340] sm:$0xff]  ;;  %v333_v43 = vld [vmem:[#allocation7 + $0x348] sm:$0xff]  ;;  %v3602_v45 = vcombine.low %v324_v6, %v328_v7 }
  0x65   :  { %1007 = vmatpush1.bf16.msra.mxu0 %v3517_v57  ;;  %5235 = vst [vmem:[#allocation61_spill] sm:$0xff] %v3590_v14  ;;  %5236 = vst [vmem:[#allocation62_spill] sm:$0xff] %v3594_v20  ;;  %v336_v36 = vld [vmem:[#allocation7 + $0x360] sm:$0xff]  ;;  %v337_v44 = vld [vmem:[#allocation7 + $0x368] sm:$0xff]  ;;  %v3606_v55 = vcombine.low %v325_v12, %v329_v13 }
  0x66   :  { %1048 = vmatpush1.bf16.msra.mxu1 %v3519_v58  ;;  %1008 = vmatprep.subr.bf16.mxu0 %v3525_v62  ;;  %5237 = vst [vmem:[#allocation63_spill] sm:$0xff] %v3596_v25  ;;  %5238 = vst [vmem:[#allocation64_spill] sm:$0xff] %v3599_v26  ;;  %v3608_v59 = vcombine.high %v332_v27, %v336_v36  ;;  %v3611_v60 = vcombine.high %v333_v43, %v337_v44  ;;  %v340_v61 = vld [vmem:[#allocation7 + $0x380] sm:$0xff] }
  0x67   :  { %1049 = vmatprep.subr.bf16.mxu1 %v3529_v3  ;;  %5239 = vst [vmem:[#allocation65_spill] sm:$0xff] %v3602_v45  ;;  %5240 = vst [vmem:[#allocation66_spill] sm:$0xff] %v3606_v55  ;;  %v344_v8 = vld [vmem:[#allocation7 + $0x3a0] sm:$0xff]  ;;  %v3614_v6 = vcombine.low %v332_v27, %v336_v36  ;;  %v3618_v7 = vcombine.low %v333_v43, %v337_v44 }
  0x68   :  { %5241 = vst [vmem:[#allocation67_spill] sm:$0xff] %v3608_v59  ;;  %5242 = vst [vmem:[#allocation68_spill] sm:$0xff] %v3611_v60  ;;  %v3620_v12 = vcombine.high %v340_v61, %v344_v8  ;;  %v3626_v27 = vcombine.low %v340_v61, %v344_v8 }
  0x69   :  { %1009 = vmatpush1.bf16.msra.mxu0 %v3527_v0  ;;  %5243 = vst [vmem:[#allocation69_spill] sm:$0xff] %v3614_v6  ;;  %5244 = vst [vmem:[#allocation70_spill] sm:$0xff] %v3618_v7 }
  0x6a   :  { %1050 = vmatpush1.bf16.msra.mxu1 %v3531_v4  ;;  %1010 = vmatprep.subr.bf16.mxu0 %v3535_v9  ;;  %5245 = vst [vmem:[#allocation71_spill] sm:$0xff] %v3620_v12  ;;  %5247 = vst [vmem:[#allocation73_spill] sm:$0xff] %v3626_v27 }
  0x6b   :  { %1051 = vmatprep.subr.bf16.mxu1 %v3537_v10 }
  0x6d   :  { %1011 = vmatpush1.bf16.msra.mxu0 %v3541_v15 }
  0x6e   :  { %1052 = vmatpush1.bf16.msra.mxu1 %v3545_v16  ;;  %1012 = vmatprep.subr.bf16.mxu0 %v3547_v18 }
  0x6f   :  { %1053 = vmatprep.subr.bf16.mxu1 %v3550_v19 }
  0x71   :  { %1013 = vmatpush1.bf16.msra.mxu0 %v3554_v28 }
  0x72   :  { %1054 = vmatpush1.bf16.msra.mxu1 %v3558_v33  ;;  %1014 = vmatprep.subr.bf16.mxu0 %v3560_v34 }
  0x73   :  { %1055 = vmatprep.subr.bf16.mxu1 %v3563_v35 }
  0x75   :  { %1015 = vmatpush1.bf16.msra.mxu0 %v3566_v47 }
  0x76   :  { %1056 = vmatpush1.bf16.msra.mxu1 %v3570_v51  ;;  %1016 = vmatprep.subr.bf16.mxu0 %v3572_v52 }
  0x77   :  { %1057 = vmatprep.subr.bf16.mxu1 %v3575_v53 }
  0x79   :  { %1017 = vmatpush1.bf16.msra.mxu0 %v3578_v63 }
  0x7a   :  { %1058 = vmatpush1.bf16.msra.mxu1 %v3582_v1  ;;  %1018 = vmatprep.subr.bf16.mxu0 %v3584_v2  ;;  %v345_v2 = vld [vmem:[#allocation7 + $0x3a8] sm:$0xff] }
  0x7b   :  { %1059 = vmatprep.subr.bf16.mxu1 %v3587_v5  ;;  %v341_v5 = vld [vmem:[#allocation7 + $0x388] sm:$0xff] }
  0x7c   :  { %v3623_v13 = vcombine.high %v341_v5, %v345_v2  ;;  %v3630_v36 = vcombine.low %v341_v5, %v345_v2 }
  0x7d   :  { %1019 = vmatpush1.bf16.msra.mxu0 %v3590_v14  ;;  %v353_v14 = vld [vmem:[#allocation7 + $0x3e8] sm:$0xff] }
  0x7e   :  { %1060 = vmatpush1.bf16.msra.mxu1 %v3594_v20  ;;  %1020 = vmatprep.subr.bf16.mxu0 %v3596_v25  ;;  %5246 = vst [vmem:[#allocation72_spill] sm:$0xff] %v3623_v13  ;;  %v352_v25 = vld [vmem:[#allocation7 + $0x3e0] sm:$0xff]  ;;  %v349_v20 = vld [vmem:[#allocation7 + $0x3c8] sm:$0xff]  ;;  %5248 = vst [vmem:[#allocation74_spill] sm:$0xff] %v3630_v36 }
  0x7f   :  { %1061 = vmatprep.subr.bf16.mxu1 %v3599_v26  ;;  %v348_v26 = vld [vmem:[#allocation7 + $0x3c0] sm:$0xff]  ;;  %v3635_v44 = vcombine.high %v349_v20, %v353_v14  ;;  %v3642_v2 = vcombine.low %v349_v20, %v353_v14  ;;  %v76_v14 = vlaneseq }
  0x80   :  { %v3632_v43 = vcombine.high %v348_v26, %v352_v25  ;;  %v3638_v8 = vcombine.low %v348_v26, %v352_v25 }
  0x81   :  { %1021 = vmatpush1.bf16.msra.mxu0 %v3602_v45  ;;  %5250 = vst [vmem:[#allocation76_spill] sm:$0xff] %v3635_v44  ;;  %v235_v45 = vld [vmem:[#allocation7 + $0x38] sm:$0xff]  ;;  %5252 = vst [vmem:[#allocation78_spill] sm:$0xff] %v3642_v2  ;;  %v3657_v20 = vshrl.u32 %v76_v14, 7 }
  0x82   :  { %1062 = vmatpush1.bf16.msra.mxu1 %v3606_v55  ;;  %1022 = vmatprep.subr.bf16.mxu0 %v3608_v59  ;;  %5249 = vst [vmem:[#allocation75_spill] sm:$0xff] %v3632_v43  ;;  %v234_v59 = vld [vmem:[#allocation7 + $0x30] sm:$0xff]  ;;  %v231_v55 = vld [vmem:[#allocation7 + $0x18] sm:$0xff]  ;;  %5251 = vst [vmem:[#allocation77_spill] sm:$0xff] %v3638_v8 }
  0x83   :  { %1063 = vmatprep.subr.bf16.mxu1 %v3611_v60  ;;  %v230_v60 = vld [vmem:[#allocation7 + $0x10] sm:$0xff]  ;;  %v3647_v61 = vcombine.high %v231_v55, %v235_v45  ;;  %v3655_v26 = vcombine.low %v231_v55, %v235_v45  ;;  %5256 = vst [vmem:[#allocation82_spill] sm:$0xff] %v3657_v20 }
  0x84   :  { %v3644_v5 = vcombine.high %v230_v60, %v234_v59  ;;  %v3653_v25 = vcombine.low %v230_v60, %v234_v59 }
  0x85   :  { %1023 = vmatpush1.bf16.msra.mxu0 %v3614_v6  ;;  %5254 = vst [vmem:[#allocation80_spill] sm:$0xff] %v3647_v61  ;;  %5255 = vst [vmem:[#allocation81_spill] sm:$0xff] %v3655_v26 }
  0x86   :  { %1064 = vmatpush1.bf16.msra.mxu1 %v3618_v7  ;;  %1024 = vmatprep.subr.bf16.mxu0 %v3620_v12  ;;  %5253 = vst [vmem:[#allocation79_spill] sm:$0xff] %v3644_v5 }
  0x87   :  { %1065 = vmatprep.subr.bf16.mxu1 %v3623_v13 }
  0x89   :  { %1025 = vmatpush1.bf16.msra.mxu0 %v3626_v27 }
  0x8a   :  { %1066 = vmatpush1.bf16.msra.mxu1 %v3630_v36  ;;  %1026 = vmatprep.subr.bf16.mxu0 %v3632_v43  ;;  %v4928_v43 = vsub.s32 0, %v3657_v20  ;;  %v4935_v36 = vsub.s32 1, %v3657_v20 }
  0x8b   :  { %1067 = vmatprep.subr.bf16.mxu1 %v3635_v44  ;;  %v68_v44 = vld [vmem:[#allocation8] ss:$8 sm:$0xf] }
  0x8d   :  { %1027 = vmatpush1.bf16.msra.mxu0 %v3638_v8  ;;  %v79_v8 = vrot.slane %v68_v44, %v4928_v43 }
  0x8e   :  { %1068 = vmatpush1.bf16.msra.mxu1 %v3642_v2  ;;  %1078 = vmatprep.subr.bf16.mxu0 %v3644_v5  ;;  %v4938_v2 = vsub.s32 2, %v3657_v20 }
  0x8f   :  { %1119 = vmatprep.subr.bf16.mxu1 %v3647_v61  ;;  %v83_v61 = vrot.slane %v68_v44, %v4935_v36 }
  0x90   :  { %v87_v55 = vrot.slane %v68_v44, %v4938_v2 }
 0x123   :  { %v157_v59 = vpop.f32.mrb[0].mxu0 }
 0x124   :  { %v3666_v60 = vadd.f32 %v157_v59, %v79_v8  ;;  %v159_v45 = vpop.f32.mrb[1].mxu0  ;;  %v198_v14 = vpop.f32.mrb[0].mxu1  ;;  %v4943_v8 = vsub.s32 3, %v3657_v20 }
 0x125   :  { %v3670_v5 = vadd.f32 %v159_v45, %v83_v61  ;;  %v161_v27 = vpop.f32.mrb[2].mxu0  ;;  %v200_v13 = vpop.f32.mrb[1].mxu1  ;;  %v3674_v63 = vadd.f32 %v198_v14, %v87_v55 }
 0x126   :  { %5257 = vst [vmem:[#allocation83_spill] sm:$0xff] %v3666_v60  ;;  %v205_v12 = vsub.f32 0.0, %v3666_v60  ;;  %v162_v43 = vpop.f32.mrb[3].mxu0  ;;  %v202_v7 = vpop.f32.mrb[2].mxu1  ;;  %v91_v27 = vrot.slane %v68_v44, %v4943_v8  ;;  %v5268_v60 = vmov 0.0|0.0  }
 0x127   :  { %5258 = vst [vmem:[#allocation84_spill] sm:$0xff] %v3670_v5  ;;  %v203_v6 = vpop.f32.mrb[3].mxu1  ;;  %v206_v1 = vsub.f32 0.0, %v3670_v5  ;;  %5259 = vst [vmem:[#allocation85_spill] sm:$0xff] %v3674_v63  ;;  %v207_v61 = vsub.f32 0.0, %v3674_v63  ;;  %v259_v5 = vld [vmem:[#allocation7 + $0xf8] sm:$0xff] }
 0x128   :  { %v208_v36 = vmul.f32 1.442695, %v205_v12  ;;  %v3680_v2 = vadd.f32 %v200_v13, %v91_v27 }
 0x129   :  { %v210_v59 = vmul.f32 1.442695, %v206_v1  ;;  %v212_v45 = vmul.f32 1.442695, %v207_v61  ;;  %v238_v61 = vld [vmem:[#allocation7 + $0x50] sm:$0xff] }
 0x12a   :  { %2993 = vpow2.f32 %v208_v36  ;;  %5260 = vst [vmem:[#allocation86_spill] sm:$0xff] %v3680_v2 }
 0x12b   :  { %2995 = vpow2.f32 %v210_v59 }
 0x12c   :  { %2997 = vpow2.f32 %v212_v45  ;;  %v242_v45 = vld [vmem:[#allocation7 + $0x70] sm:$0xff] }
 0x12d   :  { %2999 = vtanh.f32 %v3680_v2  ;;  %v3688_v8 = vcombine.high %v238_v61, %v242_v45  ;;  %v255_v2 = vld [vmem:[#allocation7 + $0xd8] sm:$0xff] }
 0x12f   :  { %5262 = vst [vmem:[#allocation88_spill] sm:$0xff] %v3688_v8 }
 0x134   :  { %v2994_v7 = vpop.eup %2993 }
 0x135   :  { %v2996_v6 = vpop.eup %2995  ;;  %v214_v12 = vadd.f32 1.0, %v2994_v7  ;;  %v239_v7 = vld [vmem:[#allocation7 + $0x58] sm:$0xff] }
 0x136   :  { %v215_v43 = vadd.f32 1.0, %v2996_v6  ;;  %v2998_v1 = vpop.eup %2997  ;;  %v243_v6 = vld [vmem:[#allocation7 + $0x78] sm:$0xff] }
 0x137   :  { %3001 = vrcp.f32 %v214_v12  ;;  %v3000_v36 = vpop.eup %2999  ;;  %v216_v14 = vadd.f32 1.0, %v2998_v1  ;;  %v3690_v1 = vcombine.high %v239_v7, %v243_v6 }
 0x138   :  { %3003 = vrcp.f32 %v215_v43 }
 0x139   :  { %3005 = vrcp.f32 %v216_v14  ;;  %5263 = vst [vmem:[#allocation89_spill] sm:$0xff] %v3690_v1  ;;  %v247_v14 = vld [vmem:[#allocation7 + $0x98] sm:$0xff] }
 0x141   :  { %v3002_v55 = vpop.eup %3001 }
 0x142   :  { %v3004_v59 = vpop.eup %3003  ;;  %v222_v63 = vmul.f32 %v3002_v55, %v3000_v36  ;;  %v246_v36 = vld [vmem:[#allocation7 + $0x90] sm:$0xff] }
 0x143   :  { %v221_v20 = vmul.f32 0.0, %v3004_v59  ;;  %v3006_v13 = vpop.eup %3005  ;;  %v250_v55 = vld [vmem:[#allocation7 + $0xb0] sm:$0xff]  ;;  %v3698_v59 = vcombine.low %v239_v7, %v243_v6  ;;  %v3718_v6 = vcombine.high %v255_v2, %v259_v5 }
 0x145   :  { %v3683_v44 = vadd.f32 %v222_v63, %v221_v20  ;;  %v251_v63 = vld [vmem:[#allocation7 + $0xb8] sm:$0xff]  ;;  %v3696_v20 = vcombine.low %v238_v61, %v242_v45  ;;  %5265 = vst [vmem:[#allocation91_spill] sm:$0xff] %v3698_v59  ;;  %v3710_v61 = vcombine.low %v246_v36, %v250_v55  ;;  %5272 = vst [vmem:[#allocation97_spill] sm:$0xff] %v3718_v6 }
 0x146   :  { %v3712_v45 = vcombine.low %v247_v14, %v251_v63 }
 0x147   :  { %5261 = vst [vmem:[#allocation87_spill] sm:$0xff] %v3683_v44  ;;  %3007 = vtanh.f32 %v3683_v44  ;;  %5264 = vst [vmem:[#allocation90_spill] sm:$0xff] %v3696_v20  ;;  %v258_v44 = vld [vmem:[#allocation7 + $0xf0] sm:$0xff] }
 0x148   :  { %5269 = vst [vmem:[#allocation94_spill] sm:$0xff] %v3710_v61  ;;  %5270 = vst [vmem:[#allocation95_spill] sm:$0xff] %v3712_v45 }
 0x151   :  { %v3008_v27 = vpop.eup %3007 }
 0x152   :  { %v225_v12 = vmul.f32 %v3008_v27, %v3006_v13  ;;  %v3702_v13 = vcombine.high %v246_v36, %v250_v55  ;;  %v3704_v27 = vcombine.high %v247_v14, %v251_v63  ;;  %v3724_v55 = vcombine.low %v255_v2, %v259_v5 }
 0x154   :  { %v3686_v43 = vpack.c.bf16 %v225_v12, %v225_v12  ;;  %5266 = vst [vmem:[#allocation92_spill] sm:$0xff] %v3702_v13  ;;  %5267 = vst [vmem:[#allocation93_spill] sm:$0xff] %v3704_v27  ;;  %v254_v12 = vld [vmem:[#allocation7 + $0xd0] sm:$0xff] }
 0x155   :  { %v3716_v7 = vcombine.high %v254_v12, %v258_v44  ;;  %v3722_v36 = vcombine.low %v254_v12, %v258_v44  ;;  %5274 = vst [vmem:[#allocation99_spill] sm:$0xff] %v3724_v55 }
 0x156   :  { %1029 = vmatmul.mubr.bf16.vlgmr.msra.gmra.mrb[4].mxu0 %v3686_v43  ;;  %1070 = vmatmul.mubr.bf16.vlgmr.msra.gmra.mrb[4].mxu1 %v3686_v43 }
 0x157   :  { %1079 = vmatpush1.bf16.msra.mxu0 %v3653_v25  ;;  %1120 = vmatpush1.bf16.msra.mxu1 %v3655_v26  ;;  %5271 = vst [vmem:[#allocation96_spill] sm:$0xff] %v3716_v7  ;;  %v263_v26 = vld [vmem:[#allocation7 + $0x118] sm:$0xff]  ;;  %5273 = vst [vmem:[#allocation98_spill] sm:$0xff] %v3722_v36 }
 0x158   :  { %1080 = vmatprep.subr.bf16.mxu0 %v3688_v8  ;;  %1121 = vmatprep.subr.bf16.mxu1 %v3690_v1  ;;  %v262_v1 = vld [vmem:[#allocation7 + $0x110] sm:$0xff] }
 0x159   :  { %1110 = vmatprep.mubr.bf16.mxu0 %v5268_v60  ;;  %1151 = vmatprep.mubr.bf16.mxu1 %v5268_v60  ;;  %v266_v8 = vld [vmem:[#allocation7 + $0x130] sm:$0xff]  ;;  %v267_v60 = vld [vmem:[#allocation7 + $0x138] sm:$0xff] }
 0x15a   :  { %v3728_v14 = vcombine.high %v262_v1, %v266_v8  ;;  %v3730_v63 = vcombine.high %v263_v26, %v267_v60  ;;  %v3734_v44 = vcombine.low %v262_v1, %v266_v8  ;;  %v3736_v2 = vcombine.low %v263_v26, %v267_v60 }
 0x15b   :  { %1081 = vmatpush1.bf16.msra.mxu0 %v3696_v20  ;;  %1122 = vmatpush1.bf16.msra.mxu1 %v3698_v59  ;;  %v271_v59 = vld [vmem:[#allocation7 + $0x158] sm:$0xff] }
 0x15c   :  { %1082 = vmatprep.subr.bf16.mxu0 %v3702_v13  ;;  %1123 = vmatprep.subr.bf16.mxu1 %v3704_v27  ;;  %5275 = vst [vmem:[#allocation100_spill] sm:$0xff] %v3728_v14  ;;  %5276 = vst [vmem:[#allocation101_spill] sm:$0xff] %v3730_v63  ;;  %v270_v27 = vld [vmem:[#allocation7 + $0x150] sm:$0xff]  ;;  %v275_v20 = vld [vmem:[#allocation7 + $0x178] sm:$0xff] }
 0x15d   :  { %v274_v13 = vld [vmem:[#allocation7 + $0x170] sm:$0xff]  ;;  %5277 = vst [vmem:[#allocation102_spill] sm:$0xff] %v3734_v44  ;;  %5278 = vst [vmem:[#allocation103_spill] sm:$0xff] %v3736_v2  ;;  %v3742_v12 = vcombine.high %v271_v59, %v275_v20  ;;  %v3748_v26 = vcombine.low %v271_v59, %v275_v20 }
 0x15e   :  { %v3740_v5 = vcombine.high %v270_v27, %v274_v13  ;;  %v3746_v8 = vcombine.low %v270_v27, %v274_v13 }
 0x15f   :  { %1083 = vmatpush1.bf16.msra.mxu0 %v3710_v61  ;;  %1124 = vmatpush1.bf16.msra.mxu1 %v3712_v45  ;;  %5280 = vst [vmem:[#allocation105_spill] sm:$0xff] %v3742_v12  ;;  %v279_v45 = vld [vmem:[#allocation7 + $0x198] sm:$0xff]  ;;  %5282 = vst [vmem:[#allocation107_spill] sm:$0xff] %v3748_v26 }
 0x160   :  { %1084 = vmatprep.subr.bf16.mxu0 %v3716_v7  ;;  %1125 = vmatprep.subr.bf16.mxu1 %v3718_v6  ;;  %5279 = vst [vmem:[#allocation104_spill] sm:$0xff] %v3740_v5  ;;  %v278_v6 = vld [vmem:[#allocation7 + $0x190] sm:$0xff]  ;;  %v283_v61 = vld [vmem:[#allocation7 + $0x1b8] sm:$0xff]  ;;  %5281 = vst [vmem:[#allocation106_spill] sm:$0xff] %v3746_v8 }
 0x161   :  { %v282_v7 = vld [vmem:[#allocation7 + $0x1b0] sm:$0xff]  ;;  %v3754_v60 = vcombine.high %v279_v45, %v283_v61  ;;  %v3760_v20 = vcombine.low %v279_v45, %v283_v61 }
 0x162   :  { %v3752_v1 = vcombine.high %v278_v6, %v282_v7  ;;  %v3758_v13 = vcombine.low %v278_v6, %v282_v7 }
 0x163   :  { %1085 = vmatpush1.bf16.msra.mxu0 %v3722_v36  ;;  %1126 = vmatpush1.bf16.msra.mxu1 %v3724_v55  ;;  %5284 = vst [vmem:[#allocation109_spill] sm:$0xff] %v3754_v60  ;;  %v287_v55 = vld [vmem:[#allocation7 + $0x1d8] sm:$0xff]  ;;  %5286 = vst [vmem:[#allocation111_spill] sm:$0xff] %v3760_v20 }
 0x164   :  { %1086 = vmatprep.subr.bf16.mxu0 %v3728_v14  ;;  %1127 = vmatprep.subr.bf16.mxu1 %v3730_v63  ;;  %5283 = vst [vmem:[#allocation108_spill] sm:$0xff] %v3752_v1  ;;  %v286_v63 = vld [vmem:[#allocation7 + $0x1d0] sm:$0xff]  ;;  %v291_v36 = vld [vmem:[#allocation7 + $0x1f8] sm:$0xff]  ;;  %5285 = vst [vmem:[#allocation110_spill] sm:$0xff] %v3758_v13 }
 0x165   :  { %v290_v14 = vld [vmem:[#allocation7 + $0x1f0] sm:$0xff]  ;;  %v3766_v27 = vcombine.high %v287_v55, %v291_v36  ;;  %v3772_v61 = vcombine.low %v287_v55, %v291_v36 }
 0x166   :  { %v3764_v59 = vcombine.high %v286_v63, %v290_v14  ;;  %v3770_v7 = vcombine.low %v286_v63, %v290_v14 }
 0x167   :  { %1087 = vmatpush1.bf16.msra.mxu0 %v3734_v44  ;;  %1128 = vmatpush1.bf16.msra.mxu1 %v3736_v2  ;;  %5288 = vst [vmem:[#allocation113_spill] sm:$0xff] %v3766_v27  ;;  %v295_v2 = vld [vmem:[#allocation7 + $0x218] sm:$0xff]  ;;  %5290 = vst [vmem:[#allocation115_spill] sm:$0xff] %v3772_v61 }
 0x168   :  { %1088 = vmatprep.subr.bf16.mxu0 %v3740_v5  ;;  %1129 = vmatprep.subr.bf16.mxu1 %v3742_v12  ;;  %5287 = vst [vmem:[#allocation112_spill] sm:$0xff] %v3764_v59  ;;  %v294_v12 = vld [vmem:[#allocation7 + $0x210] sm:$0xff]  ;;  %v299_v44 = vld [vmem:[#allocation7 + $0x238] sm:$0xff]  ;;  %5289 = vst [vmem:[#allocation114_spill] sm:$0xff] %v3770_v7 }
 0x169   :  { %v298_v5 = vld [vmem:[#allocation7 + $0x230] sm:$0xff]  ;;  %v3778_v6 = vcombine.high %v295_v2, %v299_v44  ;;  %v3784_v36 = vcombine.low %v295_v2, %v299_v44 }
 0x16a   :  { %v3776_v45 = vcombine.high %v294_v12, %v298_v5  ;;  %v3782_v14 = vcombine.low %v294_v12, %v298_v5 }
 0x16b   :  { %1089 = vmatpush1.bf16.msra.mxu0 %v3746_v8  ;;  %1130 = vmatpush1.bf16.msra.mxu1 %v3748_v26  ;;  %5292 = vst [vmem:[#allocation117_spill] sm:$0xff] %v3778_v6  ;;  %v303_v26 = vld [vmem:[#allocation7 + $0x258] sm:$0xff]  ;;  %5294 = vst [vmem:[#allocation119_spill] sm:$0xff] %v3784_v36 }
 0x16c   :  { %1090 = vmatprep.subr.bf16.mxu0 %v3752_v1  ;;  %1131 = vmatprep.subr.bf16.mxu1 %v3754_v60  ;;  %5291 = vst [vmem:[#allocation116_spill] sm:$0xff] %v3776_v45  ;;  %v302_v60 = vld [vmem:[#allocation7 + $0x250] sm:$0xff]  ;;  %v307_v8 = vld [vmem:[#allocation7 + $0x278] sm:$0xff]  ;;  %5293 = vst [vmem:[#allocation118_spill] sm:$0xff] %v3782_v14 }
 0x16d   :  { %v306_v1 = vld [vmem:[#allocation7 + $0x270] sm:$0xff]  ;;  %v3790_v63 = vcombine.high %v303_v26, %v307_v8  ;;  %v3796_v44 = vcombine.low %v303_v26, %v307_v8 }
 0x16e   :  { %v3788_v55 = vcombine.high %v302_v60, %v306_v1  ;;  %v3794_v5 = vcombine.low %v302_v60, %v306_v1 }
 0x16f   :  { %1091 = vmatpush1.bf16.msra.mxu0 %v3758_v13  ;;  %1132 = vmatpush1.bf16.msra.mxu1 %v3760_v20  ;;  %5296 = vst [vmem:[#allocation121_spill] sm:$0xff] %v3790_v63  ;;  %v311_v20 = vld [vmem:[#allocation7 + $0x298] sm:$0xff]  ;;  %5298 = vst [vmem:[#allocation123_spill] sm:$0xff] %v3796_v44 }
 0x170   :  { %1092 = vmatprep.subr.bf16.mxu0 %v3764_v59  ;;  %1133 = vmatprep.subr.bf16.mxu1 %v3766_v27  ;;  %5295 = vst [vmem:[#allocation120_spill] sm:$0xff] %v3788_v55  ;;  %v310_v27 = vld [vmem:[#allocation7 + $0x290] sm:$0xff]  ;;  %v315_v13 = vld [vmem:[#allocation7 + $0x2b8] sm:$0xff]  ;;  %5297 = vst [vmem:[#allocation122_spill] sm:$0xff] %v3794_v5 }
 0x171   :  { %v314_v59 = vld [vmem:[#allocation7 + $0x2b0] sm:$0xff]  ;;  %v3802_v12 = vcombine.high %v311_v20, %v315_v13  ;;  %v3808_v8 = vcombine.low %v311_v20, %v315_v13 }
 0x172   :  { %v3800_v2 = vcombine.high %v310_v27, %v314_v59  ;;  %v3806_v1 = vcombine.low %v310_v27, %v314_v59 }
 0x173   :  { %1093 = vmatpush1.bf16.msra.mxu0 %v3770_v7  ;;  %1134 = vmatpush1.bf16.msra.mxu1 %v3772_v61  ;;  %5300 = vst [vmem:[#allocation125_spill] sm:$0xff] %v3802_v12  ;;  %v319_v61 = vld [vmem:[#allocation7 + $0x2d8] sm:$0xff]  ;;  %5302 = vst [vmem:[#allocation127_spill] sm:$0xff] %v3808_v8 }
 0x174   :  { %1094 = vmatprep.subr.bf16.mxu0 %v3776_v45  ;;  %1135 = vmatprep.subr.bf16.mxu1 %v3778_v6  ;;  %5299 = vst [vmem:[#allocation124_spill] sm:$0xff] %v3800_v2  ;;  %v318_v6 = vld [vmem:[#allocation7 + $0x2d0] sm:$0xff]  ;;  %v323_v7 = vld [vmem:[#allocation7 + $0x2f8] sm:$0xff]  ;;  %5301 = vst [vmem:[#allocation126_spill] sm:$0xff] %v3806_v1 }
 0x175   :  { %v322_v45 = vld [vmem:[#allocation7 + $0x2f0] sm:$0xff]  ;;  %v3814_v60 = vcombine.high %v319_v61, %v323_v7  ;;  %v3820_v13 = vcombine.low %v319_v61, %v323_v7 }
 0x176   :  { %v3812_v26 = vcombine.high %v318_v6, %v322_v45  ;;  %v3818_v59 = vcombine.low %v318_v6, %v322_v45 }
 0x177   :  { %1095 = vmatpush1.bf16.msra.mxu0 %v3782_v14  ;;  %1136 = vmatpush1.bf16.msra.mxu1 %v3784_v36  ;;  %5304 = vst [vmem:[#allocation129_spill] sm:$0xff] %v3814_v60  ;;  %v327_v36 = vld [vmem:[#allocation7 + $0x318] sm:$0xff]  ;;  %5306 = vst [vmem:[#allocation131_spill] sm:$0xff] %v3820_v13 }
 0x178   :  { %1096 = vmatprep.subr.bf16.mxu0 %v3788_v55  ;;  %1137 = vmatprep.subr.bf16.mxu1 %v3790_v63  ;;  %5303 = vst [vmem:[#allocation128_spill] sm:$0xff] %v3812_v26  ;;  %v326_v63 = vld [vmem:[#allocation7 + $0x310] sm:$0xff]  ;;  %v331_v14 = vld [vmem:[#allocation7 + $0x338] sm:$0xff]  ;;  %5305 = vst [vmem:[#allocation130_spill] sm:$0xff] %v3818_v59 }
 0x179   :  { %v330_v55 = vld [vmem:[#allocation7 + $0x330] sm:$0xff]  ;;  %v3826_v27 = vcombine.high %v327_v36, %v331_v14  ;;  %v3832_v7 = vcombine.low %v327_v36, %v331_v14 }
 0x17a   :  { %v3824_v20 = vcombine.high %v326_v63, %v330_v55  ;;  %v3830_v45 = vcombine.low %v326_v63, %v330_v55 }
 0x17b   :  { %1097 = vmatpush1.bf16.msra.mxu0 %v3794_v5  ;;  %1138 = vmatpush1.bf16.msra.mxu1 %v3796_v44  ;;  %5308 = vst [vmem:[#allocation133_spill] sm:$0xff] %v3826_v27  ;;  %v335_v44 = vld [vmem:[#allocation7 + $0x358] sm:$0xff]  ;;  %5310 = vst [vmem:[#allocation135_spill] sm:$0xff] %v3832_v7 }
 0x17c   :  { %1098 = vmatprep.subr.bf16.mxu0 %v3800_v2  ;;  %1139 = vmatprep.subr.bf16.mxu1 %v3802_v12  ;;  %5307 = vst [vmem:[#allocation132_spill] sm:$0xff] %v3824_v20  ;;  %v334_v12 = vld [vmem:[#allocation7 + $0x350] sm:$0xff]  ;;  %v339_v5 = vld [vmem:[#allocation7 + $0x378] sm:$0xff]  ;;  %5309 = vst [vmem:[#allocation134_spill] sm:$0xff] %v3830_v45 }
 0x17d   :  { %v338_v2 = vld [vmem:[#allocation7 + $0x370] sm:$0xff]  ;;  %v3838_v6 = vcombine.high %v335_v44, %v339_v5  ;;  %v3844_v14 = vcombine.low %v335_v44, %v339_v5 }
 0x17e   :  { %v3836_v61 = vcombine.high %v334_v12, %v338_v2  ;;  %v3842_v55 = vcombine.low %v334_v12, %v338_v2 }
 0x17f   :  { %1099 = vmatpush1.bf16.msra.mxu0 %v3806_v1  ;;  %1140 = vmatpush1.bf16.msra.mxu1 %v3808_v8  ;;  %5312 = vst [vmem:[#allocation137_spill] sm:$0xff] %v3838_v6  ;;  %v343_v8 = vld [vmem:[#allocation7 + $0x398] sm:$0xff]  ;;  %5314 = vst [vmem:[#allocation139_spill] sm:$0xff] %v3844_v14 }
 0x180   :  { %1100 = vmatprep.subr.bf16.mxu0 %v3812_v26  ;;  %1141 = vmatprep.subr.bf16.mxu1 %v3814_v60  ;;  %5311 = vst [vmem:[#allocation136_spill] sm:$0xff] %v3836_v61  ;;  %v342_v60 = vld [vmem:[#allocation7 + $0x390] sm:$0xff]  ;;  %v347_v1 = vld [vmem:[#allocation7 + $0x3b8] sm:$0xff]  ;;  %5313 = vst [vmem:[#allocation138_spill] sm:$0xff] %v3842_v55 }
 0x181   :  { %v346_v26 = vld [vmem:[#allocation7 + $0x3b0] sm:$0xff]  ;;  %v3850_v63 = vcombine.high %v343_v8, %v347_v1  ;;  %v3856_v5 = vcombine.low %v343_v8, %v347_v1  ;;  %v5324_v1 = vld [vmem:[#allocation58_spill] sm:$0xff]  ;;  %v5325_v8 = vld [vmem:[#allocation59_spill] sm:$0xff] }
 0x182   :  { %v3848_v36 = vcombine.high %v342_v60, %v346_v26  ;;  %v3854_v2 = vcombine.low %v342_v60, %v346_v26  ;;  %v5326_v26 = vld [vmem:[#allocation60_spill] sm:$0xff]  ;;  %v5327_v60 = vld [vmem:[#allocation61_spill] sm:$0xff] }
 0x183   :  { %1101 = vmatpush1.bf16.msra.mxu0 %v3818_v59  ;;  %1142 = vmatpush1.bf16.msra.mxu1 %v3820_v13  ;;  %5316 = vst [vmem:[#allocation141_spill] sm:$0xff] %v3850_v63  ;;  %v351_v13 = vld [vmem:[#allocation7 + $0x3d8] sm:$0xff]  ;;  %5318 = vst [vmem:[#allocation143_spill] sm:$0xff] %v3856_v5 }
 0x184   :  { %1102 = vmatprep.subr.bf16.mxu0 %v3824_v20  ;;  %1143 = vmatprep.subr.bf16.mxu1 %v3826_v27  ;;  %5315 = vst [vmem:[#allocation140_spill] sm:$0xff] %v3848_v36  ;;  %v350_v27 = vld [vmem:[#allocation7 + $0x3d0] sm:$0xff]  ;;  %v355_v59 = vld [vmem:[#allocation7 + $0x3f8] sm:$0xff]  ;;  %5317 = vst [vmem:[#allocation142_spill] sm:$0xff] %v3854_v2 }
 0x185   :  { %v354_v20 = vld [vmem:[#allocation7 + $0x3f0] sm:$0xff]  ;;  %v3862_v12 = vcombine.high %v351_v13, %v355_v59 }
 0x186   :  { %v3860_v44 = vcombine.high %v350_v27, %v354_v20 }
 0x187   :  { %1103 = vmatpush1.bf16.msra.mxu0 %v3830_v45  ;;  %1144 = vmatpush1.bf16.msra.mxu1 %v3832_v7  ;;  %5320 = vst [vmem:[#allocation145_spill] sm:$0xff] %v3862_v12 }
 0x188   :  { %1104 = vmatprep.subr.bf16.mxu0 %v3836_v61  ;;  %1145 = vmatprep.subr.bf16.mxu1 %v3838_v6  ;;  %5319 = vst [vmem:[#allocation144_spill] sm:$0xff] %v3860_v44  ;;  %v3866_v6 = vcombine.low %v350_v27, %v354_v20  ;;  %v5330_v20 = vld [vmem:[#allocation64_spill] sm:$0xff]  ;;  %v5331_v27 = vld [vmem:[#allocation65_spill] sm:$0xff] }
 0x18a   :  { %5321 = vst [vmem:[#allocation146_spill] sm:$0xff] %v3866_v6 }
 0x18b   :  { %1105 = vmatpush1.bf16.msra.mxu0 %v3842_v55  ;;  %1146 = vmatpush1.bf16.msra.mxu1 %v3844_v14  ;;  %v3868_v55 = vcombine.low %v351_v13, %v355_v59  ;;  %v5328_v59 = vld [vmem:[#allocation62_spill] sm:$0xff]  ;;  %v5329_v13 = vld [vmem:[#allocation63_spill] sm:$0xff] }
 0x18c   :  { %1106 = vmatprep.subr.bf16.mxu0 %v3848_v36  ;;  %1147 = vmatprep.subr.bf16.mxu1 %v3850_v63 }
 0x18d   :  { %5322 = vst [vmem:[#allocation147_spill] sm:$0xff] %v3868_v55 }
 0x18f   :  { %1107 = vmatpush1.bf16.msra.mxu0 %v3854_v2  ;;  %1148 = vmatpush1.bf16.msra.mxu1 %v3856_v5 }
 0x190   :  { %1108 = vmatprep.subr.bf16.mxu0 %v3860_v44  ;;  %1149 = vmatprep.subr.bf16.mxu1 %v3862_v12 }
 0x193   :  { %1109 = vmatpush1.bf16.msra.mxu0 %v3866_v6  ;;  %1150 = vmatpush1.bf16.msra.mxu1 %v3868_v55 }
 0x194   :  { %1259 = vmatprep.subr.bf16.mxu0 %v3449_v11  ;;  %1300 = vmatprep.subr.bf16.mxu1 %v3454_v17 }
 0x196   :  { %1111 = vmatmul.mubr.bf16.vlgmr.msra.gmra.mrb[8].mxu0 %v3686_v43  ;;  %1152 = vmatmul.mubr.bf16.vlgmr.msra.gmra.mrb[8].mxu1 %v3686_v43  ;;  %v5323_v43 = vld [vmem:[#allocation57_spill] sm:$0xff] }
 0x197   :  { %1260 = vmatpush1.bf16.msra.mxu0 %v3457_v21  ;;  %1301 = vmatpush1.bf16.msra.mxu1 %v3460_v22 }
 0x198   :  { %1261 = vmatprep.subr.bf16.mxu0 %v3462_v23  ;;  %1302 = vmatprep.subr.bf16.mxu1 %v3465_v24 }
 0x19b   :  { %1262 = vmatpush1.bf16.msra.mxu0 %v3468_v29  ;;  %1303 = vmatpush1.bf16.msra.mxu1 %v3472_v30 }
 0x19c   :  { %1263 = vmatprep.subr.bf16.mxu0 %v3474_v31  ;;  %1304 = vmatprep.subr.bf16.mxu1 %v3477_v32 }
 0x19f   :  { %1264 = vmatpush1.bf16.msra.mxu0 %v3480_v37  ;;  %1305 = vmatpush1.bf16.msra.mxu1 %v3484_v38 }
 0x1a0   :  { %1265 = vmatprep.subr.bf16.mxu0 %v3486_v39  ;;  %1306 = vmatprep.subr.bf16.mxu1 %v3489_v40 }
 0x1a3   :  { %1266 = vmatpush1.bf16.msra.mxu0 %v3492_v41  ;;  %1307 = vmatpush1.bf16.msra.mxu1 %v3496_v42 }
 0x1a4   :  { %1267 = vmatprep.subr.bf16.mxu0 %v3501_v46  ;;  %1308 = vmatprep.subr.bf16.mxu1 %v3503_v48 }
 0x1a7   :  { %1268 = vmatpush1.bf16.msra.mxu0 %v3505_v49  ;;  %1309 = vmatpush1.bf16.msra.mxu1 %v3507_v50 }
 0x1a8   :  { %1269 = vmatprep.subr.bf16.mxu0 %v3513_v54  ;;  %1310 = vmatprep.subr.bf16.mxu1 %v3515_v56 }
 0x1ab   :  { %1270 = vmatpush1.bf16.msra.mxu0 %v3517_v57  ;;  %1311 = vmatpush1.bf16.msra.mxu1 %v3519_v58 }
 0x1ac   :  { %1271 = vmatprep.subr.bf16.mxu0 %v3525_v62  ;;  %1312 = vmatprep.subr.bf16.mxu1 %v3529_v3 }
 0x1af   :  { %1272 = vmatpush1.bf16.msra.mxu0 %v3527_v0  ;;  %1313 = vmatpush1.bf16.msra.mxu1 %v3531_v4 }
 0x1b0   :  { %1273 = vmatprep.subr.bf16.mxu0 %v3535_v9  ;;  %1314 = vmatprep.subr.bf16.mxu1 %v3537_v10 }
 0x1b3   :  { %1274 = vmatpush1.bf16.msra.mxu0 %v3541_v15  ;;  %1315 = vmatpush1.bf16.msra.mxu1 %v3545_v16 }
 0x1b4   :  { %1275 = vmatprep.subr.bf16.mxu0 %v3547_v18  ;;  %1316 = vmatprep.subr.bf16.mxu1 %v3550_v19 }
 0x1b7   :  { %1276 = vmatpush1.bf16.msra.mxu0 %v3554_v28  ;;  %1317 = vmatpush1.bf16.msra.mxu1 %v3558_v33  ;;  %v5348_v28 = vld [vmem:[#allocation84_spill] sm:$0xff] }
 0x1b8   :  { %1277 = vmatprep.subr.bf16.mxu0 %v3560_v34  ;;  %1318 = vmatprep.subr.bf16.mxu1 %v3563_v35  ;;  %v5347_v34 = vld [vmem:[#allocation83_spill] sm:$0xff] }
 0x1bb   :  { %1278 = vmatpush1.bf16.msra.mxu0 %v3566_v47  ;;  %1319 = vmatpush1.bf16.msra.mxu1 %v3570_v51 }
 0x1bc   :  { %1279 = vmatprep.subr.bf16.mxu0 %v3572_v52  ;;  %1320 = vmatprep.subr.bf16.mxu1 %v3575_v53  ;;  %v5332_v52 = vld [vmem:[#allocation66_spill] sm:$0xff]  ;;  %v5333_v53 = vld [vmem:[#allocation67_spill] sm:$0xff] }
 0x1bf   :  { %1280 = vmatpush1.bf16.msra.mxu0 %v5323_v43  ;;  %1321 = vmatpush1.bf16.msra.mxu1 %v5324_v1  ;;  %v5334_v43 = vld [vmem:[#allocation68_spill] sm:$0xff]  ;;  %v5335_v1 = vld [vmem:[#allocation69_spill] sm:$0xff] }
 0x1c0   :  { %1281 = vmatprep.subr.bf16.mxu0 %v5325_v8  ;;  %1322 = vmatprep.subr.bf16.mxu1 %v5326_v26  ;;  %v5336_v8 = vld [vmem:[#allocation70_spill] sm:$0xff]  ;;  %v5337_v26 = vld [vmem:[#allocation71_spill] sm:$0xff] }
 0x1c3   :  { %1282 = vmatpush1.bf16.msra.mxu0 %v5327_v60  ;;  %1323 = vmatpush1.bf16.msra.mxu1 %v5328_v59  ;;  %v5338_v60 = vld [vmem:[#allocation72_spill] sm:$0xff]  ;;  %v5339_v59 = vld [vmem:[#allocation73_spill] sm:$0xff] }
 0x1c4   :  { %1283 = vmatprep.subr.bf16.mxu0 %v5329_v13  ;;  %1324 = vmatprep.subr.bf16.mxu1 %v5330_v20  ;;  %v5340_v13 = vld [vmem:[#allocation74_spill] sm:$0xff]  ;;  %v5341_v20 = vld [vmem:[#allocation75_spill] sm:$0xff] }
 0x1c7   :  { %1284 = vmatpush1.bf16.msra.mxu0 %v5331_v27  ;;  %1325 = vmatpush1.bf16.msra.mxu1 %v5332_v52  ;;  %v5342_v27 = vld [vmem:[#allocation76_spill] sm:$0xff]  ;;  %v5343_v52 = vld [vmem:[#allocation77_spill] sm:$0xff] }
 0x1c8   :  { %1285 = vmatprep.subr.bf16.mxu0 %v5333_v53  ;;  %1326 = vmatprep.subr.bf16.mxu1 %v5334_v43  ;;  %v5344_v53 = vld [vmem:[#allocation78_spill] sm:$0xff]  ;;  %v5345_v43 = vld [vmem:[#allocation79_spill] sm:$0xff] }
 0x1cb   :  { %1286 = vmatpush1.bf16.msra.mxu0 %v5335_v1  ;;  %1327 = vmatpush1.bf16.msra.mxu1 %v5336_v8  ;;  %v5346_v1 = vld [vmem:[#allocation80_spill] sm:$0xff] }
 0x1cc   :  { %1287 = vmatprep.subr.bf16.mxu0 %v5337_v26  ;;  %1328 = vmatprep.subr.bf16.mxu1 %v5338_v60 }
 0x1cf   :  { %1288 = vmatpush1.bf16.msra.mxu0 %v5339_v59  ;;  %1329 = vmatpush1.bf16.msra.mxu1 %v5340_v13 }
 0x1d0   :  { %1289 = vmatprep.subr.bf16.mxu0 %v5341_v20  ;;  %1330 = vmatprep.subr.bf16.mxu1 %v5342_v27 }
 0x1d3   :  { %1290 = vmatpush1.bf16.msra.mxu0 %v5343_v52  ;;  %1331 = vmatpush1.bf16.msra.mxu1 %v5344_v53 }
 0x1d4   :  { %1341 = vmatprep.subr.bf16.mxu0 %v5345_v43  ;;  %1382 = vmatprep.subr.bf16.mxu1 %v5346_v1  ;;  %v5349_v1 = vld [vmem:[#allocation85_spill] sm:$0xff] }
 0x229   :  { %v1030_v8 = vpop.f32.mrb[4].mxu0  ;;  %v1071_v26 = vpop.f32.mrb[4].mxu1 }
 0x22a   :  { %v1210_v51 = vrot.slane %v1030_v8, 7  ;;  %v1032_v60 = vpop.f32.mrb[5].mxu0  ;;  %v1073_v47 = vpop.f32.mrb[5].mxu1  ;;  %v1212_v53 = vrot.slane %v1071_v26, 7 }
 0x22b   :  { %v1211_v59 = vrot.slane %v1032_v60, 7  ;;  %v1034_v35 = vpop.f32.mrb[6].mxu0  ;;  %v1075_v13 = vpop.f32.mrb[6].mxu1  ;;  %v1213_v8 = vrot.slane %v1073_v47, 7  ;;  %v5350_v60 = vld [vmem:[#allocation86_spill] sm:$0xff] }
 0x22c   :  { %v1218_v20 = vadd.f32 %v1210_v51, %v5347_v34  ;;  %v1035_v33 = vpop.f32.mrb[7].mxu0  ;;  %v1076_v27 = vpop.f32.mrb[7].mxu1  ;;  %v1220_v15 = vadd.f32 %v1212_v53, %v5349_v1 }
 0x22d   :  { %v1219_v52 = vadd.f32 %v1211_v59, %v5348_v28  ;;  %v1221_v35 = vadd.f32 %v1213_v8, %v5350_v60  ;;  %v70_v8 = vld [vmem:[#allocation8 + $0x1] ss:$8 sm:$0xf] }
 0x22e   :  { %v1222_v19 = vsub.f32 0.0, %v1218_v20  ;;  %v1224_v10 = vsub.f32 0.0, %v1220_v15 }
 0x22f   :  { %v1223_v18 = vsub.f32 0.0, %v1219_v52 }
 0x230   :  { %v1225_v43 = vmul.f32 1.442695, %v1222_v19  ;;  %v1229_v13 = vmul.f32 1.442695, %v1224_v10 }
 0x231   :  { %v1227_v16 = vmul.f32 1.442695, %v1223_v18 }
 0x232   :  { %3009 = vpow2.f32 %v1225_v43  ;;  %v5351_v43 = vld [vmem:[#allocation87_spill] sm:$0xff] }
 0x233   :  { %3011 = vpow2.f32 %v1227_v16  ;;  %v1239_v26 = vrot.slane %v5351_v43, 7 }
 0x234   :  { %3013 = vtanh.f32 %v1221_v35  ;;  %v5353_v35 = vld [vmem:[#allocation82_spill] sm:$0xff] }
 0x235   :  { %3015 = vpow2.f32 %v1229_v13  ;;  %v5354_v13 = vsub.s32 0, %v5353_v35 }
 0x23c   :  { %v3010_v9 = vpop.eup %3009 }
 0x23d   :  { %v1231_v51 = vadd.f32 1.0, %v3010_v9  ;;  %v3012_v33 = vpop.eup %3011 }
 0x23e   :  { %v1232_v59 = vadd.f32 1.0, %v3012_v33  ;;  %v3014_v52 = vpop.eup %3013  ;;  %v5356_v33 = vsub.s32 1, %v5353_v35 }
 0x23f   :  { %3017 = vrcp.f32 %v1231_v51  ;;  %v3016_v19 = vpop.eup %3015  ;;  %v3952_v51 = vrot.slane %v70_v8, %v5354_v13 }
 0x240   :  { %3019 = vrcp.f32 %v1232_v59  ;;  %v1233_v47 = vadd.f32 1.0, %v3016_v19  ;;  %v3956_v59 = vrot.slane %v70_v8, %v5356_v33 }
 0x241   :  { %5355 = vst [vmem:[#allocation82_spill] sm:$0xff] %v3952_v51 }
 0x242   :  { %3021 = vrcp.f32 %v1233_v47  ;;  %5357 = vst [vmem:[#allocation148_spill] sm:$0xff] %v3956_v59 }
 0x249   :  { %v3018_v18 = vpop.eup %3017 }
 0x24a   :  { %v1242_v53 = vmul.f32 %v3018_v18, %v3014_v52  ;;  %v3020_v16 = vpop.eup %3019 }
 0x24b   :  { %v1241_v15 = vmul.f32 %v3020_v16, %v1239_v26 }
 0x24c   :  { %v3022_v9 = vpop.eup %3021 }
 0x24d   :  { %v3947_v20 = vadd.f32 %v1242_v53, %v1241_v15  ;;  %v5358_v15 = vsub.s32 2, %v5353_v35 }
 0x24f   :  { %5352 = vst [vmem:[#allocation87_spill] sm:$0xff] %v3947_v20  ;;  %3023 = vtanh.f32 %v3947_v20 }
 0x259   :  { %v3024_v10 = vpop.eup %3023 }
 0x25a   :  { %v1245_v27 = vmul.f32 %v3024_v10, %v3022_v9  ;;  %v3962_v9 = vrot.slane %v70_v8, %v5358_v15 }
 0x25c   :  { %5359 = vst [vmem:[#allocation149_spill] sm:$0xff] %v3962_v9 }
 0x269   :  { %v1112_v52 = vpop.f32.mrb[8].mxu0  ;;  %v1153_v19 = vpop.f32.mrb[8].mxu1 }
 0x26a   :  { %v1181_v18 = vadd.f32 %v3952_v51, %v1112_v52  ;;  %v1114_v43 = vpop.f32.mrb[9].mxu0  ;;  %v1155_v26 = vpop.f32.mrb[9].mxu1  ;;  %v1183_v28 = vadd.f32 %v3962_v9, %v1153_v19  ;;  %v5360_v52 = vsub.s32 3, %v5353_v35 }
 0x26b   :  { %v1182_v53 = vadd.f32 %v3956_v59, %v1114_v43  ;;  %v1116_v16 = vpop.f32.mrb[10].mxu0  ;;  %v1157_v47 = vpop.f32.mrb[10].mxu1 }
 0x26c   :  { %v1185_v10 = vsub.f32 0.0, %v1181_v18  ;;  %v1117_v13 = vpop.f32.mrb[11].mxu0  ;;  %v1158_v20 = vpop.f32.mrb[11].mxu1  ;;  %v3967_v51 = vrot.slane %v70_v8, %v5360_v52  ;;  %v1187_v43 = vsub.f32 0.0, %v1183_v28 }
 0x26d   :  { %v1186_v60 = vsub.f32 0.0, %v1182_v53 }
 0x26e   :  { %v1188_v33 = vmul.f32 1.442695, %v1185_v10  ;;  %5361 = vst [vmem:[#allocation150_spill] sm:$0xff] %v3967_v51  ;;  %v1184_v16 = vadd.f32 %v3967_v51, %v1155_v26  ;;  %v1192_v47 = vmul.f32 1.442695, %v1187_v43  ;;  %v1249_v43 = vpack.c.bf16 %v1245_v27, %v1245_v27  ;;  %v5365_v27 = vld [vmem:[#allocation90_spill] sm:$0xff] }
 0x26f   :  { %v1190_v1 = vmul.f32 1.442695, %v1186_v60 }
 0x270   :  { %3025 = vpow2.f32 %v1188_v33 }
 0x271   :  { %3027 = vpow2.f32 %v1190_v1 }
 0x272   :  { %3029 = vtanh.f32 %v1184_v16 }
 0x273   :  { %3031 = vpow2.f32 %v1192_v47  ;;  %v3973_v47 = vshrl.u32 %v1249_v43, 16  ;;  %v5377_v43 = vld [vmem:[#allocation102_spill] sm:$0xff] }
 0x27a   :  { %v3026_v15 = vpop.eup %3025 }
 0x27b   :  { %v1194_v59 = vadd.f32 1.0, %v3026_v15  ;;  %v3028_v18 = vpop.eup %3027  ;;  %v5362_v15 = vld [vmem:[#allocation81_spill] sm:$0xff] }
 0x27c   :  { %v1195_v20 = vadd.f32 1.0, %v3028_v18  ;;  %v3030_v60 = vpop.eup %3029  ;;  %v5363_v18 = vld [vmem:[#allocation88_spill] sm:$0xff] }
 0x27d   :  { %3033 = vrcp.f32 %v1194_v59  ;;  %v3032_v53 = vpop.eup %3031 }
 0x27e   :  { %3035 = vrcp.f32 %v1195_v20  ;;  %v1196_v35 = vadd.f32 1.0, %v3032_v53  ;;  %v5364_v20 = vld [vmem:[#allocation89_spill] sm:$0xff]  ;;  %v5367_v53 = vld [vmem:[#allocation92_spill] sm:$0xff] }
 0x280   :  { %3037 = vrcp.f32 %v1196_v35  ;;  %v5371_v35 = vld [vmem:[#allocation96_spill] sm:$0xff] }
 0x287   :  { %v3034_v19 = vpop.eup %3033 }
 0x288   :  { %v1202_v1 = vmul.f32 %v3034_v19, %v3030_v60  ;;  %v3036_v10 = vpop.eup %3035  ;;  %v5366_v60 = vld [vmem:[#allocation91_spill] sm:$0xff]  ;;  %v5368_v19 = vld [vmem:[#allocation93_spill] sm:$0xff] }
 0x289   :  { %v1201_v8 = vmul.f32 0.0, %v3036_v10  ;;  %v5370_v10 = vld [vmem:[#allocation95_spill] sm:$0xff] }
 0x28a   :  { %v3038_v28 = vpop.eup %3037 }
 0x28b   :  { %v3970_v13 = vadd.f32 %v1202_v1, %v1201_v8  ;;  %v5369_v1 = vld [vmem:[#allocation94_spill] sm:$0xff]  ;;  %v5372_v8 = vld [vmem:[#allocation97_spill] sm:$0xff] }
 0x28d   :  { %3039 = vtanh.f32 %v3970_v13 }
 0x297   :  { %v3040_v26 = vpop.eup %3039 }
 0x298   :  { %v1205_v33 = vmul.f32 %v3040_v26, %v3038_v28  ;;  %v5373_v28 = vld [vmem:[#allocation98_spill] sm:$0xff]  ;;  %v5374_v26 = vld [vmem:[#allocation99_spill] sm:$0xff] }
 0x29a   :  { %v1247_v52 = vrot.slane %v1205_v33, 7  ;;  %v5375_v33 = vld [vmem:[#allocation100_spill] sm:$0xff] }
 0x29c   :  { %v1250_v59 = vpack.c.bf16 %v1247_v52, %v1247_v52  ;;  %v5376_v52 = vld [vmem:[#allocation101_spill] sm:$0xff] }
 0x29e   :  { %v1255_v16 = vshrl.u32 %v1250_v59, 16  ;;  %v5378_v59 = vld [vmem:[#allocation103_spill] sm:$0xff] }
 0x2a0   :  { %1291 = vmatprep.mubr.bf16.mxu0 %v1255_v16  ;;  %1332 = vmatprep.mubr.bf16.mxu1 %v1255_v16 }
 0x2a1   :  { %1292 = vmatmul.mubr.bf16.vlgmr.msra.gmra.mrb[12].mxu0 %v3973_v47  ;;  %1333 = vmatmul.mubr.bf16.vlgmr.msra.gmra.mrb[12].mxu1 %v3973_v47 }
 0x2a2   :  { %1342 = vmatpush1.bf16.msra.mxu0 %v3653_v25  ;;  %1383 = vmatpush1.bf16.msra.mxu1 %v5362_v15 }
 0x2a3   :  { %1373 = vmatprep.mubr.bf16.mxu0 %v1255_v16  ;;  %1414 = vmatprep.mubr.bf16.mxu1 %v1255_v16  ;;  %v5379_v16 = vld [vmem:[#allocation104_spill] sm:$0xff] }
 0x2a4   :  { %1343 = vmatprep.subr.bf16.mxu0 %v5363_v18  ;;  %1384 = vmatprep.subr.bf16.mxu1 %v5364_v20 }
 0x2a6   :  { %1344 = vmatpush1.bf16.msra.mxu0 %v5365_v27  ;;  %1385 = vmatpush1.bf16.msra.mxu1 %v5366_v60 }
 0x2a7   :  { %1345 = vmatprep.subr.bf16.mxu0 %v5367_v53  ;;  %1386 = vmatprep.subr.bf16.mxu1 %v5368_v19 }
 0x2aa   :  { %1346 = vmatpush1.bf16.msra.mxu0 %v5369_v1  ;;  %1387 = vmatpush1.bf16.msra.mxu1 %v5370_v10  ;;  %v5380_v1 = vld [vmem:[#allocation105_spill] sm:$0xff]  ;;  %v5381_v10 = vld [vmem:[#allocation106_spill] sm:$0xff] }
 0x2ab   :  { %1347 = vmatprep.subr.bf16.mxu0 %v5371_v35  ;;  %1388 = vmatprep.subr.bf16.mxu1 %v5372_v8  ;;  %v5382_v35 = vld [vmem:[#allocation107_spill] sm:$0xff]  ;;  %v5383_v8 = vld [vmem:[#allocation108_spill] sm:$0xff] }
 0x2ae   :  { %1348 = vmatpush1.bf16.msra.mxu0 %v5373_v28  ;;  %1389 = vmatpush1.bf16.msra.mxu1 %v5374_v26  ;;  %v5384_v28 = vld [vmem:[#allocation109_spill] sm:$0xff]  ;;  %v5385_v26 = vld [vmem:[#allocation110_spill] sm:$0xff] }
 0x2af   :  { %1349 = vmatprep.subr.bf16.mxu0 %v5375_v33  ;;  %1390 = vmatprep.subr.bf16.mxu1 %v5376_v52  ;;  %v5386_v33 = vld [vmem:[#allocation111_spill] sm:$0xff]  ;;  %v5387_v52 = vld [vmem:[#allocation112_spill] sm:$0xff] }
 0x2b2   :  { %1350 = vmatpush1.bf16.msra.mxu0 %v5377_v43  ;;  %1391 = vmatpush1.bf16.msra.mxu1 %v5378_v59  ;;  %v5388_v43 = vld [vmem:[#allocation113_spill] sm:$0xff]  ;;  %v5389_v59 = vld [vmem:[#allocation114_spill] sm:$0xff] }
 0x2b3   :  { %1351 = vmatprep.subr.bf16.mxu0 %v5379_v16  ;;  %1392 = vmatprep.subr.bf16.mxu1 %v5380_v1  ;;  %v5390_v16 = vld [vmem:[#allocation115_spill] sm:$0xff]  ;;  %v5391_v1 = vld [vmem:[#allocation116_spill] sm:$0xff] }
 0x2b6   :  { %1352 = vmatpush1.bf16.msra.mxu0 %v5381_v10  ;;  %1393 = vmatpush1.bf16.msra.mxu1 %v5382_v35  ;;  %v5392_v10 = vld [vmem:[#allocation117_spill] sm:$0xff]  ;;  %v5393_v35 = vld [vmem:[#allocation118_spill] sm:$0xff] }
 0x2b7   :  { %1353 = vmatprep.subr.bf16.mxu0 %v5383_v8  ;;  %1394 = vmatprep.subr.bf16.mxu1 %v5384_v28  ;;  %v5394_v8 = vld [vmem:[#allocation119_spill] sm:$0xff]  ;;  %v5395_v28 = vld [vmem:[#allocation120_spill] sm:$0xff] }
 0x2ba   :  { %1354 = vmatpush1.bf16.msra.mxu0 %v5385_v26  ;;  %1395 = vmatpush1.bf16.msra.mxu1 %v5386_v33  ;;  %v5396_v26 = vld [vmem:[#allocation121_spill] sm:$0xff]  ;;  %v5397_v33 = vld [vmem:[#allocation122_spill] sm:$0xff] }
 0x2bb   :  { %1355 = vmatprep.subr.bf16.mxu0 %v5387_v52  ;;  %1396 = vmatprep.subr.bf16.mxu1 %v5388_v43  ;;  %v5398_v52 = vld [vmem:[#allocation123_spill] sm:$0xff]  ;;  %v5399_v43 = vld [vmem:[#allocation124_spill] sm:$0xff] }
 0x2be   :  { %1356 = vmatpush1.bf16.msra.mxu0 %v5389_v59  ;;  %1397 = vmatpush1.bf16.msra.mxu1 %v5390_v16  ;;  %v5400_v59 = vld [vmem:[#allocation125_spill] sm:$0xff]  ;;  %v5401_v16 = vld [vmem:[#allocation126_spill] sm:$0xff] }
 0x2bf   :  { %1357 = vmatprep.subr.bf16.mxu0 %v5391_v1  ;;  %1398 = vmatprep.subr.bf16.mxu1 %v5392_v10  ;;  %v5402_v1 = vld [vmem:[#allocation127_spill] sm:$0xff]  ;;  %v5403_v10 = vld [vmem:[#allocation128_spill] sm:$0xff] }
 0x2c2   :  { %1358 = vmatpush1.bf16.msra.mxu0 %v5393_v35  ;;  %1399 = vmatpush1.bf16.msra.mxu1 %v5394_v8  ;;  %v5404_v35 = vld [vmem:[#allocation129_spill] sm:$0xff]  ;;  %v5405_v8 = vld [vmem:[#allocation130_spill] sm:$0xff] }
 0x2c3   :  { %1359 = vmatprep.subr.bf16.mxu0 %v5395_v28  ;;  %1400 = vmatprep.subr.bf16.mxu1 %v5396_v26  ;;  %v5406_v28 = vld [vmem:[#allocation131_spill] sm:$0xff]  ;;  %v5407_v26 = vld [vmem:[#allocation132_spill] sm:$0xff] }
 0x2c6   :  { %1360 = vmatpush1.bf16.msra.mxu0 %v5397_v33  ;;  %1401 = vmatpush1.bf16.msra.mxu1 %v5398_v52  ;;  %v5408_v33 = vld [vmem:[#allocation133_spill] sm:$0xff] }
 0x2c7   :  { %1361 = vmatprep.subr.bf16.mxu0 %v5399_v43  ;;  %1402 = vmatprep.subr.bf16.mxu1 %v5400_v59 }
 0x2ca   :  { %1362 = vmatpush1.bf16.msra.mxu0 %v5401_v16  ;;  %1403 = vmatpush1.bf16.msra.mxu1 %v5402_v1  ;;  %v5409_v16 = vld [vmem:[#allocation137_spill] sm:$0xff]  ;;  %v5410_v1 = vld [vmem:[#allocation138_spill] sm:$0xff] }
 0x2cb   :  { %1363 = vmatprep.subr.bf16.mxu0 %v5403_v10  ;;  %1404 = vmatprep.subr.bf16.mxu1 %v5404_v35 }
 0x2ce   :  { %1364 = vmatpush1.bf16.msra.mxu0 %v5405_v8  ;;  %1405 = vmatpush1.bf16.msra.mxu1 %v5406_v28 }
 0x2cf   :  { %1365 = vmatprep.subr.bf16.mxu0 %v5407_v26  ;;  %1406 = vmatprep.subr.bf16.mxu1 %v5408_v33 }
 0x2d2   :  { %1366 = vmatpush1.bf16.msra.mxu0 %v3830_v45  ;;  %1407 = vmatpush1.bf16.msra.mxu1 %v3832_v7 }
 0x2d3   :  { %1367 = vmatprep.subr.bf16.mxu0 %v3836_v61  ;;  %1408 = vmatprep.subr.bf16.mxu1 %v5409_v16 }
 0x2d6   :  { %1368 = vmatpush1.bf16.msra.mxu0 %v5410_v1  ;;  %1409 = vmatpush1.bf16.msra.mxu1 %v3844_v14 }
 0x2d7   :  { %1369 = vmatprep.subr.bf16.mxu0 %v3848_v36  ;;  %1410 = vmatprep.subr.bf16.mxu1 %v3850_v63 }
 0x2da   :  { %1370 = vmatpush1.bf16.msra.mxu0 %v3854_v2  ;;  %1411 = vmatpush1.bf16.msra.mxu1 %v3856_v5 }
 0x2db   :  { %1371 = vmatprep.subr.bf16.mxu0 %v3860_v44  ;;  %1412 = vmatprep.subr.bf16.mxu1 %v3862_v12 }
 0x2de   :  { %1372 = vmatpush1.bf16.msra.mxu0 %v3866_v6  ;;  %1413 = vmatpush1.bf16.msra.mxu1 %v3868_v55 }
 0x2df   :  { %1499 = vmatprep.subr.bf16.mxu0 %v3449_v11  ;;  %1540 = vmatprep.subr.bf16.mxu1 %v3454_v17 }
 0x2e1   :  { %1374 = vmatmul.mubr.bf16.vlgmr.msra.gmra.mrb[16].mxu0 %v3973_v47  ;;  %1415 = vmatmul.mubr.bf16.vlgmr.msra.gmra.mrb[16].mxu1 %v3973_v47  ;;  %v5411_v47 = vld [vmem:[#allocation43_spill] sm:$0xff] }
 0x2e2   :  { %1500 = vmatpush1.bf16.msra.mxu0 %v3457_v21  ;;  %1541 = vmatpush1.bf16.msra.mxu1 %v3460_v22 }
 0x2e3   :  { %1501 = vmatprep.subr.bf16.mxu0 %v3462_v23  ;;  %1542 = vmatprep.subr.bf16.mxu1 %v3465_v24 }
 0x2e6   :  { %1502 = vmatpush1.bf16.msra.mxu0 %v3468_v29  ;;  %1543 = vmatpush1.bf16.msra.mxu1 %v3472_v30 }
 0x2e7   :  { %1503 = vmatprep.subr.bf16.mxu0 %v3474_v31  ;;  %1544 = vmatprep.subr.bf16.mxu1 %v3477_v32 }
 0x2ea   :  { %1504 = vmatpush1.bf16.msra.mxu0 %v3480_v37  ;;  %1545 = vmatpush1.bf16.msra.mxu1 %v3484_v38 }
 0x2eb   :  { %1505 = vmatprep.subr.bf16.mxu0 %v3486_v39  ;;  %1546 = vmatprep.subr.bf16.mxu1 %v3489_v40  ;;  %v5449_v40 = vld [vmem:[#allocation84_spill] sm:$0xff] }
 0x2ee   :  { %1506 = vmatpush1.bf16.msra.mxu0 %v3492_v41  ;;  %1547 = vmatpush1.bf16.msra.mxu1 %v3496_v42 }
 0x2ef   :  { %1507 = vmatprep.subr.bf16.mxu0 %v3501_v46  ;;  %1548 = vmatprep.subr.bf16.mxu1 %v3503_v48 }
 0x2f2   :  { %1508 = vmatpush1.bf16.msra.mxu0 %v3505_v49  ;;  %1549 = vmatpush1.bf16.msra.mxu1 %v3507_v50  ;;  %v5412_v49 = vld [vmem:[#allocation44_spill] sm:$0xff]  ;;  %v5413_v50 = vld [vmem:[#allocation45_spill] sm:$0xff] }
 0x2f3   :  { %1509 = vmatprep.subr.bf16.mxu0 %v3513_v54  ;;  %1550 = vmatprep.subr.bf16.mxu1 %v3515_v56  ;;  %v5414_v54 = vld [vmem:[#allocation46_spill] sm:$0xff]  ;;  %v5415_v56 = vld [vmem:[#allocation47_spill] sm:$0xff] }
 0x2f6   :  { %1510 = vmatpush1.bf16.msra.mxu0 %v3517_v57  ;;  %1551 = vmatpush1.bf16.msra.mxu1 %v3519_v58  ;;  %v5416_v57 = vld [vmem:[#allocation48_spill] sm:$0xff]  ;;  %v5417_v58 = vld [vmem:[#allocation49_spill] sm:$0xff] }
 0x2f7   :  { %1511 = vmatprep.subr.bf16.mxu0 %v3525_v62  ;;  %1552 = vmatprep.subr.bf16.mxu1 %v3529_v3  ;;  %v5418_v62 = vld [vmem:[#allocation50_spill] sm:$0xff]  ;;  %v5419_v3 = vld [vmem:[#allocation51_spill] sm:$0xff] }
 0x2fa   :  { %1512 = vmatpush1.bf16.msra.mxu0 %v3527_v0  ;;  %1553 = vmatpush1.bf16.msra.mxu1 %v3531_v4  ;;  %v5420_v0 = vld [vmem:[#allocation52_spill] sm:$0xff]  ;;  %v5421_v4 = vld [vmem:[#allocation53_spill] sm:$0xff] }
 0x2fb   :  { %1513 = vmatprep.subr.bf16.mxu0 %v5411_v47  ;;  %1554 = vmatprep.subr.bf16.mxu1 %v5412_v49  ;;  %v5422_v47 = vld [vmem:[#allocation54_spill] sm:$0xff]  ;;  %v5423_v49 = vld [vmem:[#allocation55_spill] sm:$0xff] }
 0x2fe   :  { %1514 = vmatpush1.bf16.msra.mxu0 %v5413_v50  ;;  %1555 = vmatpush1.bf16.msra.mxu1 %v5414_v54  ;;  %v5424_v50 = vld [vmem:[#allocation56_spill] sm:$0xff]  ;;  %v5425_v54 = vld [vmem:[#allocation57_spill] sm:$0xff] }
 0x2ff   :  { %1515 = vmatprep.subr.bf16.mxu0 %v5415_v56  ;;  %1556 = vmatprep.subr.bf16.mxu1 %v5416_v57  ;;  %v5426_v56 = vld [vmem:[#allocation58_spill] sm:$0xff]  ;;  %v5427_v57 = vld [vmem:[#allocation59_spill] sm:$0xff] }
 0x302   :  { %1516 = vmatpush1.bf16.msra.mxu0 %v5417_v58  ;;  %1557 = vmatpush1.bf16.msra.mxu1 %v5418_v62  ;;  %v5428_v58 = vld [vmem:[#allocation60_spill] sm:$0xff]  ;;  %v5429_v62 = vld [vmem:[#allocation61_spill] sm:$0xff] }
 0x303   :  { %1517 = vmatprep.subr.bf16.mxu0 %v5419_v3  ;;  %1558 = vmatprep.subr.bf16.mxu1 %v5420_v0  ;;  %v5430_v3 = vld [vmem:[#allocation62_spill] sm:$0xff]  ;;  %v5431_v0 = vld [vmem:[#allocation63_spill] sm:$0xff] }
 0x306   :  { %1518 = vmatpush1.bf16.msra.mxu0 %v5421_v4  ;;  %1559 = vmatpush1.bf16.msra.mxu1 %v5422_v47  ;;  %v5432_v4 = vld [vmem:[#allocation64_spill] sm:$0xff]  ;;  %v5433_v47 = vld [vmem:[#allocation65_spill] sm:$0xff] }
 0x307   :  { %1519 = vmatprep.subr.bf16.mxu0 %v5423_v49  ;;  %1560 = vmatprep.subr.bf16.mxu1 %v5424_v50  ;;  %v5434_v49 = vld [vmem:[#allocation66_spill] sm:$0xff]  ;;  %v5435_v50 = vld [vmem:[#allocation67_spill] sm:$0xff] }
 0x30a   :  { %1520 = vmatpush1.bf16.msra.mxu0 %v5425_v54  ;;  %1561 = vmatpush1.bf16.msra.mxu1 %v5426_v56  ;;  %v5436_v54 = vld [vmem:[#allocation68_spill] sm:$0xff]  ;;  %v5437_v56 = vld [vmem:[#allocation69_spill] sm:$0xff] }
 0x30b   :  { %1521 = vmatprep.subr.bf16.mxu0 %v5427_v57  ;;  %1562 = vmatprep.subr.bf16.mxu1 %v5428_v58  ;;  %v5438_v57 = vld [vmem:[#allocation70_spill] sm:$0xff]  ;;  %v5439_v58 = vld [vmem:[#allocation71_spill] sm:$0xff] }
 0x30e   :  { %1522 = vmatpush1.bf16.msra.mxu0 %v5429_v62  ;;  %1563 = vmatpush1.bf16.msra.mxu1 %v5430_v3  ;;  %v5440_v62 = vld [vmem:[#allocation72_spill] sm:$0xff]  ;;  %v5441_v3 = vld [vmem:[#allocation73_spill] sm:$0xff] }
 0x30f   :  { %1523 = vmatprep.subr.bf16.mxu0 %v5431_v0  ;;  %1564 = vmatprep.subr.bf16.mxu1 %v5432_v4  ;;  %v5442_v0 = vld [vmem:[#allocation74_spill] sm:$0xff]  ;;  %v5443_v4 = vld [vmem:[#allocation75_spill] sm:$0xff] }
 0x312   :  { %1524 = vmatpush1.bf16.msra.mxu0 %v5433_v47  ;;  %1565 = vmatpush1.bf16.msra.mxu1 %v5434_v49  ;;  %v5444_v47 = vld [vmem:[#allocation76_spill] sm:$0xff]  ;;  %v5445_v49 = vld [vmem:[#allocation77_spill] sm:$0xff] }
 0x313   :  { %1525 = vmatprep.subr.bf16.mxu0 %v5435_v50  ;;  %1566 = vmatprep.subr.bf16.mxu1 %v5436_v54  ;;  %v5446_v50 = vld [vmem:[#allocation78_spill] sm:$0xff]  ;;  %v5447_v54 = vld [vmem:[#allocation79_spill] sm:$0xff] }
 0x316   :  { %1526 = vmatpush1.bf16.msra.mxu0 %v5437_v56  ;;  %1567 = vmatpush1.bf16.msra.mxu1 %v5438_v57  ;;  %v5448_v56 = vld [vmem:[#allocation80_spill] sm:$0xff] }
 0x317   :  { %1527 = vmatprep.subr.bf16.mxu0 %v5439_v58  ;;  %1568 = vmatprep.subr.bf16.mxu1 %v5440_v62 }
 0x31a   :  { %1528 = vmatpush1.bf16.msra.mxu0 %v5441_v3  ;;  %1569 = vmatpush1.bf16.msra.mxu1 %v5442_v0 }
 0x31b   :  { %1529 = vmatprep.subr.bf16.mxu0 %v5443_v4  ;;  %1570 = vmatprep.subr.bf16.mxu1 %v5444_v47 }
 0x31e   :  { %1530 = vmatpush1.bf16.msra.mxu0 %v5445_v49  ;;  %1571 = vmatpush1.bf16.msra.mxu1 %v5446_v50 }
 0x31f   :  { %1581 = vmatprep.subr.bf16.mxu0 %v5447_v54  ;;  %1622 = vmatprep.subr.bf16.mxu1 %v5448_v56  ;;  %v5450_v56 = vld [vmem:[#allocation85_spill] sm:$0xff] }
 0x374   :  { %v1293_v57 = vpop.f32.mrb[12].mxu0  ;;  %v1334_v58 = vpop.f32.mrb[12].mxu1 }
 0x375   :  { %v1452_v48 = vrot.slane %v1293_v57, 6  ;;  %v1295_v62 = vpop.f32.mrb[13].mxu0  ;;  %v1336_v46 = vpop.f32.mrb[13].mxu1  ;;  %v1454_v50 = vrot.slane %v1334_v58, 6 }
 0x376   :  { %v1453_v3 = vrot.slane %v1295_v62, 6  ;;  %v1297_v42 = vpop.f32.mrb[14].mxu0  ;;  %v1338_v0 = vpop.f32.mrb[14].mxu1  ;;  %v1455_v57 = vrot.slane %v1336_v46, 6  ;;  %v5451_v62 = vld [vmem:[#allocation86_spill] sm:$0xff] }
 0x377   :  { %v1460_v4 = vadd.f32 %v1452_v48, %v5347_v34  ;;  %v1298_v41 = vpop.f32.mrb[15].mxu0  ;;  %v1339_v47 = vpop.f32.mrb[15].mxu1  ;;  %v1462_v32 = vadd.f32 %v1454_v50, %v5450_v56 }
 0x378   :  { %v1461_v49 = vadd.f32 %v1453_v3, %v5449_v40  ;;  %v1463_v42 = vadd.f32 %v1455_v57, %v5451_v62  ;;  %v5455_v62 = vld [vmem:[#allocation148_spill] sm:$0xff] }
 0x379   :  { %v1464_v39 = vsub.f32 0.0, %v1460_v4  ;;  %v1466_v31 = vsub.f32 0.0, %v1462_v32 }
 0x37a   :  { %v1465_v38 = vsub.f32 0.0, %v1461_v49 }
 0x37b   :  { %v1467_v54 = vmul.f32 1.442695, %v1464_v39  ;;  %v1471_v0 = vmul.f32 1.442695, %v1466_v31 }
 0x37c   :  { %v1469_v37 = vmul.f32 1.442695, %v1465_v38 }
 0x37d   :  { %3041 = vpow2.f32 %v1467_v54  ;;  %v5452_v54 = vld [vmem:[#allocation87_spill] sm:$0xff] }
 0x37e   :  { %3043 = vpow2.f32 %v1469_v37  ;;  %v1481_v58 = vrot.slane %v5452_v54, 7 }
 0x37f   :  { %3045 = vtanh.f32 %v1463_v42 }
 0x380   :  { %3047 = vpow2.f32 %v1471_v0  ;;  %v5454_v0 = vld [vmem:[#allocation82_spill] sm:$0xff] }
 0x387   :  { %v3042_v30 = vpop.eup %3041 }
 0x388   :  { %v1473_v48 = vadd.f32 1.0, %v3042_v30  ;;  %v3044_v41 = vpop.eup %3043 }
 0x389   :  { %v1474_v3 = vadd.f32 1.0, %v3044_v41  ;;  %v3046_v49 = vpop.eup %3045 }
 0x38a   :  { %3049 = vrcp.f32 %v1473_v48  ;;  %v3048_v39 = vpop.eup %3047 }
 0x38b   :  { %3051 = vrcp.f32 %v1474_v3  ;;  %v1475_v46 = vadd.f32 1.0, %v3048_v39 }
 0x38d   :  { %3053 = vrcp.f32 %v1475_v46 }
 0x394   :  { %v3050_v38 = vpop.eup %3049 }
 0x395   :  { %v1484_v50 = vmul.f32 %v3050_v38, %v3046_v49  ;;  %v3052_v37 = vpop.eup %3051 }
 0x396   :  { %v1483_v32 = vmul.f32 %v3052_v37, %v1481_v58 }
 0x397   :  { %v3054_v30 = vpop.eup %3053 }
 0x398   :  { %v4112_v4 = vadd.f32 %v1484_v50, %v1483_v32 }
 0x39a   :  { %5453 = vst [vmem:[#allocation81_spill] sm:$0xff] %v4112_v4  ;;  %3055 = vtanh.f32 %v4112_v4 }
 0x3a4   :  { %v3056_v31 = vpop.eup %3055 }
 0x3a5   :  { %v1487_v47 = vmul.f32 %v3056_v31, %v3054_v30 }
 0x3b4   :  { %v1375_v57 = vpop.f32.mrb[16].mxu0  ;;  %v1416_v42 = vpop.f32.mrb[16].mxu1 }
 0x3b5   :  { %v1423_v48 = vadd.f32 %v1375_v57, %v5454_v0  ;;  %v1377_v41 = vpop.f32.mrb[17].mxu0  ;;  %v1418_v3 = vpop.f32.mrb[17].mxu1  ;;  %v1425_v4 = vadd.f32 %v1416_v42, %v3962_v9 }
 0x3b6   :  { %v1424_v54 = vadd.f32 %v1377_v41, %v5455_v62  ;;  %v1379_v49 = vpop.f32.mrb[18].mxu0  ;;  %v1420_v38 = vpop.f32.mrb[18].mxu1  ;;  %v1426_v31 = vadd.f32 %v1418_v3, %v3967_v51 }
 0x3b7   :  { %v1427_v39 = vsub.f32 0.0, %v1423_v48  ;;  %v1380_v58 = vpop.f32.mrb[19].mxu0  ;;  %v1421_v50 = vpop.f32.mrb[19].mxu1  ;;  %v1429_v30 = vsub.f32 0.0, %v1425_v4 }
 0x3b8   :  { %v1428_v37 = vsub.f32 0.0, %v1424_v54 }
 0x3b9   :  { %v1430_v46 = vmul.f32 1.442695, %v1427_v39  ;;  %v1434_v57 = vmul.f32 1.442695, %v1429_v30 }
 0x3ba   :  { %v1432_v32 = vmul.f32 1.442695, %v1428_v37 }
 0x3bb   :  { %3057 = vpow2.f32 %v1430_v46 }
 0x3bc   :  { %3059 = vpow2.f32 %v1432_v32 }
 0x3bd   :  { %3061 = vtanh.f32 %v1426_v31 }
 0x3be   :  { %3063 = vpow2.f32 %v1434_v57  ;;  %v5458_v57 = vld [vmem:[#allocation96_spill] sm:$0xff] }
 0x3c5   :  { %v3058_v0 = vpop.eup %3057 }
 0x3c6   :  { %v1436_v56 = vadd.f32 1.0, %v3058_v0  ;;  %v3060_v41 = vpop.eup %3059 }
 0x3c7   :  { %v1437_v48 = vadd.f32 1.0, %v3060_v41  ;;  %v3062_v49 = vpop.eup %3061  ;;  %v5459_v41 = vld [vmem:[#allocation97_spill] sm:$0xff] }
 0x3c8   :  { %3065 = vrcp.f32 %v1436_v56  ;;  %v3064_v54 = vpop.eup %3063  ;;  %v1491_v56 = vpack.c.bf16 %v1487_v47, %v1487_v47  ;;  %v5457_v47 = vld [vmem:[#allocation95_spill] sm:$0xff] }
 0x3c9   :  { %3067 = vrcp.f32 %v1437_v48  ;;  %v1438_v50 = vadd.f32 1.0, %v3064_v54  ;;  %v5460_v48 = vld [vmem:[#allocation98_spill] sm:$0xff]  ;;  %v5462_v54 = vld [vmem:[#allocation100_spill] sm:$0xff] }
 0x3ca   :  { %v4123_v31 = vrot.slane %v1491_v56, 1  ;;  %v5472_v56 = vld [vmem:[#allocation110_spill] sm:$0xff] }
 0x3cb   :  { %3069 = vrcp.f32 %v1438_v50  ;;  %v5466_v50 = vld [vmem:[#allocation104_spill] sm:$0xff] }
 0x3d2   :  { %v3066_v38 = vpop.eup %3065 }
 0x3d3   :  { %v1444_v39 = vmul.f32 %v3066_v38, %v3062_v49  ;;  %v3068_v58 = vpop.eup %3067  ;;  %v5461_v49 = vld [vmem:[#allocation99_spill] sm:$0xff]  ;;  %v5463_v38 = vld [vmem:[#allocation101_spill] sm:$0xff] }
 0x3d4   :  { %v1443_v42 = vmul.f32 %v3068_v58, %v3970_v13  ;;  %v5456_v13 = vld [vmem:[#allocation94_spill] sm:$0xff]  ;;  %v5465_v58 = vld [vmem:[#allocation103_spill] sm:$0xff] }
 0x3d5   :  { %v3070_v0 = vpop.eup %3069 }
 0x3d6   :  { %v4120_v4 = vadd.f32 %v1444_v39, %v1443_v42  ;;  %v5464_v39 = vld [vmem:[#allocation102_spill] sm:$0xff]  ;;  %v5467_v42 = vld [vmem:[#allocation105_spill] sm:$0xff] }
 0x3d8   :  { %3071 = vtanh.f32 %v4120_v4 }
 0x3e2   :  { %v3072_v3 = vpop.eup %3071 }
 0x3e3   :  { %v1447_v37 = vmul.f32 %v3072_v3, %v3070_v0  ;;  %v5468_v0 = vld [vmem:[#allocation106_spill] sm:$0xff]  ;;  %v5469_v3 = vld [vmem:[#allocation107_spill] sm:$0xff] }
 0x3e5   :  { %v1489_v46 = vrot.slane %v1447_v37, 6  ;;  %v5470_v37 = vld [vmem:[#allocation108_spill] sm:$0xff] }
 0x3e7   :  { %v1492_v32 = vpack.c.bf16 %v1489_v46, %v1489_v46  ;;  %v5471_v46 = vld [vmem:[#allocation109_spill] sm:$0xff] }
 0x3e9   :  { %v1496_v30 = vrot.slane %v1492_v32, 1  ;;  %v5473_v32 = vld [vmem:[#allocation111_spill] sm:$0xff] }
 0x3eb   :  { %1531 = vmatprep.mubr.bf16.mxu0 %v1496_v30  ;;  %1572 = vmatprep.mubr.bf16.mxu1 %v1496_v30 }
 0x3ec   :  { %1532 = vmatmul.mubr.bf16.vlgmr.msra.gmra.mrb[20].mxu0 %v4123_v31  ;;  %1573 = vmatmul.mubr.bf16.vlgmr.msra.gmra.mrb[20].mxu1 %v4123_v31 }
 0x3ed   :  { %1582 = vmatpush1.bf16.msra.mxu0 %v3653_v25  ;;  %1623 = vmatpush1.bf16.msra.mxu1 %v5362_v15 }
 0x3ee   :  { %1613 = vmatprep.mubr.bf16.mxu0 %v1496_v30  ;;  %1654 = vmatprep.mubr.bf16.mxu1 %v1496_v30  ;;  %v5474_v30 = vld [vmem:[#allocation112_spill] sm:$0xff] }
 0x3ef   :  { %1583 = vmatprep.subr.bf16.mxu0 %v5363_v18  ;;  %1624 = vmatprep.subr.bf16.mxu1 %v5364_v20 }
 0x3f1   :  { %1584 = vmatpush1.bf16.msra.mxu0 %v5365_v27  ;;  %1625 = vmatpush1.bf16.msra.mxu1 %v5366_v60 }
 0x3f2   :  { %1585 = vmatprep.subr.bf16.mxu0 %v5367_v53  ;;  %1626 = vmatprep.subr.bf16.mxu1 %v5368_v19 }
 0x3f5   :  { %1586 = vmatpush1.bf16.msra.mxu0 %v5456_v13  ;;  %1627 = vmatpush1.bf16.msra.mxu1 %v5457_v47 }
 0x3f6   :  { %1587 = vmatprep.subr.bf16.mxu0 %v5458_v57  ;;  %1628 = vmatprep.subr.bf16.mxu1 %v5459_v41 }
 0x3f9   :  { %1588 = vmatpush1.bf16.msra.mxu0 %v5460_v48  ;;  %1629 = vmatpush1.bf16.msra.mxu1 %v5461_v49 }
 0x3fa   :  { %1589 = vmatprep.subr.bf16.mxu0 %v5462_v54  ;;  %1630 = vmatprep.subr.bf16.mxu1 %v5463_v38 }
 0x3fd   :  { %1590 = vmatpush1.bf16.msra.mxu0 %v5464_v39  ;;  %1631 = vmatpush1.bf16.msra.mxu1 %v5465_v58  ;;  %v5475_v39 = vld [vmem:[#allocation113_spill] sm:$0xff]  ;;  %v5476_v58 = vld [vmem:[#allocation114_spill] sm:$0xff] }
 0x3fe   :  { %1591 = vmatprep.subr.bf16.mxu0 %v5466_v50  ;;  %1632 = vmatprep.subr.bf16.mxu1 %v5467_v42  ;;  %v5477_v50 = vld [vmem:[#allocation115_spill] sm:$0xff]  ;;  %v5478_v42 = vld [vmem:[#allocation116_spill] sm:$0xff] }
 0x401   :  { %1592 = vmatpush1.bf16.msra.mxu0 %v5468_v0  ;;  %1633 = vmatpush1.bf16.msra.mxu1 %v5469_v3  ;;  %v5479_v0 = vld [vmem:[#allocation117_spill] sm:$0xff]  ;;  %v5480_v3 = vld [vmem:[#allocation118_spill] sm:$0xff] }
 0x402   :  { %1593 = vmatprep.subr.bf16.mxu0 %v5470_v37  ;;  %1634 = vmatprep.subr.bf16.mxu1 %v5471_v46  ;;  %v5481_v37 = vld [vmem:[#allocation119_spill] sm:$0xff]  ;;  %v5482_v46 = vld [vmem:[#allocation120_spill] sm:$0xff] }
 0x405   :  { %1594 = vmatpush1.bf16.msra.mxu0 %v5472_v56  ;;  %1635 = vmatpush1.bf16.msra.mxu1 %v5473_v32  ;;  %v5483_v56 = vld [vmem:[#allocation121_spill] sm:$0xff]  ;;  %v5484_v32 = vld [vmem:[#allocation122_spill] sm:$0xff] }
 0x406   :  { %1595 = vmatprep.subr.bf16.mxu0 %v5474_v30  ;;  %1636 = vmatprep.subr.bf16.mxu1 %v5475_v39 }
 0x409   :  { %1596 = vmatpush1.bf16.msra.mxu0 %v5476_v58  ;;  %1637 = vmatpush1.bf16.msra.mxu1 %v5477_v50  ;;  %v5485_v50 = vld [vmem:[#allocation126_spill] sm:$0xff] }
 0x40a   :  { %1597 = vmatprep.subr.bf16.mxu0 %v5478_v42  ;;  %1638 = vmatprep.subr.bf16.mxu1 %v5479_v0  ;;  %v5486_v42 = vld [vmem:[#allocation127_spill] sm:$0xff] }
 0x40d   :  { %1598 = vmatpush1.bf16.msra.mxu0 %v5480_v3  ;;  %1639 = vmatpush1.bf16.msra.mxu1 %v5481_v37 }
 0x40e   :  { %1599 = vmatprep.subr.bf16.mxu0 %v5482_v46  ;;  %1640 = vmatprep.subr.bf16.mxu1 %v5483_v56 }
 0x411   :  { %1600 = vmatpush1.bf16.msra.mxu0 %v5484_v32  ;;  %1641 = vmatpush1.bf16.msra.mxu1 %v5398_v52 }
 0x412   :  { %1601 = vmatprep.subr.bf16.mxu0 %v5399_v43  ;;  %1642 = vmatprep.subr.bf16.mxu1 %v5400_v59 }
 0x415   :  { %1602 = vmatpush1.bf16.msra.mxu0 %v5485_v50  ;;  %1643 = vmatpush1.bf16.msra.mxu1 %v5486_v42 }
 0x416   :  { %1603 = vmatprep.subr.bf16.mxu0 %v5403_v10  ;;  %1644 = vmatprep.subr.bf16.mxu1 %v5404_v35 }
 0x419   :  { %1604 = vmatpush1.bf16.msra.mxu0 %v5405_v8  ;;  %1645 = vmatpush1.bf16.msra.mxu1 %v5406_v28 }
 0x41a   :  { %1605 = vmatprep.subr.bf16.mxu0 %v5407_v26  ;;  %1646 = vmatprep.subr.bf16.mxu1 %v5408_v33 }
 0x41d   :  { %1606 = vmatpush1.bf16.msra.mxu0 %v3830_v45  ;;  %1647 = vmatpush1.bf16.msra.mxu1 %v3832_v7 }
 0x41e   :  { %1607 = vmatprep.subr.bf16.mxu0 %v3836_v61  ;;  %1648 = vmatprep.subr.bf16.mxu1 %v5409_v16 }
 0x421   :  { %1608 = vmatpush1.bf16.msra.mxu0 %v5410_v1  ;;  %1649 = vmatpush1.bf16.msra.mxu1 %v3844_v14 }
 0x422   :  { %1609 = vmatprep.subr.bf16.mxu0 %v3848_v36  ;;  %1650 = vmatprep.subr.bf16.mxu1 %v3850_v63 }
 0x425   :  { %1610 = vmatpush1.bf16.msra.mxu0 %v3854_v2  ;;  %1651 = vmatpush1.bf16.msra.mxu1 %v3856_v5 }
 0x426   :  { %1611 = vmatprep.subr.bf16.mxu0 %v3860_v44  ;;  %1652 = vmatprep.subr.bf16.mxu1 %v3862_v12  ;;  %v5491_v12 = vld [vmem:[#allocation26_spill] sm:$0xff] }
 0x429   :  { %1612 = vmatpush1.bf16.msra.mxu0 %v3866_v6  ;;  %1653 = vmatpush1.bf16.msra.mxu1 %v3868_v55  ;;  %v5487_v6 = vld [vmem:[#allocation22_spill] sm:$0xff]  ;;  %v5488_v55 = vld [vmem:[#allocation23_spill] sm:$0xff] }
 0x42a   :  { %1743 = vmatprep.subr.bf16.mxu0 %v3449_v11  ;;  %1784 = vmatprep.subr.bf16.mxu1 %v3454_v17  ;;  %v5489_v11 = vld [vmem:[#allocation24_spill] sm:$0xff]  ;;  %v5490_v17 = vld [vmem:[#allocation25_spill] sm:$0xff] }
 0x42c   :  { %1614 = vmatmul.mubr.bf16.vlgmr.msra.gmra.mrb[24].mxu0 %v4123_v31  ;;  %1655 = vmatmul.mubr.bf16.vlgmr.msra.gmra.mrb[24].mxu1 %v4123_v31  ;;  %v5492_v31 = vld [vmem:[#allocation27_spill] sm:$0xff] }
 0x42d   :  { %1744 = vmatpush1.bf16.msra.mxu0 %v3457_v21  ;;  %1785 = vmatpush1.bf16.msra.mxu1 %v3460_v22  ;;  %v5493_v21 = vld [vmem:[#allocation28_spill] sm:$0xff]  ;;  %v5494_v22 = vld [vmem:[#allocation29_spill] sm:$0xff] }
 0x42e   :  { %1745 = vmatprep.subr.bf16.mxu0 %v3462_v23  ;;  %1786 = vmatprep.subr.bf16.mxu1 %v3465_v24  ;;  %v5495_v23 = vld [vmem:[#allocation30_spill] sm:$0xff]  ;;  %v5496_v24 = vld [vmem:[#allocation31_spill] sm:$0xff] }
 0x431   :  { %1746 = vmatpush1.bf16.msra.mxu0 %v3468_v29  ;;  %1787 = vmatpush1.bf16.msra.mxu1 %v5487_v6  ;;  %v5497_v29 = vld [vmem:[#allocation32_spill] sm:$0xff]  ;;  %v5498_v6 = vld [vmem:[#allocation33_spill] sm:$0xff] }
 0x432   :  { %1747 = vmatprep.subr.bf16.mxu0 %v5488_v55  ;;  %1788 = vmatprep.subr.bf16.mxu1 %v5489_v11  ;;  %v5499_v55 = vld [vmem:[#allocation34_spill] sm:$0xff]  ;;  %v5500_v11 = vld [vmem:[#allocation35_spill] sm:$0xff] }
 0x435   :  { %1748 = vmatpush1.bf16.msra.mxu0 %v5490_v17  ;;  %1789 = vmatpush1.bf16.msra.mxu1 %v5491_v12  ;;  %v5501_v17 = vld [vmem:[#allocation36_spill] sm:$0xff]  ;;  %v5502_v12 = vld [vmem:[#allocation37_spill] sm:$0xff] }
 0x436   :  { %1749 = vmatprep.subr.bf16.mxu0 %v5492_v31  ;;  %1790 = vmatprep.subr.bf16.mxu1 %v5493_v21  ;;  %v5503_v31 = vld [vmem:[#allocation38_spill] sm:$0xff]  ;;  %v5504_v21 = vld [vmem:[#allocation39_spill] sm:$0xff] }
 0x439   :  { %1750 = vmatpush1.bf16.msra.mxu0 %v5494_v22  ;;  %1791 = vmatpush1.bf16.msra.mxu1 %v5495_v23  ;;  %v5505_v22 = vld [vmem:[#allocation41_spill] sm:$0xff]  ;;  %v5506_v23 = vld [vmem:[#allocation40_spill] sm:$0xff] }
 0x43a   :  { %1751 = vmatprep.subr.bf16.mxu0 %v5496_v24  ;;  %1792 = vmatprep.subr.bf16.mxu1 %v5497_v29  ;;  %v5507_v24 = vld [vmem:[#allocation42_spill] sm:$0xff]  ;;  %v5508_v29 = vld [vmem:[#allocation43_spill] sm:$0xff] }
 0x43d   :  { %1752 = vmatpush1.bf16.msra.mxu0 %v5498_v6  ;;  %1793 = vmatpush1.bf16.msra.mxu1 %v5499_v55  ;;  %v5509_v6 = vld [vmem:[#allocation44_spill] sm:$0xff]  ;;  %v5510_v55 = vld [vmem:[#allocation45_spill] sm:$0xff] }
 0x43e   :  { %1753 = vmatprep.subr.bf16.mxu0 %v5500_v11  ;;  %1794 = vmatprep.subr.bf16.mxu1 %v5501_v17  ;;  %v5511_v11 = vld [vmem:[#allocation46_spill] sm:$0xff]  ;;  %v5512_v17 = vld [vmem:[#allocation47_spill] sm:$0xff] }
 0x441   :  { %1754 = vmatpush1.bf16.msra.mxu0 %v5502_v12  ;;  %1795 = vmatpush1.bf16.msra.mxu1 %v5503_v31  ;;  %v5513_v12 = vld [vmem:[#allocation48_spill] sm:$0xff]  ;;  %v5514_v31 = vld [vmem:[#allocation49_spill] sm:$0xff] }
 0x442   :  { %1755 = vmatprep.subr.bf16.mxu0 %v5504_v21  ;;  %1796 = vmatprep.subr.bf16.mxu1 %v5505_v22  ;;  %v5515_v21 = vld [vmem:[#allocation50_spill] sm:$0xff]  ;;  %v5516_v22 = vld [vmem:[#allocation51_spill] sm:$0xff] }
 0x445   :  { %1756 = vmatpush1.bf16.msra.mxu0 %v5506_v23  ;;  %1797 = vmatpush1.bf16.msra.mxu1 %v5507_v24  ;;  %v5517_v23 = vld [vmem:[#allocation52_spill] sm:$0xff]  ;;  %v5518_v24 = vld [vmem:[#allocation53_spill] sm:$0xff] }
 0x446   :  { %1757 = vmatprep.subr.bf16.mxu0 %v5508_v29  ;;  %1798 = vmatprep.subr.bf16.mxu1 %v5509_v6  ;;  %v5519_v29 = vld [vmem:[#allocation54_spill] sm:$0xff]  ;;  %v5520_v6 = vld [vmem:[#allocation55_spill] sm:$0xff] }
 0x449   :  { %1758 = vmatpush1.bf16.msra.mxu0 %v5510_v55  ;;  %1799 = vmatpush1.bf16.msra.mxu1 %v5511_v11  ;;  %v5521_v55 = vld [vmem:[#allocation56_spill] sm:$0xff]  ;;  %v5522_v11 = vld [vmem:[#allocation57_spill] sm:$0xff] }
 0x44a   :  { %1759 = vmatprep.subr.bf16.mxu0 %v5512_v17  ;;  %1800 = vmatprep.subr.bf16.mxu1 %v5513_v12  ;;  %v5523_v17 = vld [vmem:[#allocation58_spill] sm:$0xff]  ;;  %v5524_v12 = vld [vmem:[#allocation59_spill] sm:$0xff] }
 0x44d   :  { %1760 = vmatpush1.bf16.msra.mxu0 %v5514_v31  ;;  %1801 = vmatpush1.bf16.msra.mxu1 %v5515_v21  ;;  %v5525_v31 = vld [vmem:[#allocation60_spill] sm:$0xff]  ;;  %v5526_v21 = vld [vmem:[#allocation61_spill] sm:$0xff] }
 0x44e   :  { %1761 = vmatprep.subr.bf16.mxu0 %v5516_v22  ;;  %1802 = vmatprep.subr.bf16.mxu1 %v5517_v23  ;;  %v5527_v22 = vld [vmem:[#allocation62_spill] sm:$0xff]  ;;  %v5528_v23 = vld [vmem:[#allocation63_spill] sm:$0xff] }
 0x451   :  { %1762 = vmatpush1.bf16.msra.mxu0 %v5518_v24  ;;  %1803 = vmatpush1.bf16.msra.mxu1 %v5519_v29  ;;  %v5529_v24 = vld [vmem:[#allocation64_spill] sm:$0xff]  ;;  %v5530_v29 = vld [vmem:[#allocation65_spill] sm:$0xff] }
 0x452   :  { %1763 = vmatprep.subr.bf16.mxu0 %v5520_v6  ;;  %1804 = vmatprep.subr.bf16.mxu1 %v5521_v55  ;;  %v5531_v6 = vld [vmem:[#allocation66_spill] sm:$0xff]  ;;  %v5532_v55 = vld [vmem:[#allocation67_spill] sm:$0xff] }
 0x455   :  { %1764 = vmatpush1.bf16.msra.mxu0 %v5522_v11  ;;  %1805 = vmatpush1.bf16.msra.mxu1 %v5523_v17  ;;  %v5533_v11 = vld [vmem:[#allocation68_spill] sm:$0xff]  ;;  %v5534_v17 = vld [vmem:[#allocation69_spill] sm:$0xff] }
 0x456   :  { %1765 = vmatprep.subr.bf16.mxu0 %v5524_v12  ;;  %1806 = vmatprep.subr.bf16.mxu1 %v5525_v31  ;;  %v5535_v12 = vld [vmem:[#allocation70_spill] sm:$0xff]  ;;  %v5536_v31 = vld [vmem:[#allocation71_spill] sm:$0xff] }
 0x459   :  { %1766 = vmatpush1.bf16.msra.mxu0 %v5526_v21  ;;  %1807 = vmatpush1.bf16.msra.mxu1 %v5527_v22  ;;  %v5537_v21 = vld [vmem:[#allocation72_spill] sm:$0xff]  ;;  %v5538_v22 = vld [vmem:[#allocation73_spill] sm:$0xff] }
 0x45a   :  { %1767 = vmatprep.subr.bf16.mxu0 %v5528_v23  ;;  %1808 = vmatprep.subr.bf16.mxu1 %v5529_v24  ;;  %v5539_v23 = vld [vmem:[#allocation74_spill] sm:$0xff]  ;;  %v5540_v24 = vld [vmem:[#allocation75_spill] sm:$0xff] }
 0x45d   :  { %1768 = vmatpush1.bf16.msra.mxu0 %v5530_v29  ;;  %1809 = vmatpush1.bf16.msra.mxu1 %v5531_v6  ;;  %v5541_v29 = vld [vmem:[#allocation76_spill] sm:$0xff]  ;;  %v5542_v6 = vld [vmem:[#allocation77_spill] sm:$0xff] }
 0x45e   :  { %1769 = vmatprep.subr.bf16.mxu0 %v5532_v55  ;;  %1810 = vmatprep.subr.bf16.mxu1 %v5533_v11  ;;  %v5543_v55 = vld [vmem:[#allocation78_spill] sm:$0xff]  ;;  %v5544_v11 = vld [vmem:[#allocation79_spill] sm:$0xff] }
 0x461   :  { %1770 = vmatpush1.bf16.msra.mxu0 %v5534_v17  ;;  %1811 = vmatpush1.bf16.msra.mxu1 %v5535_v12  ;;  %v5545_v17 = vld [vmem:[#allocation80_spill] sm:$0xff] }
 0x462   :  { %1771 = vmatprep.subr.bf16.mxu0 %v5536_v31  ;;  %1812 = vmatprep.subr.bf16.mxu1 %v5537_v21 }
 0x465   :  { %1772 = vmatpush1.bf16.msra.mxu0 %v5538_v22  ;;  %1813 = vmatpush1.bf16.msra.mxu1 %v5539_v23 }
 0x466   :  { %1773 = vmatprep.subr.bf16.mxu0 %v5540_v24  ;;  %1814 = vmatprep.subr.bf16.mxu1 %v5541_v29 }
 0x469   :  { %1774 = vmatpush1.bf16.msra.mxu0 %v5542_v6  ;;  %1815 = vmatpush1.bf16.msra.mxu1 %v5543_v55 }
 0x46a   :  { %1825 = vmatprep.subr.bf16.mxu0 %v5544_v11  ;;  %1866 = vmatprep.subr.bf16.mxu1 %v5545_v17  ;;  %v5546_v17 = vld [vmem:[#allocation85_spill] sm:$0xff] }
 0x4bf   :  { %v1533_v12 = vpop.f32.mrb[20].mxu0  ;;  %v1574_v31 = vpop.f32.mrb[20].mxu1 }
 0x4c0   :  { %v1692_v44 = vrot.slane %v1533_v12, 5  ;;  %v1535_v21 = vpop.f32.mrb[21].mxu0  ;;  %v1576_v5 = vpop.f32.mrb[21].mxu1  ;;  %v1694_v55 = vrot.slane %v1574_v31, 5 }
 0x4c1   :  { %v1693_v22 = vrot.slane %v1535_v21, 5  ;;  %v1537_v2 = vpop.f32.mrb[22].mxu0  ;;  %v1578_v23 = vpop.f32.mrb[22].mxu1  ;;  %v1695_v12 = vrot.slane %v1576_v5, 5  ;;  %v5547_v21 = vld [vmem:[#allocation86_spill] sm:$0xff] }
 0x4c2   :  { %v1700_v24 = vadd.f32 %v1692_v44, %v5347_v34  ;;  %v1538_v63 = vpop.f32.mrb[23].mxu0  ;;  %v1579_v29 = vpop.f32.mrb[23].mxu1  ;;  %v1702_v16 = vadd.f32 %v1694_v55, %v5546_v17 }
 0x4c3   :  { %v1701_v6 = vadd.f32 %v1693_v22, %v5449_v40  ;;  %v1703_v2 = vadd.f32 %v1695_v12, %v5547_v21 }
 0x4c4   :  { %v1704_v36 = vsub.f32 0.0, %v1700_v24  ;;  %v1706_v61 = vsub.f32 0.0, %v1702_v16 }
 0x4c5   :  { %v1705_v14 = vsub.f32 0.0, %v1701_v6 }
 0x4c6   :  { %v1707_v11 = vmul.f32 1.442695, %v1704_v36  ;;  %v1711_v23 = vmul.f32 1.442695, %v1706_v61 }
 0x4c7   :  { %v1709_v1 = vmul.f32 1.442695, %v1705_v14 }
 0x4c8   :  { %3073 = vpow2.f32 %v1707_v11  ;;  %v5548_v11 = vld [vmem:[#allocation81_spill] sm:$0xff] }
 0x4c9   :  { %3075 = vpow2.f32 %v1709_v1  ;;  %v1721_v36 = vrot.slane %v5548_v11, 7 }
 0x4ca   :  { %3077 = vtanh.f32 %v1703_v2 }
 0x4cb   :  { %3079 = vpow2.f32 %v1711_v23  ;;  %v5550_v23 = vld [vmem:[#allocation82_spill] sm:$0xff] }
 0x4d2   :  { %v3074_v7 = vpop.eup %3073 }
 0x4d3   :  { %v1713_v44 = vadd.f32 1.0, %v3074_v7  ;;  %v3076_v29 = vpop.eup %3075 }
 0x4d4   :  { %v1714_v22 = vadd.f32 1.0, %v3076_v29  ;;  %v3078_v24 = vpop.eup %3077 }
 0x4d5   :  { %3081 = vrcp.f32 %v1713_v44  ;;  %v3080_v6 = vpop.eup %3079 }
 0x4d6   :  { %3083 = vrcp.f32 %v1714_v22  ;;  %v1715_v5 = vadd.f32 1.0, %v3080_v6 }
 0x4d8   :  { %3085 = vrcp.f32 %v1715_v5 }
 0x4df   :  { %v3082_v14 = vpop.eup %3081 }
 0x4e0   :  { %v1724_v55 = vmul.f32 %v3082_v14, %v3078_v24  ;;  %v3084_v63 = vpop.eup %3083 }
 0x4e1   :  { %v1723_v1 = vmul.f32 %v3084_v63, %v1721_v36 }
 0x4e2   :  { %v3086_v7 = vpop.eup %3085 }
 0x4e3   :  { %v4262_v16 = vadd.f32 %v1724_v55, %v1723_v1 }
 0x4e5   :  { %5549 = vst [vmem:[#allocation88_spill] sm:$0xff] %v4262_v16  ;;  %3087 = vtanh.f32 %v4262_v16 }
 0x4ef   :  { %v3088_v61 = vpop.eup %3087 }
 0x4f0   :  { %v1727_v31 = vmul.f32 %v3088_v61, %v3086_v7 }
 0x4ff   :  { %v1615_v12 = vpop.f32.mrb[24].mxu0  ;;  %v1656_v2 = vpop.f32.mrb[24].mxu1 }
 0x500   :  { %v1663_v44 = vadd.f32 %v1615_v12, %v5550_v23  ;;  %v1617_v29 = vpop.f32.mrb[25].mxu0  ;;  %v1658_v22 = vpop.f32.mrb[25].mxu1  ;;  %v1665_v16 = vadd.f32 %v1656_v2, %v3962_v9 }
 0x501   :  { %v1664_v11 = vadd.f32 %v1617_v29, %v5455_v62  ;;  %v1619_v24 = vpop.f32.mrb[26].mxu0  ;;  %v1660_v14 = vpop.f32.mrb[26].mxu1  ;;  %v1666_v61 = vadd.f32 %v1658_v22, %v3967_v51 }
 0x502   :  { %v1667_v6 = vsub.f32 0.0, %v1663_v44  ;;  %v1620_v36 = vpop.f32.mrb[27].mxu0  ;;  %v1661_v55 = vpop.f32.mrb[27].mxu1  ;;  %v1669_v7 = vsub.f32 0.0, %v1665_v16 }
 0x503   :  { %v1668_v63 = vsub.f32 0.0, %v1664_v11 }
 0x504   :  { %v1670_v5 = vmul.f32 1.442695, %v1667_v6  ;;  %v1674_v12 = vmul.f32 1.442695, %v1669_v7 }
 0x505   :  { %v1672_v1 = vmul.f32 1.442695, %v1668_v63 }
 0x506   :  { %3089 = vpow2.f32 %v1670_v5  ;;  %v1731_v5 = vpack.c.bf16 %v1727_v31, %v1727_v31  ;;  %v5552_v31 = vld [vmem:[#allocation103_spill] sm:$0xff] }
 0x507   :  { %3091 = vpow2.f32 %v1672_v1 }
 0x508   :  { %3093 = vtanh.f32 %v1666_v61  ;;  %v1734_v7 = vshrl.u32 %v1731_v5, 16  ;;  %v5564_v5 = vld [vmem:[#allocation136_spill] sm:$0xff] }
 0x509   :  { %3095 = vpow2.f32 %v1674_v12 }
 0x510   :  { %v3090_v23 = vpop.eup %3089 }
 0x511   :  { %v1676_v21 = vadd.f32 1.0, %v3090_v23  ;;  %v3092_v29 = vpop.eup %3091 }
 0x512   :  { %v1677_v44 = vadd.f32 1.0, %v3092_v29  ;;  %v3094_v24 = vpop.eup %3093  ;;  %v4273_v29 = vrot.slane %v1734_v7, 1  ;;  %v5567_v7 = vld [vmem:[#allocation139_spill] sm:$0xff] }
 0x513   :  { %3097 = vrcp.f32 %v1676_v21  ;;  %v3096_v11 = vpop.eup %3095 }
 0x514   :  { %3099 = vrcp.f32 %v1677_v44  ;;  %v1678_v55 = vadd.f32 1.0, %v3096_v11  ;;  %v5553_v44 = vld [vmem:[#allocation104_spill] sm:$0xff]  ;;  %v5555_v11 = vld [vmem:[#allocation106_spill] sm:$0xff] }
 0x516   :  { %3101 = vrcp.f32 %v1678_v55  ;;  %v5559_v55 = vld [vmem:[#allocation110_spill] sm:$0xff] }
 0x51d   :  { %v3098_v14 = vpop.eup %3097 }
 0x51e   :  { %v1684_v6 = vmul.f32 %v3098_v14, %v3094_v24  ;;  %v3100_v36 = vpop.eup %3099  ;;  %v5554_v24 = vld [vmem:[#allocation105_spill] sm:$0xff]  ;;  %v5556_v14 = vld [vmem:[#allocation107_spill] sm:$0xff] }
 0x51f   :  { %v1683_v2 = vmul.f32 %v3100_v36, %v4120_v4  ;;  %v5551_v4 = vld [vmem:[#allocation102_spill] sm:$0xff]  ;;  %v5558_v36 = vld [vmem:[#allocation109_spill] sm:$0xff] }
 0x520   :  { %v3102_v23 = vpop.eup %3101 }
 0x521   :  { %v4270_v16 = vadd.f32 %v1684_v6, %v1683_v2  ;;  %v5557_v6 = vld [vmem:[#allocation108_spill] sm:$0xff]  ;;  %v5560_v2 = vld [vmem:[#allocation111_spill] sm:$0xff] }
 0x523   :  { %3103 = vtanh.f32 %v4270_v16 }
 0x52d   :  { %v3104_v22 = vpop.eup %3103 }
 0x52e   :  { %v1687_v63 = vmul.f32 %v3104_v22, %v3102_v23  ;;  %v5561_v23 = vld [vmem:[#allocation115_spill] sm:$0xff]  ;;  %v5562_v22 = vld [vmem:[#allocation116_spill] sm:$0xff] }
 0x530   :  { %v1729_v21 = vrot.slane %v1687_v63, 5  ;;  %v5563_v63 = vld [vmem:[#allocation135_spill] sm:$0xff] }
 0x532   :  { %v1732_v1 = vpack.c.bf16 %v1729_v21, %v1729_v21  ;;  %v5565_v21 = vld [vmem:[#allocation137_spill] sm:$0xff] }
 0x534   :  { %v1738_v61 = vshrl.u32 %v1732_v1, 16  ;;  %v5566_v1 = vld [vmem:[#allocation138_spill] sm:$0xff] }
 0x536   :  { %v1740_v12 = vrot.slane %v1738_v61, 1  ;;  %v5568_v61 = vld [vmem:[#allocation140_spill] sm:$0xff] }
 0x538   :  { %1775 = vmatprep.mubr.bf16.mxu0 %v1740_v12  ;;  %1816 = vmatprep.mubr.bf16.mxu1 %v1740_v12 }
 0x539   :  { %1776 = vmatmul.mubr.bf16.vlgmr.msra.gmra.mrb[28].mxu0 %v4273_v29  ;;  %1817 = vmatmul.mubr.bf16.vlgmr.msra.gmra.mrb[28].mxu1 %v4273_v29 }
 0x53a   :  { %1826 = vmatpush1.bf16.msra.mxu0 %v3653_v25  ;;  %1867 = vmatpush1.bf16.msra.mxu1 %v5362_v15 }
 0x53b   :  { %1857 = vmatprep.mubr.bf16.mxu0 %v1740_v12  ;;  %1898 = vmatprep.mubr.bf16.mxu1 %v1740_v12  ;;  %v5569_v12 = vld [vmem:[#allocation141_spill] sm:$0xff] }
 0x53c   :  { %1827 = vmatprep.subr.bf16.mxu0 %v5363_v18  ;;  %1868 = vmatprep.subr.bf16.mxu1 %v5364_v20 }
 0x53e   :  { %1828 = vmatpush1.bf16.msra.mxu0 %v5365_v27  ;;  %1869 = vmatpush1.bf16.msra.mxu1 %v5366_v60 }
 0x53f   :  { %1829 = vmatprep.subr.bf16.mxu0 %v5367_v53  ;;  %1870 = vmatprep.subr.bf16.mxu1 %v5368_v19 }
 0x542   :  { %1830 = vmatpush1.bf16.msra.mxu0 %v5456_v13  ;;  %1871 = vmatpush1.bf16.msra.mxu1 %v5457_v47 }
 0x543   :  { %1831 = vmatprep.subr.bf16.mxu0 %v5458_v57  ;;  %1872 = vmatprep.subr.bf16.mxu1 %v5459_v41 }
 0x546   :  { %1832 = vmatpush1.bf16.msra.mxu0 %v5460_v48  ;;  %1873 = vmatpush1.bf16.msra.mxu1 %v5461_v49 }
 0x547   :  { %1833 = vmatprep.subr.bf16.mxu0 %v5462_v54  ;;  %1874 = vmatprep.subr.bf16.mxu1 %v5463_v38 }
 0x54a   :  { %1834 = vmatpush1.bf16.msra.mxu0 %v5551_v4  ;;  %1875 = vmatpush1.bf16.msra.mxu1 %v5552_v31 }
 0x54b   :  { %1835 = vmatprep.subr.bf16.mxu0 %v5553_v44  ;;  %1876 = vmatprep.subr.bf16.mxu1 %v5554_v24 }
 0x54e   :  { %1836 = vmatpush1.bf16.msra.mxu0 %v5555_v11  ;;  %1877 = vmatpush1.bf16.msra.mxu1 %v5556_v14 }
 0x54f   :  { %1837 = vmatprep.subr.bf16.mxu0 %v5557_v6  ;;  %1878 = vmatprep.subr.bf16.mxu1 %v5558_v36 }
 0x552   :  { %1838 = vmatpush1.bf16.msra.mxu0 %v5559_v55  ;;  %1879 = vmatpush1.bf16.msra.mxu1 %v5560_v2 }
 0x553   :  { %1839 = vmatprep.subr.bf16.mxu0 %v5474_v30  ;;  %1880 = vmatprep.subr.bf16.mxu1 %v5475_v39 }
 0x556   :  { %1840 = vmatpush1.bf16.msra.mxu0 %v5476_v58  ;;  %1881 = vmatpush1.bf16.msra.mxu1 %v5561_v23 }
 0x557   :  { %1841 = vmatprep.subr.bf16.mxu0 %v5562_v22  ;;  %1882 = vmatprep.subr.bf16.mxu1 %v5479_v0 }
 0x55a   :  { %1842 = vmatpush1.bf16.msra.mxu0 %v5480_v3  ;;  %1883 = vmatpush1.bf16.msra.mxu1 %v5481_v37 }
 0x55b   :  { %1843 = vmatprep.subr.bf16.mxu0 %v5482_v46  ;;  %1884 = vmatprep.subr.bf16.mxu1 %v5483_v56 }
 0x55e   :  { %1844 = vmatpush1.bf16.msra.mxu0 %v5484_v32  ;;  %1885 = vmatpush1.bf16.msra.mxu1 %v5398_v52 }
 0x55f   :  { %1845 = vmatprep.subr.bf16.mxu0 %v5399_v43  ;;  %1886 = vmatprep.subr.bf16.mxu1 %v5400_v59 }
 0x562   :  { %1846 = vmatpush1.bf16.msra.mxu0 %v5485_v50  ;;  %1887 = vmatpush1.bf16.msra.mxu1 %v5486_v42 }
 0x563   :  { %1847 = vmatprep.subr.bf16.mxu0 %v5403_v10  ;;  %1888 = vmatprep.subr.bf16.mxu1 %v5404_v35 }
 0x566   :  { %1848 = vmatpush1.bf16.msra.mxu0 %v5405_v8  ;;  %1889 = vmatpush1.bf16.msra.mxu1 %v5406_v28  ;;  %v5570_v28 = vld [vmem:[#allocation142_spill] sm:$0xff] }
 0x567   :  { %1849 = vmatprep.subr.bf16.mxu0 %v5407_v26  ;;  %1890 = vmatprep.subr.bf16.mxu1 %v5408_v33  ;;  %v5571_v26 = vld [vmem:[#allocation143_spill] sm:$0xff]  ;;  %v5572_v33 = vld [vmem:[#allocation144_spill] sm:$0xff] }
 0x56a   :  { %1850 = vmatpush1.bf16.msra.mxu0 %v3830_v45  ;;  %1891 = vmatpush1.bf16.msra.mxu1 %v5563_v63  ;;  %v5573_v45 = vld [vmem:[#allocation145_spill] sm:$0xff]  ;;  %v5574_v63 = vld [vmem:[#allocation146_spill] sm:$0xff] }
 0x56b   :  { %1851 = vmatprep.subr.bf16.mxu0 %v5564_v5  ;;  %1892 = vmatprep.subr.bf16.mxu1 %v5565_v21  ;;  %v5575_v5 = vld [vmem:[#allocation147_spill] sm:$0xff] }
 0x56c   :  { %v5576_v21 = vld [vmem:[#allocation15_spill] sm:$0xff] }
 0x56e   :  { %1852 = vmatpush1.bf16.msra.mxu0 %v5566_v1  ;;  %1893 = vmatpush1.bf16.msra.mxu1 %v5567_v7  ;;  %v5577_v1 = vld [vmem:[#allocation16_spill] sm:$0xff] }
 0x56f   :  { %1853 = vmatprep.subr.bf16.mxu0 %v5568_v61  ;;  %1894 = vmatprep.subr.bf16.mxu1 %v5569_v12  ;;  %v5578_v12 = vld [vmem:[#allocation17_spill] sm:$0xff]  ;;  %v5587_v61 = vld [vmem:[#allocation26_spill] sm:$0xff] }
 0x572   :  { %1854 = vmatpush1.bf16.msra.mxu0 %v5570_v28  ;;  %1895 = vmatpush1.bf16.msra.mxu1 %v5571_v26  ;;  %v5579_v28 = vld [vmem:[#allocation18_spill] sm:$0xff]  ;;  %v5580_v26 = vld [vmem:[#allocation19_spill] sm:$0xff] }
 0x573   :  { %1855 = vmatprep.subr.bf16.mxu0 %v5572_v33  ;;  %1896 = vmatprep.subr.bf16.mxu1 %v5573_v45  ;;  %v5581_v33 = vld [vmem:[#allocation20_spill] sm:$0xff]  ;;  %v5582_v45 = vld [vmem:[#allocation21_spill] sm:$0xff] }
 0x576   :  { %1856 = vmatpush1.bf16.msra.mxu0 %v5574_v63  ;;  %1897 = vmatpush1.bf16.msra.mxu1 %v5575_v5  ;;  %v5583_v63 = vld [vmem:[#allocation22_spill] sm:$0xff]  ;;  %v5584_v5 = vld [vmem:[#allocation23_spill] sm:$0xff] }
 0x577   :  { %1983 = vmatprep.subr.bf16.mxu0 %v5576_v21  ;;  %2024 = vmatprep.subr.bf16.mxu1 %v5577_v1  ;;  %v5585_v21 = vld [vmem:[#allocation24_spill] sm:$0xff]  ;;  %v5586_v1 = vld [vmem:[#allocation25_spill] sm:$0xff] }
 0x579   :  { %1858 = vmatmul.mubr.bf16.vlgmr.msra.gmra.mrb[32].mxu0 %v4273_v29  ;;  %1899 = vmatmul.mubr.bf16.vlgmr.msra.gmra.mrb[32].mxu1 %v4273_v29  ;;  %v5588_v29 = vld [vmem:[#allocation27_spill] sm:$0xff] }
 0x57a   :  { %1984 = vmatpush1.bf16.msra.mxu0 %v5578_v12  ;;  %2025 = vmatpush1.bf16.msra.mxu1 %v5579_v28  ;;  %v5589_v12 = vld [vmem:[#allocation28_spill] sm:$0xff]  ;;  %v5590_v28 = vld [vmem:[#allocation29_spill] sm:$0xff] }
 0x57b   :  { %1985 = vmatprep.subr.bf16.mxu0 %v5580_v26  ;;  %2026 = vmatprep.subr.bf16.mxu1 %v5581_v33  ;;  %v5591_v26 = vld [vmem:[#allocation30_spill] sm:$0xff]  ;;  %v5592_v33 = vld [vmem:[#allocation31_spill] sm:$0xff] }
 0x57e   :  { %1986 = vmatpush1.bf16.msra.mxu0 %v5582_v45  ;;  %2027 = vmatpush1.bf16.msra.mxu1 %v5583_v63  ;;  %v5593_v45 = vld [vmem:[#allocation32_spill] sm:$0xff]  ;;  %v5594_v63 = vld [vmem:[#allocation33_spill] sm:$0xff] }
 0x57f   :  { %1987 = vmatprep.subr.bf16.mxu0 %v5584_v5  ;;  %2028 = vmatprep.subr.bf16.mxu1 %v5585_v21  ;;  %v5595_v5 = vld [vmem:[#allocation34_spill] sm:$0xff]  ;;  %v5596_v21 = vld [vmem:[#allocation35_spill] sm:$0xff] }
 0x582   :  { %1988 = vmatpush1.bf16.msra.mxu0 %v5586_v1  ;;  %2029 = vmatpush1.bf16.msra.mxu1 %v5587_v61  ;;  %v5597_v1 = vld [vmem:[#allocation36_spill] sm:$0xff]  ;;  %v5598_v61 = vld [vmem:[#allocation37_spill] sm:$0xff] }
 0x583   :  { %1989 = vmatprep.subr.bf16.mxu0 %v5588_v29  ;;  %2030 = vmatprep.subr.bf16.mxu1 %v5589_v12  ;;  %v5599_v29 = vld [vmem:[#allocation38_spill] sm:$0xff]  ;;  %v5600_v12 = vld [vmem:[#allocation39_spill] sm:$0xff] }
 0x586   :  { %1990 = vmatpush1.bf16.msra.mxu0 %v5590_v28  ;;  %2031 = vmatpush1.bf16.msra.mxu1 %v5591_v26  ;;  %v5601_v28 = vld [vmem:[#allocation41_spill] sm:$0xff]  ;;  %v5602_v26 = vld [vmem:[#allocation40_spill] sm:$0xff] }
 0x587   :  { %1991 = vmatprep.subr.bf16.mxu0 %v5592_v33  ;;  %2032 = vmatprep.subr.bf16.mxu1 %v5593_v45  ;;  %v5603_v33 = vld [vmem:[#allocation42_spill] sm:$0xff]  ;;  %v5604_v45 = vld [vmem:[#allocation43_spill] sm:$0xff] }
 0x58a   :  { %1992 = vmatpush1.bf16.msra.mxu0 %v5594_v63  ;;  %2033 = vmatpush1.bf16.msra.mxu1 %v5595_v5  ;;  %v5605_v63 = vld [vmem:[#allocation44_spill] sm:$0xff]  ;;  %v5606_v5 = vld [vmem:[#allocation45_spill] sm:$0xff] }
 0x58b   :  { %1993 = vmatprep.subr.bf16.mxu0 %v5596_v21  ;;  %2034 = vmatprep.subr.bf16.mxu1 %v5597_v1  ;;  %v5607_v21 = vld [vmem:[#allocation46_spill] sm:$0xff]  ;;  %v5608_v1 = vld [vmem:[#allocation47_spill] sm:$0xff] }
 0x58e   :  { %1994 = vmatpush1.bf16.msra.mxu0 %v5598_v61  ;;  %2035 = vmatpush1.bf16.msra.mxu1 %v5599_v29  ;;  %v5609_v61 = vld [vmem:[#allocation48_spill] sm:$0xff]  ;;  %v5610_v29 = vld [vmem:[#allocation49_spill] sm:$0xff] }
 0x58f   :  { %1995 = vmatprep.subr.bf16.mxu0 %v5600_v12  ;;  %2036 = vmatprep.subr.bf16.mxu1 %v5601_v28  ;;  %v5611_v12 = vld [vmem:[#allocation50_spill] sm:$0xff]  ;;  %v5612_v28 = vld [vmem:[#allocation51_spill] sm:$0xff] }
 0x592   :  { %1996 = vmatpush1.bf16.msra.mxu0 %v5602_v26  ;;  %2037 = vmatpush1.bf16.msra.mxu1 %v5603_v33  ;;  %v5613_v26 = vld [vmem:[#allocation52_spill] sm:$0xff]  ;;  %v5614_v33 = vld [vmem:[#allocation53_spill] sm:$0xff] }
 0x593   :  { %1997 = vmatprep.subr.bf16.mxu0 %v5604_v45  ;;  %2038 = vmatprep.subr.bf16.mxu1 %v5605_v63  ;;  %v5615_v45 = vld [vmem:[#allocation54_spill] sm:$0xff]  ;;  %v5616_v63 = vld [vmem:[#allocation55_spill] sm:$0xff] }
 0x596   :  { %1998 = vmatpush1.bf16.msra.mxu0 %v5606_v5  ;;  %2039 = vmatpush1.bf16.msra.mxu1 %v5607_v21  ;;  %v5617_v5 = vld [vmem:[#allocation56_spill] sm:$0xff]  ;;  %v5618_v21 = vld [vmem:[#allocation57_spill] sm:$0xff] }
 0x597   :  { %1999 = vmatprep.subr.bf16.mxu0 %v5608_v1  ;;  %2040 = vmatprep.subr.bf16.mxu1 %v5609_v61  ;;  %v5619_v1 = vld [vmem:[#allocation58_spill] sm:$0xff]  ;;  %v5620_v61 = vld [vmem:[#allocation59_spill] sm:$0xff] }
 0x59a   :  { %2000 = vmatpush1.bf16.msra.mxu0 %v5610_v29  ;;  %2041 = vmatpush1.bf16.msra.mxu1 %v5611_v12  ;;  %v5621_v29 = vld [vmem:[#allocation60_spill] sm:$0xff]  ;;  %v5622_v12 = vld [vmem:[#allocation61_spill] sm:$0xff] }
 0x59b   :  { %2001 = vmatprep.subr.bf16.mxu0 %v5612_v28  ;;  %2042 = vmatprep.subr.bf16.mxu1 %v5613_v26  ;;  %v5623_v28 = vld [vmem:[#allocation62_spill] sm:$0xff]  ;;  %v5624_v26 = vld [vmem:[#allocation63_spill] sm:$0xff] }
 0x59e   :  { %2002 = vmatpush1.bf16.msra.mxu0 %v5614_v33  ;;  %2043 = vmatpush1.bf16.msra.mxu1 %v5615_v45  ;;  %v5625_v33 = vld [vmem:[#allocation64_spill] sm:$0xff]  ;;  %v5626_v45 = vld [vmem:[#allocation65_spill] sm:$0xff] }
 0x59f   :  { %2003 = vmatprep.subr.bf16.mxu0 %v5616_v63  ;;  %2044 = vmatprep.subr.bf16.mxu1 %v5617_v5  ;;  %v5627_v63 = vld [vmem:[#allocation66_spill] sm:$0xff]  ;;  %v5628_v5 = vld [vmem:[#allocation67_spill] sm:$0xff] }
 0x5a2   :  { %2004 = vmatpush1.bf16.msra.mxu0 %v5618_v21  ;;  %2045 = vmatpush1.bf16.msra.mxu1 %v5619_v1  ;;  %v5629_v21 = vld [vmem:[#allocation68_spill] sm:$0xff]  ;;  %v5630_v1 = vld [vmem:[#allocation69_spill] sm:$0xff] }
 0x5a3   :  { %2005 = vmatprep.subr.bf16.mxu0 %v5620_v61  ;;  %2046 = vmatprep.subr.bf16.mxu1 %v5621_v29  ;;  %v5631_v61 = vld [vmem:[#allocation70_spill] sm:$0xff]  ;;  %v5632_v29 = vld [vmem:[#allocation71_spill] sm:$0xff] }
 0x5a6   :  { %2006 = vmatpush1.bf16.msra.mxu0 %v5622_v12  ;;  %2047 = vmatpush1.bf16.msra.mxu1 %v5623_v28  ;;  %v5633_v12 = vld [vmem:[#allocation72_spill] sm:$0xff]  ;;  %v5634_v28 = vld [vmem:[#allocation73_spill] sm:$0xff] }
 0x5a7   :  { %2007 = vmatprep.subr.bf16.mxu0 %v5624_v26  ;;  %2048 = vmatprep.subr.bf16.mxu1 %v5625_v33  ;;  %v5635_v26 = vld [vmem:[#allocation74_spill] sm:$0xff]  ;;  %v5636_v33 = vld [vmem:[#allocation75_spill] sm:$0xff] }
 0x5aa   :  { %2008 = vmatpush1.bf16.msra.mxu0 %v5626_v45  ;;  %2049 = vmatpush1.bf16.msra.mxu1 %v5627_v63  ;;  %v5637_v45 = vld [vmem:[#allocation76_spill] sm:$0xff]  ;;  %v5638_v63 = vld [vmem:[#allocation77_spill] sm:$0xff] }
 0x5ab   :  { %2009 = vmatprep.subr.bf16.mxu0 %v5628_v5  ;;  %2050 = vmatprep.subr.bf16.mxu1 %v5629_v21  ;;  %v5639_v5 = vld [vmem:[#allocation78_spill] sm:$0xff]  ;;  %v5640_v21 = vld [vmem:[#allocation79_spill] sm:$0xff] }
 0x5ae   :  { %2010 = vmatpush1.bf16.msra.mxu0 %v5630_v1  ;;  %2051 = vmatpush1.bf16.msra.mxu1 %v5631_v61  ;;  %v5641_v1 = vld [vmem:[#allocation80_spill] sm:$0xff] }
 0x5af   :  { %2011 = vmatprep.subr.bf16.mxu0 %v5632_v29  ;;  %2052 = vmatprep.subr.bf16.mxu1 %v5633_v12 }
 0x5b2   :  { %2012 = vmatpush1.bf16.msra.mxu0 %v5634_v28  ;;  %2053 = vmatpush1.bf16.msra.mxu1 %v5635_v26 }
 0x5b3   :  { %2013 = vmatprep.subr.bf16.mxu0 %v5636_v33  ;;  %2054 = vmatprep.subr.bf16.mxu1 %v5637_v45 }
 0x5b6   :  { %2014 = vmatpush1.bf16.msra.mxu0 %v5638_v63  ;;  %2055 = vmatpush1.bf16.msra.mxu1 %v5639_v5 }
 0x5b7   :  { %2065 = vmatprep.subr.bf16.mxu0 %v5640_v21  ;;  %2106 = vmatprep.subr.bf16.mxu1 %v5641_v1 }
 0x60c   :  { %v1777_v61 = vpop.f32.mrb[28].mxu0  ;;  %v1818_v29 = vpop.f32.mrb[28].mxu1 }
 0x60d   :  { %v1936_v7 = vrot.slane %v1777_v61, 4  ;;  %v1779_v12 = vpop.f32.mrb[29].mxu0  ;;  %v1820_v8 = vpop.f32.mrb[29].mxu1  ;;  %v1938_v5 = vrot.slane %v1818_v29, 4 }
 0x60e   :  { %v1937_v28 = vrot.slane %v1779_v12, 4  ;;  %v1781_v35 = vpop.f32.mrb[30].mxu0  ;;  %v1822_v26 = vpop.f32.mrb[30].mxu1  ;;  %v1939_v61 = vrot.slane %v1820_v8, 4  ;;  %v5642_v12 = vld [vmem:[#allocation86_spill] sm:$0xff] }
 0x60f   :  { %v1944_v33 = vadd.f32 %v1936_v7, %v5347_v34  ;;  %v1782_v10 = vpop.f32.mrb[31].mxu0  ;;  %v1823_v45 = vpop.f32.mrb[31].mxu1  ;;  %v1946_v1 = vadd.f32 %v1938_v5, %v5546_v17 }
 0x610   :  { %v1945_v63 = vadd.f32 %v1937_v28, %v5449_v40  ;;  %v1947_v35 = vadd.f32 %v1939_v61, %v5642_v12 }
 0x611   :  { %v1948_v42 = vsub.f32 0.0, %v1944_v33  ;;  %v1950_v43 = vsub.f32 0.0, %v1946_v1 }
 0x612   :  { %v1949_v50 = vsub.f32 0.0, %v1945_v63 }
 0x613   :  { %v1951_v21 = vmul.f32 1.442695, %v1948_v42  ;;  %v1955_v26 = vmul.f32 1.442695, %v1950_v43  ;;  %v5643_v42 = vld [vmem:[#allocation88_spill] sm:$0xff] }
 0x614   :  { %v1953_v59 = vmul.f32 1.442695, %v1949_v50  ;;  %v1965_v63 = vrot.slane %v5643_v42, 7 }
 0x615   :  { %3105 = vpow2.f32 %v1951_v21 }
 0x616   :  { %3107 = vpow2.f32 %v1953_v59 }
 0x617   :  { %3109 = vtanh.f32 %v1947_v35 }
 0x618   :  { %3111 = vpow2.f32 %v1955_v26  ;;  %v5645_v26 = vld [vmem:[#allocation82_spill] sm:$0xff] }
 0x61f   :  { %v3106_v52 = vpop.eup %3105 }
 0x620   :  { %v1957_v7 = vadd.f32 1.0, %v3106_v52  ;;  %v3108_v45 = vpop.eup %3107 }
 0x621   :  { %v1958_v10 = vadd.f32 1.0, %v3108_v45  ;;  %v3110_v28 = vpop.eup %3109 }
 0x622   :  { %3113 = vrcp.f32 %v1957_v7  ;;  %v3112_v33 = vpop.eup %3111 }
 0x623   :  { %3115 = vrcp.f32 %v1958_v10  ;;  %v1959_v8 = vadd.f32 1.0, %v3112_v33 }
 0x625   :  { %3117 = vrcp.f32 %v1959_v8 }
 0x62c   :  { %v3114_v50 = vpop.eup %3113 }
 0x62d   :  { %v1968_v5 = vmul.f32 %v3114_v50, %v3110_v28  ;;  %v3116_v59 = vpop.eup %3115 }
 0x62e   :  { %v1967_v21 = vmul.f32 %v3116_v59, %v1965_v63 }
 0x62f   :  { %v3118_v52 = vpop.eup %3117 }
 0x630   :  { %v4412_v1 = vadd.f32 %v1968_v5, %v1967_v21 }
 0x632   :  { %5644 = vst [vmem:[#allocation89_spill] sm:$0xff] %v4412_v1  ;;  %3119 = vtanh.f32 %v4412_v1 }
 0x63c   :  { %v3120_v43 = vpop.eup %3119 }
 0x63d   :  { %v1971_v29 = vmul.f32 %v3120_v43, %v3118_v52 }
 0x64c   :  { %v1859_v61 = vpop.f32.mrb[32].mxu0  ;;  %v1900_v35 = vpop.f32.mrb[32].mxu1 }
 0x64d   :  { %v1907_v7 = vadd.f32 %v1859_v61, %v5645_v26  ;;  %v1861_v45 = vpop.f32.mrb[33].mxu0  ;;  %v1902_v10 = vpop.f32.mrb[33].mxu1  ;;  %v1909_v1 = vadd.f32 %v1900_v35, %v3962_v9 }
 0x64e   :  { %v1908_v42 = vadd.f32 %v1861_v45, %v5455_v62  ;;  %v1863_v28 = vpop.f32.mrb[34].mxu0  ;;  %v1904_v50 = vpop.f32.mrb[34].mxu1  ;;  %v1910_v43 = vadd.f32 %v1902_v10, %v3967_v51 }
 0x64f   :  { %v1911_v33 = vsub.f32 0.0, %v1907_v7  ;;  %v1864_v63 = vpop.f32.mrb[35].mxu0  ;;  %v1905_v5 = vpop.f32.mrb[35].mxu1  ;;  %v1913_v52 = vsub.f32 0.0, %v1909_v1 }
 0x650   :  { %v1912_v59 = vsub.f32 0.0, %v1908_v42 }
 0x651   :  { %v1914_v8 = vmul.f32 1.442695, %v1911_v33  ;;  %v1918_v61 = vmul.f32 1.442695, %v1913_v52 }
 0x652   :  { %v1916_v21 = vmul.f32 1.442695, %v1912_v59 }
 0x653   :  { %3121 = vpow2.f32 %v1914_v8 }
 0x654   :  { %3123 = vpow2.f32 %v1916_v21 }
 0x655   :  { %3125 = vtanh.f32 %v1910_v43 }
 0x656   :  { %3127 = vpow2.f32 %v1918_v61  ;;  %v5648_v61 = vld [vmem:[#allocation125_spill] sm:$0xff] }
 0x65d   :  { %v3122_v26 = vpop.eup %3121 }
 0x65e   :  { %v1920_v12 = vadd.f32 1.0, %v3122_v26  ;;  %v3124_v45 = vpop.eup %3123 }
 0x65f   :  { %v1921_v7 = vadd.f32 1.0, %v3124_v45  ;;  %v3126_v28 = vpop.eup %3125  ;;  %v5649_v45 = vld [vmem:[#allocation126_spill] sm:$0xff] }
 0x660   :  { %3129 = vrcp.f32 %v1920_v12  ;;  %v3128_v42 = vpop.eup %3127  ;;  %v1975_v12 = vpack.c.bf16 %v1971_v29, %v1971_v29  ;;  %v5647_v29 = vld [vmem:[#allocation124_spill] sm:$0xff] }
 0x661   :  { %3131 = vrcp.f32 %v1921_v7  ;;  %v1922_v5 = vadd.f32 1.0, %v3128_v42  ;;  %v5650_v7 = vld [vmem:[#allocation127_spill] sm:$0xff]  ;;  %v5652_v42 = vld [vmem:[#allocation129_spill] sm:$0xff] }
 0x662   :  { %v4423_v43 = vrot.slane %v1975_v12, 2  ;;  %v5662_v12 = vld [vmem:[#allocation139_spill] sm:$0xff] }
 0x663   :  { %3133 = vrcp.f32 %v1922_v5  ;;  %v5656_v5 = vld [vmem:[#allocation133_spill] sm:$0xff] }
 0x66a   :  { %v3130_v50 = vpop.eup %3129 }
 0x66b   :  { %v1928_v33 = vmul.f32 %v3130_v50, %v3126_v28  ;;  %v3132_v63 = vpop.eup %3131  ;;  %v5651_v28 = vld [vmem:[#allocation128_spill] sm:$0xff]  ;;  %v5653_v50 = vld [vmem:[#allocation130_spill] sm:$0xff] }
 0x66c   :  { %v1927_v35 = vmul.f32 %v3132_v63, %v4270_v16  ;;  %v5646_v16 = vld [vmem:[#allocation123_spill] sm:$0xff]  ;;  %v5655_v63 = vld [vmem:[#allocation132_spill] sm:$0xff] }
 0x66d   :  { %v3134_v26 = vpop.eup %3133 }
 0x66e   :  { %v4420_v1 = vadd.f32 %v1928_v33, %v1927_v35  ;;  %v5654_v33 = vld [vmem:[#allocation131_spill] sm:$0xff]  ;;  %v5657_v35 = vld [vmem:[#allocation134_spill] sm:$0xff] }
 0x670   :  { %3135 = vtanh.f32 %v4420_v1 }
 0x67a   :  { %v3136_v10 = vpop.eup %3135 }
 0x67b   :  { %v1931_v59 = vmul.f32 %v3136_v10, %v3134_v26  ;;  %v5658_v26 = vld [vmem:[#allocation135_spill] sm:$0xff]  ;;  %v5659_v10 = vld [vmem:[#allocation136_spill] sm:$0xff] }
 0x67d   :  { %v1973_v8 = vrot.slane %v1931_v59, 4  ;;  %v5660_v59 = vld [vmem:[#allocation137_spill] sm:$0xff] }
 0x67f   :  { %v1976_v21 = vpack.c.bf16 %v1973_v8, %v1973_v8  ;;  %v5661_v8 = vld [vmem:[#allocation138_spill] sm:$0xff] }
 0x681   :  { %v1980_v52 = vrot.slane %v1976_v21, 2  ;;  %v5663_v21 = vld [vmem:[#allocation140_spill] sm:$0xff] }
 0x683   :  { %2015 = vmatprep.mubr.bf16.mxu0 %v1980_v52  ;;  %2056 = vmatprep.mubr.bf16.mxu1 %v1980_v52 }
 0x684   :  { %2016 = vmatmul.mubr.bf16.vlgmr.msra.gmra.mrb[36].mxu0 %v4423_v43  ;;  %2057 = vmatmul.mubr.bf16.vlgmr.msra.gmra.mrb[36].mxu1 %v4423_v43 }
 0x685   :  { %2066 = vmatpush1.bf16.msra.mxu0 %v3653_v25  ;;  %2107 = vmatpush1.bf16.msra.mxu1 %v5362_v15 }
 0x686   :  { %2097 = vmatprep.mubr.bf16.mxu0 %v1980_v52  ;;  %2138 = vmatprep.mubr.bf16.mxu1 %v1980_v52  ;;  %v5664_v52 = vld [vmem:[#allocation141_spill] sm:$0xff] }
 0x687   :  { %2067 = vmatprep.subr.bf16.mxu0 %v5363_v18  ;;  %2108 = vmatprep.subr.bf16.mxu1 %v5364_v20 }
 0x689   :  { %2068 = vmatpush1.bf16.msra.mxu0 %v5365_v27  ;;  %2109 = vmatpush1.bf16.msra.mxu1 %v5366_v60 }
 0x68a   :  { %2069 = vmatprep.subr.bf16.mxu0 %v5367_v53  ;;  %2110 = vmatprep.subr.bf16.mxu1 %v5368_v19 }
 0x68d   :  { %2070 = vmatpush1.bf16.msra.mxu0 %v5456_v13  ;;  %2111 = vmatpush1.bf16.msra.mxu1 %v5457_v47 }
 0x68e   :  { %2071 = vmatprep.subr.bf16.mxu0 %v5458_v57  ;;  %2112 = vmatprep.subr.bf16.mxu1 %v5459_v41 }
 0x691   :  { %2072 = vmatpush1.bf16.msra.mxu0 %v5460_v48  ;;  %2113 = vmatpush1.bf16.msra.mxu1 %v5461_v49 }
 0x692   :  { %2073 = vmatprep.subr.bf16.mxu0 %v5462_v54  ;;  %2114 = vmatprep.subr.bf16.mxu1 %v5463_v38 }
 0x695   :  { %2074 = vmatpush1.bf16.msra.mxu0 %v5551_v4  ;;  %2115 = vmatpush1.bf16.msra.mxu1 %v5552_v31 }
 0x696   :  { %2075 = vmatprep.subr.bf16.mxu0 %v5553_v44  ;;  %2116 = vmatprep.subr.bf16.mxu1 %v5554_v24 }
 0x699   :  { %2076 = vmatpush1.bf16.msra.mxu0 %v5555_v11  ;;  %2117 = vmatpush1.bf16.msra.mxu1 %v5556_v14 }
 0x69a   :  { %2077 = vmatprep.subr.bf16.mxu0 %v5557_v6  ;;  %2118 = vmatprep.subr.bf16.mxu1 %v5558_v36 }
 0x69d   :  { %2078 = vmatpush1.bf16.msra.mxu0 %v5559_v55  ;;  %2119 = vmatpush1.bf16.msra.mxu1 %v5560_v2 }
 0x69e   :  { %2079 = vmatprep.subr.bf16.mxu0 %v5474_v30  ;;  %2120 = vmatprep.subr.bf16.mxu1 %v5475_v39 }
 0x6a1   :  { %2080 = vmatpush1.bf16.msra.mxu0 %v5476_v58  ;;  %2121 = vmatpush1.bf16.msra.mxu1 %v5561_v23 }
 0x6a2   :  { %2081 = vmatprep.subr.bf16.mxu0 %v5562_v22  ;;  %2122 = vmatprep.subr.bf16.mxu1 %v5479_v0 }
 0x6a5   :  { %2082 = vmatpush1.bf16.msra.mxu0 %v5480_v3  ;;  %2123 = vmatpush1.bf16.msra.mxu1 %v5481_v37 }
 0x6a6   :  { %2083 = vmatprep.subr.bf16.mxu0 %v5482_v46  ;;  %2124 = vmatprep.subr.bf16.mxu1 %v5483_v56 }
 0x6a9   :  { %2084 = vmatpush1.bf16.msra.mxu0 %v5484_v32  ;;  %2125 = vmatpush1.bf16.msra.mxu1 %v5646_v16 }
 0x6aa   :  { %2085 = vmatprep.subr.bf16.mxu0 %v5647_v29  ;;  %2126 = vmatprep.subr.bf16.mxu1 %v5648_v61 }
 0x6ad   :  { %2086 = vmatpush1.bf16.msra.mxu0 %v5649_v45  ;;  %2127 = vmatpush1.bf16.msra.mxu1 %v5650_v7 }
 0x6ae   :  { %2087 = vmatprep.subr.bf16.mxu0 %v5651_v28  ;;  %2128 = vmatprep.subr.bf16.mxu1 %v5652_v42 }
 0x6b1   :  { %2088 = vmatpush1.bf16.msra.mxu0 %v5653_v50  ;;  %2129 = vmatpush1.bf16.msra.mxu1 %v5654_v33  ;;  %v5665_v33 = vld [vmem:[#allocation142_spill] sm:$0xff] }
 0x6b2   :  { %2089 = vmatprep.subr.bf16.mxu0 %v5655_v63  ;;  %2130 = vmatprep.subr.bf16.mxu1 %v5656_v5  ;;  %v5666_v63 = vld [vmem:[#allocation143_spill] sm:$0xff]  ;;  %v5667_v5 = vld [vmem:[#allocation144_spill] sm:$0xff] }
 0x6b5   :  { %2090 = vmatpush1.bf16.msra.mxu0 %v5657_v35  ;;  %2131 = vmatpush1.bf16.msra.mxu1 %v5658_v26  ;;  %v5668_v35 = vld [vmem:[#allocation145_spill] sm:$0xff]  ;;  %v5669_v26 = vld [vmem:[#allocation146_spill] sm:$0xff] }
 0x6b6   :  { %2091 = vmatprep.subr.bf16.mxu0 %v5659_v10  ;;  %2132 = vmatprep.subr.bf16.mxu1 %v5660_v59  ;;  %v5670_v10 = vld [vmem:[#allocation147_spill] sm:$0xff] }
 0x6b7   :  { %v5671_v59 = vld [vmem:[#allocation15_spill] sm:$0xff] }
 0x6b9   :  { %2092 = vmatpush1.bf16.msra.mxu0 %v5661_v8  ;;  %2133 = vmatpush1.bf16.msra.mxu1 %v5662_v12  ;;  %v5672_v8 = vld [vmem:[#allocation16_spill] sm:$0xff] }
 0x6ba   :  { %2093 = vmatprep.subr.bf16.mxu0 %v5663_v21  ;;  %2134 = vmatprep.subr.bf16.mxu1 %v5664_v52  ;;  %v5673_v52 = vld [vmem:[#allocation17_spill] sm:$0xff]  ;;  %v5682_v21 = vld [vmem:[#allocation26_spill] sm:$0xff] }
 0x6bd   :  { %2094 = vmatpush1.bf16.msra.mxu0 %v5665_v33  ;;  %2135 = vmatpush1.bf16.msra.mxu1 %v5666_v63  ;;  %v5674_v33 = vld [vmem:[#allocation18_spill] sm:$0xff]  ;;  %v5675_v63 = vld [vmem:[#allocation19_spill] sm:$0xff] }
 0x6be   :  { %2095 = vmatprep.subr.bf16.mxu0 %v5667_v5  ;;  %2136 = vmatprep.subr.bf16.mxu1 %v5668_v35  ;;  %v5676_v5 = vld [vmem:[#allocation20_spill] sm:$0xff]  ;;  %v5677_v35 = vld [vmem:[#allocation21_spill] sm:$0xff] }
 0x6c1   :  { %2096 = vmatpush1.bf16.msra.mxu0 %v5669_v26  ;;  %2137 = vmatpush1.bf16.msra.mxu1 %v5670_v10  ;;  %v5678_v26 = vld [vmem:[#allocation22_spill] sm:$0xff]  ;;  %v5679_v10 = vld [vmem:[#allocation23_spill] sm:$0xff] }
 0x6c2   :  { %2227 = vmatprep.subr.bf16.mxu0 %v5671_v59  ;;  %2268 = vmatprep.subr.bf16.mxu1 %v5672_v8  ;;  %v5680_v59 = vld [vmem:[#allocation24_spill] sm:$0xff]  ;;  %v5681_v8 = vld [vmem:[#allocation25_spill] sm:$0xff] }
 0x6c4   :  { %2098 = vmatmul.mubr.bf16.vlgmr.msra.gmra.mrb[40].mxu0 %v4423_v43  ;;  %2139 = vmatmul.mubr.bf16.vlgmr.msra.gmra.mrb[40].mxu1 %v4423_v43  ;;  %v5683_v43 = vld [vmem:[#allocation27_spill] sm:$0xff] }
 0x6c5   :  { %2228 = vmatpush1.bf16.msra.mxu0 %v5673_v52  ;;  %2269 = vmatpush1.bf16.msra.mxu1 %v5674_v33  ;;  %v5684_v52 = vld [vmem:[#allocation28_spill] sm:$0xff]  ;;  %v5685_v33 = vld [vmem:[#allocation29_spill] sm:$0xff] }
 0x6c6   :  { %2229 = vmatprep.subr.bf16.mxu0 %v5675_v63  ;;  %2270 = vmatprep.subr.bf16.mxu1 %v5676_v5  ;;  %v5686_v63 = vld [vmem:[#allocation30_spill] sm:$0xff]  ;;  %v5687_v5 = vld [vmem:[#allocation31_spill] sm:$0xff] }
 0x6c9   :  { %2230 = vmatpush1.bf16.msra.mxu0 %v5677_v35  ;;  %2271 = vmatpush1.bf16.msra.mxu1 %v5678_v26  ;;  %v5688_v35 = vld [vmem:[#allocation32_spill] sm:$0xff]  ;;  %v5689_v26 = vld [vmem:[#allocation33_spill] sm:$0xff] }
 0x6ca   :  { %2231 = vmatprep.subr.bf16.mxu0 %v5679_v10  ;;  %2272 = vmatprep.subr.bf16.mxu1 %v5680_v59  ;;  %v5690_v10 = vld [vmem:[#allocation34_spill] sm:$0xff]  ;;  %v5691_v59 = vld [vmem:[#allocation35_spill] sm:$0xff] }
 0x6cd   :  { %2232 = vmatpush1.bf16.msra.mxu0 %v5681_v8  ;;  %2273 = vmatpush1.bf16.msra.mxu1 %v5682_v21  ;;  %v5692_v8 = vld [vmem:[#allocation36_spill] sm:$0xff]  ;;  %v5693_v21 = vld [vmem:[#allocation37_spill] sm:$0xff] }
 0x6ce   :  { %2233 = vmatprep.subr.bf16.mxu0 %v5683_v43  ;;  %2274 = vmatprep.subr.bf16.mxu1 %v5684_v52  ;;  %v5694_v43 = vld [vmem:[#allocation38_spill] sm:$0xff]  ;;  %v5695_v52 = vld [vmem:[#allocation39_spill] sm:$0xff] }
 0x6d1   :  { %2234 = vmatpush1.bf16.msra.mxu0 %v5685_v33  ;;  %2275 = vmatpush1.bf16.msra.mxu1 %v5686_v63  ;;  %v5696_v33 = vld [vmem:[#allocation41_spill] sm:$0xff]  ;;  %v5697_v63 = vld [vmem:[#allocation40_spill] sm:$0xff] }
 0x6d2   :  { %2235 = vmatprep.subr.bf16.mxu0 %v5687_v5  ;;  %2276 = vmatprep.subr.bf16.mxu1 %v5688_v35  ;;  %v5698_v5 = vld [vmem:[#allocation42_spill] sm:$0xff]  ;;  %v5699_v35 = vld [vmem:[#allocation43_spill] sm:$0xff] }
 0x6d5   :  { %2236 = vmatpush1.bf16.msra.mxu0 %v5689_v26  ;;  %2277 = vmatpush1.bf16.msra.mxu1 %v5690_v10  ;;  %v5700_v26 = vld [vmem:[#allocation44_spill] sm:$0xff]  ;;  %v5701_v10 = vld [vmem:[#allocation45_spill] sm:$0xff] }
 0x6d6   :  { %2237 = vmatprep.subr.bf16.mxu0 %v5691_v59  ;;  %2278 = vmatprep.subr.bf16.mxu1 %v5692_v8  ;;  %v5702_v59 = vld [vmem:[#allocation46_spill] sm:$0xff]  ;;  %v5703_v8 = vld [vmem:[#allocation47_spill] sm:$0xff] }
 0x6d9   :  { %2238 = vmatpush1.bf16.msra.mxu0 %v5693_v21  ;;  %2279 = vmatpush1.bf16.msra.mxu1 %v5694_v43  ;;  %v5704_v21 = vld [vmem:[#allocation48_spill] sm:$0xff]  ;;  %v5705_v43 = vld [vmem:[#allocation49_spill] sm:$0xff] }
 0x6da   :  { %2239 = vmatprep.subr.bf16.mxu0 %v5695_v52  ;;  %2280 = vmatprep.subr.bf16.mxu1 %v5696_v33  ;;  %v5706_v52 = vld [vmem:[#allocation50_spill] sm:$0xff]  ;;  %v5707_v33 = vld [vmem:[#allocation51_spill] sm:$0xff] }
 0x6dd   :  { %2240 = vmatpush1.bf16.msra.mxu0 %v5697_v63  ;;  %2281 = vmatpush1.bf16.msra.mxu1 %v5698_v5  ;;  %v5708_v63 = vld [vmem:[#allocation52_spill] sm:$0xff]  ;;  %v5709_v5 = vld [vmem:[#allocation53_spill] sm:$0xff] }
 0x6de   :  { %2241 = vmatprep.subr.bf16.mxu0 %v5699_v35  ;;  %2282 = vmatprep.subr.bf16.mxu1 %v5700_v26  ;;  %v5710_v35 = vld [vmem:[#allocation54_spill] sm:$0xff]  ;;  %v5711_v26 = vld [vmem:[#allocation55_spill] sm:$0xff] }
 0x6e1   :  { %2242 = vmatpush1.bf16.msra.mxu0 %v5701_v10  ;;  %2283 = vmatpush1.bf16.msra.mxu1 %v5702_v59  ;;  %v5712_v10 = vld [vmem:[#allocation56_spill] sm:$0xff]  ;;  %v5713_v59 = vld [vmem:[#allocation57_spill] sm:$0xff] }
 0x6e2   :  { %2243 = vmatprep.subr.bf16.mxu0 %v5703_v8  ;;  %2284 = vmatprep.subr.bf16.mxu1 %v5704_v21  ;;  %v5714_v8 = vld [vmem:[#allocation58_spill] sm:$0xff]  ;;  %v5715_v21 = vld [vmem:[#allocation59_spill] sm:$0xff] }
 0x6e5   :  { %2244 = vmatpush1.bf16.msra.mxu0 %v5705_v43  ;;  %2285 = vmatpush1.bf16.msra.mxu1 %v5706_v52  ;;  %v5716_v43 = vld [vmem:[#allocation60_spill] sm:$0xff]  ;;  %v5717_v52 = vld [vmem:[#allocation61_spill] sm:$0xff] }
 0x6e6   :  { %2245 = vmatprep.subr.bf16.mxu0 %v5707_v33  ;;  %2286 = vmatprep.subr.bf16.mxu1 %v5708_v63  ;;  %v5718_v33 = vld [vmem:[#allocation62_spill] sm:$0xff]  ;;  %v5719_v63 = vld [vmem:[#allocation63_spill] sm:$0xff] }
 0x6e9   :  { %2246 = vmatpush1.bf16.msra.mxu0 %v5709_v5  ;;  %2287 = vmatpush1.bf16.msra.mxu1 %v5710_v35  ;;  %v5720_v5 = vld [vmem:[#allocation64_spill] sm:$0xff]  ;;  %v5721_v35 = vld [vmem:[#allocation65_spill] sm:$0xff] }
 0x6ea   :  { %2247 = vmatprep.subr.bf16.mxu0 %v5711_v26  ;;  %2288 = vmatprep.subr.bf16.mxu1 %v5712_v10  ;;  %v5722_v26 = vld [vmem:[#allocation66_spill] sm:$0xff]  ;;  %v5723_v10 = vld [vmem:[#allocation67_spill] sm:$0xff] }
 0x6ed   :  { %2248 = vmatpush1.bf16.msra.mxu0 %v5713_v59  ;;  %2289 = vmatpush1.bf16.msra.mxu1 %v5714_v8  ;;  %v5724_v59 = vld [vmem:[#allocation68_spill] sm:$0xff]  ;;  %v5725_v8 = vld [vmem:[#allocation69_spill] sm:$0xff] }
 0x6ee   :  { %2249 = vmatprep.subr.bf16.mxu0 %v5715_v21  ;;  %2290 = vmatprep.subr.bf16.mxu1 %v5716_v43  ;;  %v5726_v21 = vld [vmem:[#allocation70_spill] sm:$0xff]  ;;  %v5727_v43 = vld [vmem:[#allocation71_spill] sm:$0xff] }
 0x6f1   :  { %2250 = vmatpush1.bf16.msra.mxu0 %v5717_v52  ;;  %2291 = vmatpush1.bf16.msra.mxu1 %v5718_v33  ;;  %v5728_v52 = vld [vmem:[#allocation72_spill] sm:$0xff]  ;;  %v5729_v33 = vld [vmem:[#allocation73_spill] sm:$0xff] }
 0x6f2   :  { %2251 = vmatprep.subr.bf16.mxu0 %v5719_v63  ;;  %2292 = vmatprep.subr.bf16.mxu1 %v5720_v5  ;;  %v5730_v63 = vld [vmem:[#allocation74_spill] sm:$0xff]  ;;  %v5731_v5 = vld [vmem:[#allocation75_spill] sm:$0xff] }
 0x6f5   :  { %2252 = vmatpush1.bf16.msra.mxu0 %v5721_v35  ;;  %2293 = vmatpush1.bf16.msra.mxu1 %v5722_v26  ;;  %v5732_v35 = vld [vmem:[#allocation76_spill] sm:$0xff]  ;;  %v5733_v26 = vld [vmem:[#allocation77_spill] sm:$0xff] }
 0x6f6   :  { %2253 = vmatprep.subr.bf16.mxu0 %v5723_v10  ;;  %2294 = vmatprep.subr.bf16.mxu1 %v5724_v59  ;;  %v5734_v10 = vld [vmem:[#allocation78_spill] sm:$0xff]  ;;  %v5735_v59 = vld [vmem:[#allocation79_spill] sm:$0xff] }
 0x6f9   :  { %2254 = vmatpush1.bf16.msra.mxu0 %v5725_v8  ;;  %2295 = vmatpush1.bf16.msra.mxu1 %v5726_v21  ;;  %v5736_v8 = vld [vmem:[#allocation80_spill] sm:$0xff] }
 0x6fa   :  { %2255 = vmatprep.subr.bf16.mxu0 %v5727_v43  ;;  %2296 = vmatprep.subr.bf16.mxu1 %v5728_v52 }
 0x6fd   :  { %2256 = vmatpush1.bf16.msra.mxu0 %v5729_v33  ;;  %2297 = vmatpush1.bf16.msra.mxu1 %v5730_v63 }
 0x6fe   :  { %2257 = vmatprep.subr.bf16.mxu0 %v5731_v5  ;;  %2298 = vmatprep.subr.bf16.mxu1 %v5732_v35 }
 0x701   :  { %2258 = vmatpush1.bf16.msra.mxu0 %v5733_v26  ;;  %2299 = vmatpush1.bf16.msra.mxu1 %v5734_v10 }
 0x702   :  { %2309 = vmatprep.subr.bf16.mxu0 %v5735_v59  ;;  %2350 = vmatprep.subr.bf16.mxu1 %v5736_v8 }
 0x757   :  { %v2017_v21 = vpop.f32.mrb[36].mxu0  ;;  %v2058_v43 = vpop.f32.mrb[36].mxu1 }
 0x758   :  { %v2176_v12 = vrot.slane %v2017_v21, 3  ;;  %v2019_v52 = vpop.f32.mrb[37].mxu0  ;;  %v2060_v50 = vpop.f32.mrb[37].mxu1  ;;  %v2178_v10 = vrot.slane %v2058_v43, 3 }
 0x759   :  { %v2177_v33 = vrot.slane %v2019_v52, 3  ;;  %v2021_v42 = vpop.f32.mrb[38].mxu0  ;;  %v2062_v63 = vpop.f32.mrb[38].mxu1  ;;  %v2179_v21 = vrot.slane %v2060_v50, 3  ;;  %v5737_v52 = vld [vmem:[#allocation86_spill] sm:$0xff] }
 0x75a   :  { %v2184_v5 = vadd.f32 %v2176_v12, %v5347_v34  ;;  %v2022_v28 = vpop.f32.mrb[39].mxu0  ;;  %v2063_v35 = vpop.f32.mrb[39].mxu1  ;;  %v2186_v8 = vadd.f32 %v2178_v10, %v5546_v17 }
 0x75b   :  { %v2185_v26 = vadd.f32 %v2177_v33, %v5449_v40  ;;  %v2187_v42 = vadd.f32 %v2179_v21, %v5737_v52  ;;  %v5738_v35 = vld [vmem:[#allocation89_spill] sm:$0xff] }
 0x75c   :  { %v2188_v7 = vsub.f32 0.0, %v2184_v5  ;;  %v2190_v29 = vsub.f32 0.0, %v2186_v8 }
 0x75d   :  { %v2189_v45 = vsub.f32 0.0, %v2185_v26  ;;  %v2205_v26 = vrot.slane %v5738_v35, 7 }
 0x75e   :  { %v2191_v59 = vmul.f32 1.442695, %v2188_v7  ;;  %v2195_v63 = vmul.f32 1.442695, %v2190_v29 }
 0x75f   :  { %v2193_v61 = vmul.f32 1.442695, %v2189_v45 }
 0x760   :  { %3137 = vpow2.f32 %v2191_v59 }
 0x761   :  { %3139 = vpow2.f32 %v2193_v61 }
 0x762   :  { %3141 = vtanh.f32 %v2187_v42 }
 0x763   :  { %3143 = vpow2.f32 %v2195_v63  ;;  %v5740_v63 = vld [vmem:[#allocation82_spill] sm:$0xff] }
 0x76a   :  { %v3138_v16 = vpop.eup %3137 }
 0x76b   :  { %v2197_v12 = vadd.f32 1.0, %v3138_v16  ;;  %v3140_v28 = vpop.eup %3139 }
 0x76c   :  { %v2198_v33 = vadd.f32 1.0, %v3140_v28  ;;  %v3142_v5 = vpop.eup %3141 }
 0x76d   :  { %3145 = vrcp.f32 %v2197_v12  ;;  %v3144_v7 = vpop.eup %3143 }
 0x76e   :  { %3147 = vrcp.f32 %v2198_v33  ;;  %v2199_v50 = vadd.f32 1.0, %v3144_v7 }
 0x770   :  { %3149 = vrcp.f32 %v2199_v50 }
 0x777   :  { %v3146_v45 = vpop.eup %3145 }
 0x778   :  { %v2208_v10 = vmul.f32 %v3146_v45, %v3142_v5  ;;  %v3148_v61 = vpop.eup %3147 }
 0x779   :  { %v2207_v59 = vmul.f32 %v3148_v61, %v2205_v26 }
 0x77a   :  { %v3150_v16 = vpop.eup %3149 }
 0x77b   :  { %v4562_v8 = vadd.f32 %v2208_v10, %v2207_v59 }
 0x77d   :  { %5739 = vst [vmem:[#allocation90_spill] sm:$0xff] %v4562_v8  ;;  %3151 = vtanh.f32 %v4562_v8 }
 0x787   :  { %v3152_v29 = vpop.eup %3151 }
 0x788   :  { %v2211_v43 = vmul.f32 %v3152_v29, %v3150_v16 }
 0x797   :  { %v2099_v21 = vpop.f32.mrb[40].mxu0  ;;  %v2140_v42 = vpop.f32.mrb[40].mxu1 }
 0x798   :  { %v2147_v12 = vadd.f32 %v2099_v21, %v5740_v63  ;;  %v2101_v28 = vpop.f32.mrb[41].mxu0  ;;  %v2142_v33 = vpop.f32.mrb[41].mxu1  ;;  %v2149_v8 = vadd.f32 %v2140_v42, %v3962_v9 }
 0x799   :  { %v2148_v35 = vadd.f32 %v2101_v28, %v5455_v62  ;;  %v2103_v5 = vpop.f32.mrb[42].mxu0  ;;  %v2144_v45 = vpop.f32.mrb[42].mxu1  ;;  %v2150_v29 = vadd.f32 %v2142_v33, %v3967_v51 }
 0x79a   :  { %v2151_v7 = vsub.f32 0.0, %v2147_v12  ;;  %v2104_v26 = vpop.f32.mrb[43].mxu0  ;;  %v2145_v10 = vpop.f32.mrb[43].mxu1  ;;  %v2153_v16 = vsub.f32 0.0, %v2149_v8 }
 0x79b   :  { %v2152_v61 = vsub.f32 0.0, %v2148_v35 }
 0x79c   :  { %v2154_v50 = vmul.f32 1.442695, %v2151_v7  ;;  %v2158_v21 = vmul.f32 1.442695, %v2153_v16 }
 0x79d   :  { %v2156_v59 = vmul.f32 1.442695, %v2152_v61 }
 0x79e   :  { %3153 = vpow2.f32 %v2154_v50  ;;  %v2215_v50 = vpack.c.bf16 %v2211_v43, %v2211_v43  ;;  %v5742_v43 = vld [vmem:[#allocation124_spill] sm:$0xff] }
 0x79f   :  { %3155 = vpow2.f32 %v2156_v59 }
 0x7a0   :  { %3157 = vtanh.f32 %v2150_v29  ;;  %v2218_v16 = vshrl.u32 %v2215_v50, 16  ;;  %v5754_v50 = vld [vmem:[#allocation136_spill] sm:$0xff] }
 0x7a1   :  { %3159 = vpow2.f32 %v2158_v21 }
 0x7a8   :  { %v3154_v63 = vpop.eup %3153 }
 0x7a9   :  { %v2160_v52 = vadd.f32 1.0, %v3154_v63  ;;  %v3156_v28 = vpop.eup %3155 }
 0x7aa   :  { %v2161_v12 = vadd.f32 1.0, %v3156_v28  ;;  %v3158_v5 = vpop.eup %3157  ;;  %v4573_v28 = vrot.slane %v2218_v16, 2  ;;  %v5757_v16 = vld [vmem:[#allocation139_spill] sm:$0xff] }
 0x7ab   :  { %3161 = vrcp.f32 %v2160_v52  ;;  %v3160_v35 = vpop.eup %3159 }
 0x7ac   :  { %3163 = vrcp.f32 %v2161_v12  ;;  %v2162_v10 = vadd.f32 1.0, %v3160_v35  ;;  %v5743_v12 = vld [vmem:[#allocation125_spill] sm:$0xff]  ;;  %v5745_v35 = vld [vmem:[#allocation127_spill] sm:$0xff] }
 0x7ae   :  { %3165 = vrcp.f32 %v2162_v10  ;;  %v5749_v10 = vld [vmem:[#allocation131_spill] sm:$0xff] }
 0x7b5   :  { %v3162_v45 = vpop.eup %3161 }
 0x7b6   :  { %v2168_v7 = vmul.f32 %v3162_v45, %v3158_v5  ;;  %v3164_v26 = vpop.eup %3163  ;;  %v5744_v5 = vld [vmem:[#allocation126_spill] sm:$0xff]  ;;  %v5746_v45 = vld [vmem:[#allocation128_spill] sm:$0xff] }
 0x7b7   :  { %v2167_v42 = vmul.f32 %v3164_v26, %v4420_v1  ;;  %v5741_v1 = vld [vmem:[#allocation123_spill] sm:$0xff]  ;;  %v5748_v26 = vld [vmem:[#allocation130_spill] sm:$0xff] }
 0x7b8   :  { %v3166_v63 = vpop.eup %3165 }
 0x7b9   :  { %v4570_v8 = vadd.f32 %v2168_v7, %v2167_v42  ;;  %v5747_v7 = vld [vmem:[#allocation129_spill] sm:$0xff]  ;;  %v5750_v42 = vld [vmem:[#allocation132_spill] sm:$0xff] }
 0x7bb   :  { %3167 = vtanh.f32 %v4570_v8 }
 0x7c5   :  { %v3168_v33 = vpop.eup %3167 }
 0x7c6   :  { %v2171_v61 = vmul.f32 %v3168_v33, %v3166_v63  ;;  %v5751_v63 = vld [vmem:[#allocation133_spill] sm:$0xff]  ;;  %v5752_v33 = vld [vmem:[#allocation134_spill] sm:$0xff] }
 0x7c8   :  { %v2213_v52 = vrot.slane %v2171_v61, 3  ;;  %v5753_v61 = vld [vmem:[#allocation135_spill] sm:$0xff] }
 0x7ca   :  { %v2216_v59 = vpack.c.bf16 %v2213_v52, %v2213_v52  ;;  %v5755_v52 = vld [vmem:[#allocation137_spill] sm:$0xff] }
 0x7cc   :  { %v2222_v29 = vshrl.u32 %v2216_v59, 16  ;;  %v5756_v59 = vld [vmem:[#allocation138_spill] sm:$0xff] }
 0x7ce   :  { %v2224_v21 = vrot.slane %v2222_v29, 2  ;;  %v5758_v29 = vld [vmem:[#allocation140_spill] sm:$0xff] }
 0x7d0   :  { %2259 = vmatprep.mubr.bf16.mxu0 %v2224_v21  ;;  %2300 = vmatprep.mubr.bf16.mxu1 %v2224_v21 }
 0x7d1   :  { %2260 = vmatmul.mubr.bf16.vlgmr.msra.gmra.mrb[44].mxu0 %v4573_v28  ;;  %2301 = vmatmul.mubr.bf16.vlgmr.msra.gmra.mrb[44].mxu1 %v4573_v28 }
 0x7d2   :  { %2310 = vmatpush1.bf16.msra.mxu0 %v3653_v25  ;;  %2351 = vmatpush1.bf16.msra.mxu1 %v5362_v15 }
 0x7d3   :  { %2341 = vmatprep.mubr.bf16.mxu0 %v2224_v21  ;;  %2382 = vmatprep.mubr.bf16.mxu1 %v2224_v21  ;;  %v5759_v21 = vld [vmem:[#allocation141_spill] sm:$0xff] }
 0x7d4   :  { %2311 = vmatprep.subr.bf16.mxu0 %v5363_v18  ;;  %2352 = vmatprep.subr.bf16.mxu1 %v5364_v20 }
 0x7d6   :  { %2312 = vmatpush1.bf16.msra.mxu0 %v5365_v27  ;;  %2353 = vmatpush1.bf16.msra.mxu1 %v5366_v60 }
 0x7d7   :  { %2313 = vmatprep.subr.bf16.mxu0 %v5367_v53  ;;  %2354 = vmatprep.subr.bf16.mxu1 %v5368_v19 }
 0x7da   :  { %2314 = vmatpush1.bf16.msra.mxu0 %v5456_v13  ;;  %2355 = vmatpush1.bf16.msra.mxu1 %v5457_v47 }
 0x7db   :  { %2315 = vmatprep.subr.bf16.mxu0 %v5458_v57  ;;  %2356 = vmatprep.subr.bf16.mxu1 %v5459_v41 }
 0x7de   :  { %2316 = vmatpush1.bf16.msra.mxu0 %v5460_v48  ;;  %2357 = vmatpush1.bf16.msra.mxu1 %v5461_v49 }
 0x7df   :  { %2317 = vmatprep.subr.bf16.mxu0 %v5462_v54  ;;  %2358 = vmatprep.subr.bf16.mxu1 %v5463_v38 }
 0x7e2   :  { %2318 = vmatpush1.bf16.msra.mxu0 %v5551_v4  ;;  %2359 = vmatpush1.bf16.msra.mxu1 %v5552_v31 }
 0x7e3   :  { %2319 = vmatprep.subr.bf16.mxu0 %v5553_v44  ;;  %2360 = vmatprep.subr.bf16.mxu1 %v5554_v24 }
 0x7e6   :  { %2320 = vmatpush1.bf16.msra.mxu0 %v5555_v11  ;;  %2361 = vmatpush1.bf16.msra.mxu1 %v5556_v14 }
 0x7e7   :  { %2321 = vmatprep.subr.bf16.mxu0 %v5557_v6  ;;  %2362 = vmatprep.subr.bf16.mxu1 %v5558_v36 }
 0x7ea   :  { %2322 = vmatpush1.bf16.msra.mxu0 %v5559_v55  ;;  %2363 = vmatpush1.bf16.msra.mxu1 %v5560_v2 }
 0x7eb   :  { %2323 = vmatprep.subr.bf16.mxu0 %v5474_v30  ;;  %2364 = vmatprep.subr.bf16.mxu1 %v5475_v39 }
 0x7ee   :  { %2324 = vmatpush1.bf16.msra.mxu0 %v5476_v58  ;;  %2365 = vmatpush1.bf16.msra.mxu1 %v5561_v23 }
 0x7ef   :  { %2325 = vmatprep.subr.bf16.mxu0 %v5562_v22  ;;  %2366 = vmatprep.subr.bf16.mxu1 %v5479_v0 }
 0x7f2   :  { %2326 = vmatpush1.bf16.msra.mxu0 %v5480_v3  ;;  %2367 = vmatpush1.bf16.msra.mxu1 %v5481_v37 }
 0x7f3   :  { %2327 = vmatprep.subr.bf16.mxu0 %v5482_v46  ;;  %2368 = vmatprep.subr.bf16.mxu1 %v5483_v56 }
 0x7f6   :  { %2328 = vmatpush1.bf16.msra.mxu0 %v5484_v32  ;;  %2369 = vmatpush1.bf16.msra.mxu1 %v5741_v1 }
 0x7f7   :  { %2329 = vmatprep.subr.bf16.mxu0 %v5742_v43  ;;  %2370 = vmatprep.subr.bf16.mxu1 %v5743_v12 }
 0x7fa   :  { %2330 = vmatpush1.bf16.msra.mxu0 %v5744_v5  ;;  %2371 = vmatpush1.bf16.msra.mxu1 %v5745_v35 }
 0x7fb   :  { %2331 = vmatprep.subr.bf16.mxu0 %v5746_v45  ;;  %2372 = vmatprep.subr.bf16.mxu1 %v5747_v7 }
 0x7fe   :  { %2332 = vmatpush1.bf16.msra.mxu0 %v5748_v26  ;;  %2373 = vmatpush1.bf16.msra.mxu1 %v5749_v10  ;;  %v5760_v10 = vld [vmem:[#allocation142_spill] sm:$0xff] }
 0x7ff   :  { %2333 = vmatprep.subr.bf16.mxu0 %v5750_v42  ;;  %2374 = vmatprep.subr.bf16.mxu1 %v5751_v63  ;;  %v5761_v42 = vld [vmem:[#allocation143_spill] sm:$0xff]  ;;  %v5762_v63 = vld [vmem:[#allocation144_spill] sm:$0xff] }
 0x802   :  { %2334 = vmatpush1.bf16.msra.mxu0 %v5752_v33  ;;  %2375 = vmatpush1.bf16.msra.mxu1 %v5753_v61  ;;  %v5763_v33 = vld [vmem:[#allocation145_spill] sm:$0xff]  ;;  %v5764_v61 = vld [vmem:[#allocation146_spill] sm:$0xff] }
 0x803   :  { %2335 = vmatprep.subr.bf16.mxu0 %v5754_v50  ;;  %2376 = vmatprep.subr.bf16.mxu1 %v5755_v52  ;;  %v5765_v50 = vld [vmem:[#allocation147_spill] sm:$0xff] }
 0x804   :  { %v5766_v52 = vld [vmem:[#allocation15_spill] sm:$0xff] }
 0x806   :  { %2336 = vmatpush1.bf16.msra.mxu0 %v5756_v59  ;;  %2377 = vmatpush1.bf16.msra.mxu1 %v5757_v16  ;;  %v5767_v59 = vld [vmem:[#allocation16_spill] sm:$0xff] }
 0x807   :  { %2337 = vmatprep.subr.bf16.mxu0 %v5758_v29  ;;  %2378 = vmatprep.subr.bf16.mxu1 %v5759_v21  ;;  %v5768_v21 = vld [vmem:[#allocation17_spill] sm:$0xff]  ;;  %v5777_v29 = vld [vmem:[#allocation26_spill] sm:$0xff] }
 0x80a   :  { %2338 = vmatpush1.bf16.msra.mxu0 %v5760_v10  ;;  %2379 = vmatpush1.bf16.msra.mxu1 %v5761_v42  ;;  %v5769_v10 = vld [vmem:[#allocation18_spill] sm:$0xff]  ;;  %v5770_v42 = vld [vmem:[#allocation19_spill] sm:$0xff] }
 0x80b   :  { %2339 = vmatprep.subr.bf16.mxu0 %v5762_v63  ;;  %2380 = vmatprep.subr.bf16.mxu1 %v5763_v33  ;;  %v5771_v63 = vld [vmem:[#allocation20_spill] sm:$0xff]  ;;  %v5772_v33 = vld [vmem:[#allocation21_spill] sm:$0xff] }
 0x80e   :  { %2340 = vmatpush1.bf16.msra.mxu0 %v5764_v61  ;;  %2381 = vmatpush1.bf16.msra.mxu1 %v5765_v50  ;;  %v5773_v61 = vld [vmem:[#allocation22_spill] sm:$0xff]  ;;  %v5774_v50 = vld [vmem:[#allocation23_spill] sm:$0xff] }
 0x80f   :  { %2467 = vmatprep.subr.bf16.mxu0 %v5766_v52  ;;  %2508 = vmatprep.subr.bf16.mxu1 %v5767_v59  ;;  %v5775_v52 = vld [vmem:[#allocation24_spill] sm:$0xff]  ;;  %v5776_v59 = vld [vmem:[#allocation25_spill] sm:$0xff] }
 0x811   :  { %2342 = vmatmul.mubr.bf16.vlgmr.msra.gmra.mrb[48].mxu0 %v4573_v28  ;;  %2383 = vmatmul.mubr.bf16.vlgmr.msra.gmra.mrb[48].mxu1 %v4573_v28  ;;  %v5778_v28 = vld [vmem:[#allocation27_spill] sm:$0xff] }
 0x812   :  { %2468 = vmatpush1.bf16.msra.mxu0 %v5768_v21  ;;  %2509 = vmatpush1.bf16.msra.mxu1 %v5769_v10  ;;  %v5779_v21 = vld [vmem:[#allocation28_spill] sm:$0xff]  ;;  %v5780_v10 = vld [vmem:[#allocation29_spill] sm:$0xff] }
 0x813   :  { %2469 = vmatprep.subr.bf16.mxu0 %v5770_v42  ;;  %2510 = vmatprep.subr.bf16.mxu1 %v5771_v63  ;;  %v5781_v42 = vld [vmem:[#allocation30_spill] sm:$0xff]  ;;  %v5782_v63 = vld [vmem:[#allocation31_spill] sm:$0xff] }
 0x816   :  { %2470 = vmatpush1.bf16.msra.mxu0 %v5772_v33  ;;  %2511 = vmatpush1.bf16.msra.mxu1 %v5773_v61  ;;  %v5783_v33 = vld [vmem:[#allocation32_spill] sm:$0xff]  ;;  %v5784_v61 = vld [vmem:[#allocation33_spill] sm:$0xff] }
 0x817   :  { %2471 = vmatprep.subr.bf16.mxu0 %v5774_v50  ;;  %2512 = vmatprep.subr.bf16.mxu1 %v5775_v52  ;;  %v5785_v50 = vld [vmem:[#allocation34_spill] sm:$0xff]  ;;  %v5786_v52 = vld [vmem:[#allocation35_spill] sm:$0xff] }
 0x81a   :  { %2472 = vmatpush1.bf16.msra.mxu0 %v5776_v59  ;;  %2513 = vmatpush1.bf16.msra.mxu1 %v5777_v29  ;;  %v5787_v59 = vld [vmem:[#allocation36_spill] sm:$0xff]  ;;  %v5788_v29 = vld [vmem:[#allocation37_spill] sm:$0xff] }
 0x81b   :  { %2473 = vmatprep.subr.bf16.mxu0 %v5778_v28  ;;  %2514 = vmatprep.subr.bf16.mxu1 %v5779_v21  ;;  %v5789_v28 = vld [vmem:[#allocation38_spill] sm:$0xff]  ;;  %v5790_v21 = vld [vmem:[#allocation39_spill] sm:$0xff] }
 0x81e   :  { %2474 = vmatpush1.bf16.msra.mxu0 %v5780_v10  ;;  %2515 = vmatpush1.bf16.msra.mxu1 %v5781_v42  ;;  %v5791_v10 = vld [vmem:[#allocation41_spill] sm:$0xff]  ;;  %v5792_v42 = vld [vmem:[#allocation40_spill] sm:$0xff] }
 0x81f   :  { %2475 = vmatprep.subr.bf16.mxu0 %v5782_v63  ;;  %2516 = vmatprep.subr.bf16.mxu1 %v5783_v33  ;;  %v5793_v63 = vld [vmem:[#allocation42_spill] sm:$0xff]  ;;  %v5794_v33 = vld [vmem:[#allocation43_spill] sm:$0xff] }
 0x822   :  { %2476 = vmatpush1.bf16.msra.mxu0 %v5784_v61  ;;  %2517 = vmatpush1.bf16.msra.mxu1 %v5785_v50  ;;  %v5795_v61 = vld [vmem:[#allocation44_spill] sm:$0xff]  ;;  %v5796_v50 = vld [vmem:[#allocation45_spill] sm:$0xff] }
 0x823   :  { %2477 = vmatprep.subr.bf16.mxu0 %v5786_v52  ;;  %2518 = vmatprep.subr.bf16.mxu1 %v5787_v59  ;;  %v5797_v52 = vld [vmem:[#allocation46_spill] sm:$0xff]  ;;  %v5798_v59 = vld [vmem:[#allocation47_spill] sm:$0xff] }
 0x826   :  { %2478 = vmatpush1.bf16.msra.mxu0 %v5788_v29  ;;  %2519 = vmatpush1.bf16.msra.mxu1 %v5789_v28  ;;  %v5799_v29 = vld [vmem:[#allocation48_spill] sm:$0xff]  ;;  %v5800_v28 = vld [vmem:[#allocation49_spill] sm:$0xff] }
 0x827   :  { %2479 = vmatprep.subr.bf16.mxu0 %v5790_v21  ;;  %2520 = vmatprep.subr.bf16.mxu1 %v5791_v10  ;;  %v5801_v21 = vld [vmem:[#allocation50_spill] sm:$0xff]  ;;  %v5802_v10 = vld [vmem:[#allocation51_spill] sm:$0xff] }
 0x82a   :  { %2480 = vmatpush1.bf16.msra.mxu0 %v5792_v42  ;;  %2521 = vmatpush1.bf16.msra.mxu1 %v5793_v63  ;;  %v5803_v42 = vld [vmem:[#allocation52_spill] sm:$0xff]  ;;  %v5804_v63 = vld [vmem:[#allocation53_spill] sm:$0xff] }
 0x82b   :  { %2481 = vmatprep.subr.bf16.mxu0 %v5794_v33  ;;  %2522 = vmatprep.subr.bf16.mxu1 %v5795_v61  ;;  %v5805_v33 = vld [vmem:[#allocation54_spill] sm:$0xff]  ;;  %v5806_v61 = vld [vmem:[#allocation55_spill] sm:$0xff] }
 0x82e   :  { %2482 = vmatpush1.bf16.msra.mxu0 %v5796_v50  ;;  %2523 = vmatpush1.bf16.msra.mxu1 %v5797_v52  ;;  %v5807_v50 = vld [vmem:[#allocation56_spill] sm:$0xff]  ;;  %v5808_v52 = vld [vmem:[#allocation57_spill] sm:$0xff] }
 0x82f   :  { %2483 = vmatprep.subr.bf16.mxu0 %v5798_v59  ;;  %2524 = vmatprep.subr.bf16.mxu1 %v5799_v29  ;;  %v5809_v59 = vld [vmem:[#allocation58_spill] sm:$0xff]  ;;  %v5810_v29 = vld [vmem:[#allocation59_spill] sm:$0xff] }
 0x832   :  { %2484 = vmatpush1.bf16.msra.mxu0 %v5800_v28  ;;  %2525 = vmatpush1.bf16.msra.mxu1 %v5801_v21  ;;  %v5811_v28 = vld [vmem:[#allocation60_spill] sm:$0xff]  ;;  %v5812_v21 = vld [vmem:[#allocation61_spill] sm:$0xff] }
 0x833   :  { %2485 = vmatprep.subr.bf16.mxu0 %v5802_v10  ;;  %2526 = vmatprep.subr.bf16.mxu1 %v5803_v42  ;;  %v5813_v10 = vld [vmem:[#allocation62_spill] sm:$0xff]  ;;  %v5814_v42 = vld [vmem:[#allocation63_spill] sm:$0xff] }
 0x836   :  { %2486 = vmatpush1.bf16.msra.mxu0 %v5804_v63  ;;  %2527 = vmatpush1.bf16.msra.mxu1 %v5805_v33  ;;  %v5815_v63 = vld [vmem:[#allocation64_spill] sm:$0xff]  ;;  %v5816_v33 = vld [vmem:[#allocation65_spill] sm:$0xff] }
 0x837   :  { %2487 = vmatprep.subr.bf16.mxu0 %v5806_v61  ;;  %2528 = vmatprep.subr.bf16.mxu1 %v5807_v50  ;;  %v5817_v61 = vld [vmem:[#allocation66_spill] sm:$0xff]  ;;  %v5818_v50 = vld [vmem:[#allocation67_spill] sm:$0xff] }
 0x83a   :  { %2488 = vmatpush1.bf16.msra.mxu0 %v5808_v52  ;;  %2529 = vmatpush1.bf16.msra.mxu1 %v5809_v59  ;;  %v5819_v52 = vld [vmem:[#allocation68_spill] sm:$0xff]  ;;  %v5820_v59 = vld [vmem:[#allocation69_spill] sm:$0xff] }
 0x83b   :  { %2489 = vmatprep.subr.bf16.mxu0 %v5810_v29  ;;  %2530 = vmatprep.subr.bf16.mxu1 %v5811_v28  ;;  %v5821_v29 = vld [vmem:[#allocation70_spill] sm:$0xff]  ;;  %v5822_v28 = vld [vmem:[#allocation71_spill] sm:$0xff] }
 0x83e   :  { %2490 = vmatpush1.bf16.msra.mxu0 %v5812_v21  ;;  %2531 = vmatpush1.bf16.msra.mxu1 %v5813_v10  ;;  %v5823_v21 = vld [vmem:[#allocation72_spill] sm:$0xff]  ;;  %v5824_v10 = vld [vmem:[#allocation73_spill] sm:$0xff] }
 0x83f   :  { %2491 = vmatprep.subr.bf16.mxu0 %v5814_v42  ;;  %2532 = vmatprep.subr.bf16.mxu1 %v5815_v63  ;;  %v5825_v42 = vld [vmem:[#allocation74_spill] sm:$0xff]  ;;  %v5826_v63 = vld [vmem:[#allocation75_spill] sm:$0xff] }
 0x842   :  { %2492 = vmatpush1.bf16.msra.mxu0 %v5816_v33  ;;  %2533 = vmatpush1.bf16.msra.mxu1 %v5817_v61  ;;  %v5827_v33 = vld [vmem:[#allocation76_spill] sm:$0xff]  ;;  %v5828_v61 = vld [vmem:[#allocation77_spill] sm:$0xff] }
 0x843   :  { %2493 = vmatprep.subr.bf16.mxu0 %v5818_v50  ;;  %2534 = vmatprep.subr.bf16.mxu1 %v5819_v52  ;;  %v5829_v50 = vld [vmem:[#allocation78_spill] sm:$0xff]  ;;  %v5830_v52 = vld [vmem:[#allocation79_spill] sm:$0xff] }
 0x846   :  { %2494 = vmatpush1.bf16.msra.mxu0 %v5820_v59  ;;  %2535 = vmatpush1.bf16.msra.mxu1 %v5821_v29  ;;  %v5831_v59 = vld [vmem:[#allocation80_spill] sm:$0xff] }
 0x847   :  { %2495 = vmatprep.subr.bf16.mxu0 %v5822_v28  ;;  %2536 = vmatprep.subr.bf16.mxu1 %v5823_v21 }
 0x84a   :  { %2496 = vmatpush1.bf16.msra.mxu0 %v5824_v10  ;;  %2537 = vmatpush1.bf16.msra.mxu1 %v5825_v42 }
 0x84b   :  { %2497 = vmatprep.subr.bf16.mxu0 %v5826_v63  ;;  %2538 = vmatprep.subr.bf16.mxu1 %v5827_v33 }
 0x84e   :  { %2498 = vmatpush1.bf16.msra.mxu0 %v5828_v61  ;;  %2539 = vmatpush1.bf16.msra.mxu1 %v5829_v50 }
 0x84f   :  { %2549 = vmatprep.subr.bf16.mxu0 %v5830_v52  ;;  %2590 = vmatprep.subr.bf16.mxu1 %v5831_v59 }
 0x8a4   :  { %v2261_v29 = vpop.f32.mrb[44].mxu0  ;;  %v2302_v28 = vpop.f32.mrb[44].mxu1 }
 0x8a5   :  { %v2420_v16 = vrot.slane %v2261_v29, 2  ;;  %v2263_v21 = vpop.f32.mrb[45].mxu0  ;;  %v2304_v26 = vpop.f32.mrb[45].mxu1  ;;  %v2422_v50 = vrot.slane %v2302_v28, 2 }
 0x8a6   :  { %v2421_v10 = vrot.slane %v2263_v21, 2  ;;  %v2265_v7 = vpop.f32.mrb[46].mxu0  ;;  %v2306_v42 = vpop.f32.mrb[46].mxu1  ;;  %v2423_v29 = vrot.slane %v2304_v26, 2  ;;  %v5832_v21 = vld [vmem:[#allocation86_spill] sm:$0xff] }
 0x8a7   :  { %v2428_v63 = vadd.f32 %v2420_v16, %v5347_v34  ;;  %v2266_v45 = vpop.f32.mrb[47].mxu0  ;;  %v2307_v33 = vpop.f32.mrb[47].mxu1  ;;  %v2430_v59 = vadd.f32 %v2422_v50, %v5546_v17  ;;  %v5860_v17 = vld [vmem:[#allocation146_spill] sm:$0xff]  ;;  %v5862_v34 = vld [vmem:[#allocation79_spill] sm:$0xff] }
 0x8a8   :  { %v2429_v61 = vadd.f32 %v2421_v10, %v5449_v40  ;;  %v2431_v7 = vadd.f32 %v2423_v29, %v5832_v21  ;;  %v5861_v40 = vld [vmem:[#allocation147_spill] sm:$0xff] }
 0x8a9   :  { %v2432_v35 = vsub.f32 0.0, %v2428_v63  ;;  %v2434_v43 = vsub.f32 0.0, %v2430_v59 }
 0x8aa   :  { %v2433_v5 = vsub.f32 0.0, %v2429_v61 }
 0x8ab   :  { %v2435_v52 = vmul.f32 1.442695, %v2432_v35  ;;  %v2439_v42 = vmul.f32 1.442695, %v2434_v43 }
 0x8ac   :  { %v2437_v12 = vmul.f32 1.442695, %v2433_v5 }
 0x8ad   :  { %3169 = vpow2.f32 %v2435_v52  ;;  %v5833_v52 = vld [vmem:[#allocation90_spill] sm:$0xff] }
 0x8ae   :  { %3171 = vpow2.f32 %v2437_v12  ;;  %v2449_v63 = vrot.slane %v5833_v52, 7 }
 0x8af   :  { %3173 = vtanh.f32 %v2431_v7 }
 0x8b0   :  { %3175 = vpow2.f32 %v2439_v42  ;;  %v5835_v42 = vld [vmem:[#allocation82_spill] sm:$0xff] }
 0x8b7   :  { %v3170_v1 = vpop.eup %3169 }
 0x8b8   :  { %v2441_v16 = vadd.f32 1.0, %v3170_v1  ;;  %v3172_v45 = vpop.eup %3171 }
 0x8b9   :  { %v2442_v10 = vadd.f32 1.0, %v3172_v45  ;;  %v3174_v28 = vpop.eup %3173 }
 0x8ba   :  { %3177 = vrcp.f32 %v2441_v16  ;;  %v3176_v35 = vpop.eup %3175 }
 0x8bb   :  { %3179 = vrcp.f32 %v2442_v10  ;;  %v2443_v26 = vadd.f32 1.0, %v3176_v35 }
 0x8bd   :  { %3181 = vrcp.f32 %v2443_v26 }
 0x8c4   :  { %v3178_v5 = vpop.eup %3177 }
 0x8c5   :  { %v2452_v33 = vmul.f32 %v3178_v5, %v3174_v28  ;;  %v3180_v12 = vpop.eup %3179 }
 0x8c6   :  { %v2451_v59 = vmul.f32 %v3180_v12, %v2449_v63 }
 0x8c7   :  { %v3182_v1 = vpop.eup %3181 }
 0x8c8   :  { %v4712_v61 = vadd.f32 %v2452_v33, %v2451_v59 }
 0x8ca   :  { %5834 = vst [vmem:[#allocation91_spill] sm:$0xff] %v4712_v61  ;;  %3183 = vtanh.f32 %v4712_v61 }
 0x8d4   :  { %v3184_v43 = vpop.eup %3183 }
 0x8d5   :  { %v2455_v50 = vmul.f32 %v3184_v43, %v3182_v1 }
 0x8e4   :  { %v2343_v29 = vpop.f32.mrb[48].mxu0  ;;  %v2384_v7 = vpop.f32.mrb[48].mxu1 }
 0x8e5   :  { %v2391_v16 = vadd.f32 %v2343_v29, %v5835_v42  ;;  %v2345_v45 = vpop.f32.mrb[49].mxu0  ;;  %v2386_v10 = vpop.f32.mrb[49].mxu1  ;;  %v2393_v61 = vadd.f32 %v2384_v7, %v3962_v9  ;;  %v5858_v9 = vld [vmem:[#allocation144_spill] sm:$0xff] }
 0x8e6   :  { %v2392_v52 = vadd.f32 %v2345_v45, %v5455_v62  ;;  %v2347_v28 = vpop.f32.mrb[50].mxu0  ;;  %v2388_v5 = vpop.f32.mrb[50].mxu1  ;;  %v2394_v43 = vadd.f32 %v2386_v10, %v3967_v51  ;;  %v5857_v51 = vld [vmem:[#allocation143_spill] sm:$0xff]  ;;  %v5859_v62 = vld [vmem:[#allocation145_spill] sm:$0xff] }
 0x8e7   :  { %v2395_v35 = vsub.f32 0.0, %v2391_v16  ;;  %v2348_v63 = vpop.f32.mrb[51].mxu0  ;;  %v2389_v33 = vpop.f32.mrb[51].mxu1  ;;  %v2397_v1 = vsub.f32 0.0, %v2393_v61 }
 0x8e8   :  { %v2396_v12 = vsub.f32 0.0, %v2392_v52 }
 0x8e9   :  { %v2398_v26 = vmul.f32 1.442695, %v2395_v35  ;;  %v2402_v29 = vmul.f32 1.442695, %v2397_v1 }
 0x8ea   :  { %v2400_v59 = vmul.f32 1.442695, %v2396_v12 }
 0x8eb   :  { %3185 = vpow2.f32 %v2398_v26 }
 0x8ec   :  { %3187 = vpow2.f32 %v2400_v59 }
 0x8ed   :  { %3189 = vtanh.f32 %v2394_v43 }
 0x8ee   :  { %3191 = vpow2.f32 %v2402_v29  ;;  %v5839_v29 = vld [vmem:[#allocation125_spill] sm:$0xff] }
 0x8f5   :  { %v3186_v42 = vpop.eup %3185 }
 0x8f6   :  { %v2404_v21 = vadd.f32 1.0, %v3186_v42  ;;  %v3188_v45 = vpop.eup %3187 }
 0x8f7   :  { %v2405_v16 = vadd.f32 1.0, %v3188_v45  ;;  %v3190_v28 = vpop.eup %3189  ;;  %v5840_v45 = vld [vmem:[#allocation126_spill] sm:$0xff] }
 0x8f8   :  { %3193 = vrcp.f32 %v2404_v21  ;;  %v3192_v52 = vpop.eup %3191  ;;  %v2459_v21 = vpack.c.bf16 %v2455_v50, %v2455_v50  ;;  %v5838_v50 = vld [vmem:[#allocation124_spill] sm:$0xff] }
 0x8f9   :  { %3195 = vrcp.f32 %v2405_v16  ;;  %v2406_v33 = vadd.f32 1.0, %v3192_v52  ;;  %v5841_v16 = vld [vmem:[#allocation127_spill] sm:$0xff]  ;;  %v5843_v52 = vld [vmem:[#allocation129_spill] sm:$0xff] }
 0x8fa   :  { %v4723_v43 = vrot.slane %v2459_v21, 3  ;;  %v5853_v21 = vld [vmem:[#allocation139_spill] sm:$0xff] }
 0x8fb   :  { %3197 = vrcp.f32 %v2406_v33  ;;  %v5847_v33 = vld [vmem:[#allocation133_spill] sm:$0xff] }
 0x902   :  { %v3194_v5 = vpop.eup %3193 }
 0x903   :  { %v2412_v35 = vmul.f32 %v3194_v5, %v3190_v28  ;;  %v3196_v63 = vpop.eup %3195  ;;  %v5842_v28 = vld [vmem:[#allocation128_spill] sm:$0xff]  ;;  %v5844_v5 = vld [vmem:[#allocation130_spill] sm:$0xff] }
 0x904   :  { %v2411_v7 = vmul.f32 %v3196_v63, %v4570_v8  ;;  %v5837_v8 = vld [vmem:[#allocation123_spill] sm:$0xff]  ;;  %v5846_v63 = vld [vmem:[#allocation132_spill] sm:$0xff] }
 0x905   :  { %v3198_v42 = vpop.eup %3197 }
 0x906   :  { %v4720_v61 = vadd.f32 %v2412_v35, %v2411_v7  ;;  %v5845_v35 = vld [vmem:[#allocation131_spill] sm:$0xff]  ;;  %v5848_v7 = vld [vmem:[#allocation134_spill] sm:$0xff] }
 0x908   :  { %5836 = vst [vmem:[#allocation92_spill] sm:$0xff] %v4720_v61  ;;  %3199 = vtanh.f32 %v4720_v61  ;;  %v5856_v61 = vld [vmem:[#allocation142_spill] sm:$0xff] }
 0x912   :  { %v3200_v10 = vpop.eup %3199 }
 0x913   :  { %v2415_v12 = vmul.f32 %v3200_v10, %v3198_v42  ;;  %v5849_v42 = vld [vmem:[#allocation135_spill] sm:$0xff]  ;;  %v5850_v10 = vld [vmem:[#allocation136_spill] sm:$0xff] }
 0x915   :  { %v2457_v26 = vrot.slane %v2415_v12, 2  ;;  %v5851_v12 = vld [vmem:[#allocation137_spill] sm:$0xff] }
 0x917   :  { %v2460_v59 = vpack.c.bf16 %v2457_v26, %v2457_v26  ;;  %v5852_v26 = vld [vmem:[#allocation138_spill] sm:$0xff] }
 0x919   :  { %v2464_v1 = vrot.slane %v2460_v59, 3  ;;  %v5854_v59 = vld [vmem:[#allocation140_spill] sm:$0xff] }
 0x91b   :  { %2499 = vmatprep.mubr.bf16.mxu0 %v2464_v1  ;;  %2540 = vmatprep.mubr.bf16.mxu1 %v2464_v1 }
 0x91c   :  { %2500 = vmatmul.mubr.bf16.vlgmr.msra.gmra.mrb[52].mxu0 %v4723_v43  ;;  %2541 = vmatmul.mubr.bf16.vlgmr.msra.gmra.mrb[52].mxu1 %v4723_v43 }
 0x91d   :  { %2550 = vmatpush1.bf16.msra.mxu0 %v3653_v25  ;;  %2591 = vmatpush1.bf16.msra.mxu1 %v5362_v15 }
 0x91e   :  { %2581 = vmatprep.mubr.bf16.mxu0 %v2464_v1  ;;  %2622 = vmatprep.mubr.bf16.mxu1 %v2464_v1  ;;  %v5855_v1 = vld [vmem:[#allocation141_spill] sm:$0xff] }
 0x91f   :  { %2551 = vmatprep.subr.bf16.mxu0 %v5363_v18  ;;  %2592 = vmatprep.subr.bf16.mxu1 %v5364_v20 }
 0x921   :  { %2552 = vmatpush1.bf16.msra.mxu0 %v5365_v27  ;;  %2593 = vmatpush1.bf16.msra.mxu1 %v5366_v60 }
 0x922   :  { %2553 = vmatprep.subr.bf16.mxu0 %v5367_v53  ;;  %2594 = vmatprep.subr.bf16.mxu1 %v5368_v19 }
 0x925   :  { %2554 = vmatpush1.bf16.msra.mxu0 %v5456_v13  ;;  %2595 = vmatpush1.bf16.msra.mxu1 %v5457_v47 }
 0x926   :  { %2555 = vmatprep.subr.bf16.mxu0 %v5458_v57  ;;  %2596 = vmatprep.subr.bf16.mxu1 %v5459_v41 }
 0x929   :  { %2556 = vmatpush1.bf16.msra.mxu0 %v5460_v48  ;;  %2597 = vmatpush1.bf16.msra.mxu1 %v5461_v49 }
 0x92a   :  { %2557 = vmatprep.subr.bf16.mxu0 %v5462_v54  ;;  %2598 = vmatprep.subr.bf16.mxu1 %v5463_v38 }
 0x92d   :  { %2558 = vmatpush1.bf16.msra.mxu0 %v5551_v4  ;;  %2599 = vmatpush1.bf16.msra.mxu1 %v5552_v31 }
 0x92e   :  { %2559 = vmatprep.subr.bf16.mxu0 %v5553_v44  ;;  %2600 = vmatprep.subr.bf16.mxu1 %v5554_v24 }
 0x931   :  { %2560 = vmatpush1.bf16.msra.mxu0 %v5555_v11  ;;  %2601 = vmatpush1.bf16.msra.mxu1 %v5556_v14 }
 0x932   :  { %2561 = vmatprep.subr.bf16.mxu0 %v5557_v6  ;;  %2602 = vmatprep.subr.bf16.mxu1 %v5558_v36 }
 0x935   :  { %2562 = vmatpush1.bf16.msra.mxu0 %v5559_v55  ;;  %2603 = vmatpush1.bf16.msra.mxu1 %v5560_v2 }
 0x936   :  { %2563 = vmatprep.subr.bf16.mxu0 %v5474_v30  ;;  %2604 = vmatprep.subr.bf16.mxu1 %v5475_v39 }
 0x939   :  { %2564 = vmatpush1.bf16.msra.mxu0 %v5476_v58  ;;  %2605 = vmatpush1.bf16.msra.mxu1 %v5561_v23 }
 0x93a   :  { %2565 = vmatprep.subr.bf16.mxu0 %v5562_v22  ;;  %2606 = vmatprep.subr.bf16.mxu1 %v5479_v0 }
 0x93d   :  { %2566 = vmatpush1.bf16.msra.mxu0 %v5480_v3  ;;  %2607 = vmatpush1.bf16.msra.mxu1 %v5481_v37 }
 0x93e   :  { %2567 = vmatprep.subr.bf16.mxu0 %v5482_v46  ;;  %2608 = vmatprep.subr.bf16.mxu1 %v5483_v56 }
 0x941   :  { %2568 = vmatpush1.bf16.msra.mxu0 %v5484_v32  ;;  %2609 = vmatpush1.bf16.msra.mxu1 %v5837_v8 }
 0x942   :  { %2569 = vmatprep.subr.bf16.mxu0 %v5838_v50  ;;  %2610 = vmatprep.subr.bf16.mxu1 %v5839_v29 }
 0x945   :  { %2570 = vmatpush1.bf16.msra.mxu0 %v5840_v45  ;;  %2611 = vmatpush1.bf16.msra.mxu1 %v5841_v16 }
 0x946   :  { %2571 = vmatprep.subr.bf16.mxu0 %v5842_v28  ;;  %2612 = vmatprep.subr.bf16.mxu1 %v5843_v52 }
 0x949   :  { %2572 = vmatpush1.bf16.msra.mxu0 %v5844_v5  ;;  %2613 = vmatpush1.bf16.msra.mxu1 %v5845_v35 }
 0x94a   :  { %2573 = vmatprep.subr.bf16.mxu0 %v5846_v63  ;;  %2614 = vmatprep.subr.bf16.mxu1 %v5847_v33 }
 0x94d   :  { %2574 = vmatpush1.bf16.msra.mxu0 %v5848_v7  ;;  %2615 = vmatpush1.bf16.msra.mxu1 %v5849_v42 }
 0x94e   :  { %2575 = vmatprep.subr.bf16.mxu0 %v5850_v10  ;;  %2616 = vmatprep.subr.bf16.mxu1 %v5851_v12 }
 0x951   :  { %2576 = vmatpush1.bf16.msra.mxu0 %v5852_v26  ;;  %2617 = vmatpush1.bf16.msra.mxu1 %v5853_v21  ;;  %v5863_v26 = vld [vmem:[#allocation80_spill] sm:$0xff] }
 0x952   :  { %2577 = vmatprep.subr.bf16.mxu0 %v5854_v59  ;;  %2618 = vmatprep.subr.bf16.mxu1 %v5855_v1 }
 0x955   :  { %2578 = vmatpush1.bf16.msra.mxu0 %v5856_v61  ;;  %2619 = vmatpush1.bf16.msra.mxu1 %v5857_v51 }
 0x956   :  { %2579 = vmatprep.subr.bf16.mxu0 %v5858_v9  ;;  %2620 = vmatprep.subr.bf16.mxu1 %v5859_v62 }
 0x959   :  { %2580 = vmatpush1.bf16.msra.mxu0 %v5860_v17  ;;  %2621 = vmatpush1.bf16.msra.mxu1 %v5861_v40 }
 0x95a   :  { %2711 = vmatprep.subr.bf16.mxu0 %v5862_v34  ;;  %2752 = vmatprep.subr.bf16.mxu1 %v5863_v26  ;;  %v5864_v34 = vld [vmem:[#allocation138_spill] sm:$0xff]  ;;  %v5872_v26 = vld [vmem:[#allocation149_spill] sm:$0xff] }
 0x95c   :  { %2582 = vmatmul.mubr.bf16.vlgmr.msra.gmra.mrb[56].mxu0 %v4723_v43  ;;  %2623 = vmatmul.mubr.bf16.vlgmr.msra.gmra.mrb[56].mxu1 %v4723_v43 }
 0x95d   :  { %2712 = vmatpush1.bf16.msra.mxu0 %v3653_v25  ;;  %2753 = vmatpush1.bf16.msra.mxu1 %v5362_v15 }
 0x95e   :  { %2713 = vmatprep.subr.bf16.mxu0 %v5363_v18  ;;  %2754 = vmatprep.subr.bf16.mxu1 %v5364_v20 }
 0x961   :  { %2714 = vmatpush1.bf16.msra.mxu0 %v5365_v27  ;;  %2755 = vmatpush1.bf16.msra.mxu1 %v5366_v60 }
 0x962   :  { %2715 = vmatprep.subr.bf16.mxu0 %v5367_v53  ;;  %2756 = vmatprep.subr.bf16.mxu1 %v5368_v19 }
 0x965   :  { %2716 = vmatpush1.bf16.msra.mxu0 %v5456_v13  ;;  %2757 = vmatpush1.bf16.msra.mxu1 %v5457_v47  ;;  %v5865_v13 = vld [vmem:[#allocation83_spill] sm:$0xff] }
 0x966   :  { %2717 = vmatprep.subr.bf16.mxu0 %v5458_v57  ;;  %2758 = vmatprep.subr.bf16.mxu1 %v5459_v41  ;;  %v5866_v41 = vld [vmem:[#allocation84_spill] sm:$0xff] }
 0x969   :  { %2718 = vmatpush1.bf16.msra.mxu0 %v5460_v48  ;;  %2759 = vmatpush1.bf16.msra.mxu1 %v5461_v49 }
 0x96a   :  { %2719 = vmatprep.subr.bf16.mxu0 %v5462_v54  ;;  %2760 = vmatprep.subr.bf16.mxu1 %v5463_v38 }
 0x96d   :  { %2720 = vmatpush1.bf16.msra.mxu0 %v5551_v4  ;;  %2761 = vmatpush1.bf16.msra.mxu1 %v5552_v31 }
 0x96e   :  { %2721 = vmatprep.subr.bf16.mxu0 %v5553_v44  ;;  %2762 = vmatprep.subr.bf16.mxu1 %v5554_v24  ;;  %v5869_v24 = vld [vmem:[#allocation91_spill] sm:$0xff] }
 0x971   :  { %2722 = vmatpush1.bf16.msra.mxu0 %v5555_v11  ;;  %2763 = vmatpush1.bf16.msra.mxu1 %v5556_v14  ;;  %v2689_v11 = vrot.slane %v5869_v24, 7 }
 0x972   :  { %2723 = vmatprep.subr.bf16.mxu0 %v5557_v6  ;;  %2764 = vmatprep.subr.bf16.mxu1 %v5558_v36 }
 0x975   :  { %2724 = vmatpush1.bf16.msra.mxu0 %v5559_v55  ;;  %2765 = vmatpush1.bf16.msra.mxu1 %v5560_v2 }
 0x976   :  { %2725 = vmatprep.subr.bf16.mxu0 %v5474_v30  ;;  %2766 = vmatprep.subr.bf16.mxu1 %v5475_v39 }
 0x979   :  { %2726 = vmatpush1.bf16.msra.mxu0 %v5476_v58  ;;  %2767 = vmatpush1.bf16.msra.mxu1 %v5561_v23 }
 0x97a   :  { %2727 = vmatprep.subr.bf16.mxu0 %v5562_v22  ;;  %2768 = vmatprep.subr.bf16.mxu1 %v5479_v0  ;;  %v5868_v0 = vld [vmem:[#allocation86_spill] sm:$0xff] }
 0x97d   :  { %2728 = vmatpush1.bf16.msra.mxu0 %v5480_v3  ;;  %2769 = vmatpush1.bf16.msra.mxu1 %v5481_v37 }
 0x97e   :  { %2729 = vmatprep.subr.bf16.mxu0 %v5482_v46  ;;  %2770 = vmatprep.subr.bf16.mxu1 %v5483_v56 }
 0x981   :  { %2730 = vmatpush1.bf16.msra.mxu0 %v5484_v32  ;;  %2771 = vmatpush1.bf16.msra.mxu1 %v5837_v8 }
 0x982   :  { %2731 = vmatprep.subr.bf16.mxu0 %v5838_v50  ;;  %2772 = vmatprep.subr.bf16.mxu1 %v5839_v29  ;;  %v5870_v50 = vld [vmem:[#allocation82_spill] sm:$0xff] }
 0x985   :  { %2732 = vmatpush1.bf16.msra.mxu0 %v5840_v45  ;;  %2773 = vmatpush1.bf16.msra.mxu1 %v5841_v16 }
 0x986   :  { %2733 = vmatprep.subr.bf16.mxu0 %v5842_v28  ;;  %2774 = vmatprep.subr.bf16.mxu1 %v5843_v52  ;;  %v5871_v28 = vld [vmem:[#allocation148_spill] sm:$0xff] }
 0x989   :  { %2734 = vmatpush1.bf16.msra.mxu0 %v5844_v5  ;;  %2775 = vmatpush1.bf16.msra.mxu1 %v5845_v35 }
 0x98a   :  { %2735 = vmatprep.subr.bf16.mxu0 %v5846_v63  ;;  %2776 = vmatprep.subr.bf16.mxu1 %v5847_v33 }
 0x98d   :  { %2736 = vmatpush1.bf16.msra.mxu0 %v5848_v7  ;;  %2777 = vmatpush1.bf16.msra.mxu1 %v5849_v42 }
 0x98e   :  { %2737 = vmatprep.subr.bf16.mxu0 %v5850_v10  ;;  %2778 = vmatprep.subr.bf16.mxu1 %v5851_v12 }
 0x991   :  { %2738 = vmatpush1.bf16.msra.mxu0 %v5864_v34  ;;  %2779 = vmatpush1.bf16.msra.mxu1 %v5853_v21 }
 0x992   :  { %2739 = vmatprep.subr.bf16.mxu0 %v5854_v59  ;;  %2780 = vmatprep.subr.bf16.mxu1 %v5855_v1  ;;  %v5873_v1 = vld [vmem:[#allocation150_spill] sm:$0xff] }
 0x995   :  { %2740 = vmatpush1.bf16.msra.mxu0 %v5856_v61  ;;  %2781 = vmatpush1.bf16.msra.mxu1 %v5857_v51 }
 0x996   :  { %2741 = vmatprep.subr.bf16.mxu0 %v5858_v9  ;;  %2782 = vmatprep.subr.bf16.mxu1 %v5859_v62 }
 0x999   :  { %2742 = vmatpush1.bf16.msra.mxu0 %v5860_v17  ;;  %2783 = vmatpush1.bf16.msra.mxu1 %v5861_v40  ;;  %v5867_v40 = vld [vmem:[#allocation85_spill] sm:$0xff] }
 0x9ef   :  { %v2501_v25 = vpop.f32.mrb[52].mxu0  ;;  %v2542_v15 = vpop.f32.mrb[52].mxu1 }
 0x9f0   :  { %v2660_v18 = vrot.slane %v2501_v25, 1  ;;  %v2503_v20 = vpop.f32.mrb[53].mxu0  ;;  %v2544_v27 = vpop.f32.mrb[53].mxu1  ;;  %v2662_v62 = vrot.slane %v2542_v15, 1 }
 0x9f1   :  { %v2661_v60 = vrot.slane %v2503_v20, 1  ;;  %v2505_v53 = vpop.f32.mrb[54].mxu0  ;;  %v2546_v19 = vpop.f32.mrb[54].mxu1  ;;  %v2663_v39 = vrot.slane %v2544_v27, 1 }
 0x9f2   :  { %v2668_v47 = vadd.f32 %v2660_v18, %v5865_v13  ;;  %v2506_v57 = vpop.f32.mrb[55].mxu0  ;;  %v2547_v51 = vpop.f32.mrb[55].mxu1  ;;  %v2670_v38 = vadd.f32 %v2662_v62, %v5867_v40 }
 0x9f3   :  { %v2669_v9 = vadd.f32 %v2661_v60, %v5866_v41  ;;  %v2671_v3 = vadd.f32 %v2663_v39, %v5868_v0  ;;  %v5874_v51 = vld [vmem:[#allocation92_spill] sm:$0xff] }
 0x9f4   :  { %v2672_v48 = vsub.f32 0.0, %v2668_v47  ;;  %v2674_v58 = vsub.f32 0.0, %v2670_v38 }
 0x9f5   :  { %v2673_v49 = vsub.f32 0.0, %v2669_v9 }
 0x9f6   :  { %v2675_v17 = vmul.f32 1.442695, %v2672_v48  ;;  %v2679_v37 = vmul.f32 1.442695, %v2674_v58 }
 0x9f7   :  { %v2677_v54 = vmul.f32 1.442695, %v2673_v49 }
 0x9f8   :  { %3201 = vpow2.f32 %v2675_v17 }
 0x9f9   :  { %3203 = vpow2.f32 %v2677_v54 }
 0x9fa   :  { %3205 = vtanh.f32 %v2671_v3 }
 0x9fb   :  { %3207 = vpow2.f32 %v2679_v37 }
 0xa02   :  { %v3202_v46 = vpop.eup %3201 }
 0xa03   :  { %v2681_v56 = vadd.f32 1.0, %v3202_v46  ;;  %v3204_v32 = vpop.eup %3203 }
 0xa04   :  { %v2682_v30 = vadd.f32 1.0, %v3204_v32  ;;  %v3206_v4 = vpop.eup %3205 }
 0xa05   :  { %3209 = vrcp.f32 %v2681_v56  ;;  %v3208_v31 = vpop.eup %3207 }
 0xa06   :  { %3211 = vrcp.f32 %v2682_v30  ;;  %v2683_v36 = vadd.f32 1.0, %v3208_v31 }
 0xa08   :  { %3213 = vrcp.f32 %v2683_v36 }
 0xa0f   :  { %v3210_v44 = vpop.eup %3209 }
 0xa10   :  { %v2692_v14 = vmul.f32 %v3210_v44, %v3206_v4  ;;  %v3212_v6 = vpop.eup %3211 }
 0xa11   :  { %v2691_v55 = vmul.f32 %v3212_v6, %v2689_v11 }
 0xa12   :  { %v3214_v23 = vpop.eup %3213 }
 0xa13   :  { %v2693_v2 = vadd.f32 %v2692_v14, %v2691_v55 }
 0xa15   :  { %3215 = vtanh.f32 %v2693_v2 }
 0xa1f   :  { %v3216_v22 = vpop.eup %3215 }
 0xa20   :  { %v2695_v61 = vmul.f32 %v3216_v22, %v3214_v23 }
 0xa22   :  { %v2699_v17 = vpack.c.bf16 %v2695_v61, %v2695_v61 }
 0xa24   :  { %v2702_v38 = vshrl.u32 %v2699_v17, 16 }
 0xa26   :  { %v2704_v0 = vrot.slane %v2702_v38, 3 }
 0xa2f   :  { %v2583_v43 = vpop.f32.mrb[56].mxu0  ;;  %v2624_v8 = vpop.f32.mrb[56].mxu1 }
 0xa30   :  { %v2631_v29 = vadd.f32 %v2583_v43, %v5870_v50  ;;  %v2585_v45 = vpop.f32.mrb[57].mxu0  ;;  %v2626_v16 = vpop.f32.mrb[57].mxu1  ;;  %v2633_v21 = vadd.f32 %v2624_v8, %v5872_v26 }
 0xa31   :  { %v2632_v52 = vadd.f32 %v2585_v45, %v5871_v28  ;;  %v2587_v5 = vpop.f32.mrb[58].mxu0  ;;  %v2628_v35 = vpop.f32.mrb[58].mxu1  ;;  %v2634_v34 = vadd.f32 %v2626_v16, %v5873_v1 }
 0xa32   :  { %v2635_v63 = vsub.f32 0.0, %v2631_v29  ;;  %v2588_v33 = vpop.f32.mrb[59].mxu0  ;;  %v2629_v7 = vpop.f32.mrb[59].mxu1  ;;  %v2637_v59 = vsub.f32 0.0, %v2633_v21  ;;  %v2824_v21 = vld [vmem:[#allocation8 + $0x3] ss:$0 sm:$0xff] }
 0xa33   :  { %v2636_v42 = vsub.f32 0.0, %v2632_v52 }
 0xa34   :  { %v2638_v10 = vmul.f32 1.442695, %v2635_v63  ;;  %v2642_v25 = vmul.f32 1.442695, %v2637_v59 }
 0xa35   :  { %v2640_v12 = vmul.f32 1.442695, %v2636_v42  ;;  %v2818_v42 = vld [vmem:[#allocation8 + $0x2] ss:$0 sm:$0xff] }
 0xa36   :  { %3217 = vpow2.f32 %v2638_v10 }
 0xa37   :  { %3219 = vpow2.f32 %v2640_v12 }
 0xa38   :  { %3221 = vtanh.f32 %v2634_v34 }
 0xa39   :  { %3223 = vpow2.f32 %v2642_v25 }
 0xa40   :  { %v3218_v15 = vpop.eup %3217 }
 0xa41   :  { %v2644_v18 = vadd.f32 1.0, %v3218_v15  ;;  %v3220_v20 = vpop.eup %3219 }
 0xa42   :  { %v2645_v27 = vadd.f32 1.0, %v3220_v20  ;;  %v3222_v60 = vpop.eup %3221 }
 0xa43   :  { %3225 = vrcp.f32 %v2644_v18  ;;  %v3224_v53 = vpop.eup %3223 }
 0xa44   :  { %3227 = vrcp.f32 %v2645_v27  ;;  %v2646_v57 = vadd.f32 1.0, %v3224_v53 }
 0xa46   :  { %3229 = vrcp.f32 %v2646_v57 }
 0xa4d   :  { %v3226_v19 = vpop.eup %3225 }
 0xa4e   :  { %v2652_v13 = vmul.f32 %v3226_v19, %v3222_v60  ;;  %v3228_v47 = vpop.eup %3227 }
 0xa4f   :  { %v2651_v41 = vmul.f32 %v3228_v47, %v5874_v51 }
 0xa50   :  { %v3230_v48 = vpop.eup %3229 }
 0xa51   :  { %v2653_v9 = vadd.f32 %v2652_v13, %v2651_v41 }
 0xa53   :  { %3231 = vtanh.f32 %v2653_v9 }
 0xa5d   :  { %v3232_v62 = vpop.eup %3231 }
 0xa5e   :  { %v2655_v49 = vmul.f32 %v3232_v62, %v3230_v48 }
 0xa60   :  { %v2697_v54 = vrot.slane %v2655_v49, 1 }
 0xa62   :  { %v2700_v40 = vpack.c.bf16 %v2697_v54, %v2697_v54 }
 0xa64   :  { %v2706_v39 = vshrl.u32 %v2700_v40, 16 }
 0xa66   :  { %v2708_v58 = vrot.slane %v2706_v39, 3 }
 0xa68   :  { %2743 = vmatprep.mubr.bf16.mxu0 %v2708_v58  ;;  %2784 = vmatprep.mubr.bf16.mxu1 %v2708_v58 }
 0xa69   :  { %2744 = vmatmul.mubr.bf16.vlgmr.msra.gmra.mrb[60].mxu0 %v2704_v0  ;;  %2785 = vmatmul.mubr.bf16.vlgmr.msra.gmra.mrb[60].mxu1 %v2704_v0 }
 0xb3c   :  { %v2745_v3 = vpop.f32.mrb[60].mxu0  ;;  %v2786_v37 = vpop.f32.mrb[60].mxu1 }
 0xb3d   :  { %v2793_v46 = vadd.f32 %v2745_v3, %v5870_v50  ;;  %v2747_v56 = vpop.f32.mrb[61].mxu0  ;;  %v2788_v32 = vpop.f32.mrb[61].mxu1  ;;  %v2795_v55 = vadd.f32 %v2786_v37, %v5872_v26 }
 0xb3e   :  { %v2794_v30 = vadd.f32 %v2747_v56, %v5871_v28  ;;  %v2749_v4 = vpop.f32.mrb[62].mxu0  ;;  %v2790_v31 = vpop.f32.mrb[62].mxu1  ;;  %v2796_v23 = vadd.f32 %v2788_v32, %v5873_v1 }
 0xb3f   :  { %v2797_v44 = vsub.f32 0.0, %v2793_v46  ;;  %v2750_v24 = vpop.f32.mrb[63].mxu0  ;;  %v2791_v11 = vpop.f32.mrb[63].mxu1  ;;  %v2799_v2 = vsub.f32 0.0, %v2795_v55 }
 0xb40   :  { %v2798_v14 = vsub.f32 0.0, %v2794_v30 }
 0xb41   :  { %v2800_v6 = vmul.f32 1.442695, %v2797_v44  ;;  %v2804_v22 = vmul.f32 1.442695, %v2799_v2 }
 0xb42   :  { %v2802_v36 = vmul.f32 1.442695, %v2798_v14 }
 0xb43   :  { %3233 = vpow2.f32 %v2800_v6 }
 0xb44   :  { %3235 = vpow2.f32 %v2802_v36 }
 0xb45   :  { %3237 = vtanh.f32 %v2796_v23 }
 0xb46   :  { %3239 = vpow2.f32 %v2804_v22 }
 0xb4d   :  { %v3234_v61 = vpop.eup %3233 }
 0xb4e   :  { %v2806_v43 = vadd.f32 1.0, %v3234_v61  ;;  %v3236_v8 = vpop.eup %3235 }
 0xb4f   :  { %v2807_v50 = vadd.f32 1.0, %v3236_v8  ;;  %v3238_v29 = vpop.eup %3237 }
 0xb50   :  { %3241 = vrcp.f32 %v2806_v43  ;;  %v3240_v45 = vpop.eup %3239 }
 0xb51   :  { %3243 = vrcp.f32 %v2807_v50  ;;  %v2808_v5 = vadd.f32 1.0, %v3240_v45 }
 0xb53   :  { %3245 = vrcp.f32 %v2808_v5 }
 0xb5a   :  { %v3242_v16 = vpop.eup %3241 }
 0xb5b   :  { %v2814_v28 = vmul.f32 %v3242_v16, %v3238_v29  ;;  %v3244_v52 = vpop.eup %3243 }
 0xb5c   :  { %v2813_v35 = vmul.f32 %v3244_v52, %v2653_v9 }
 0xb5d   :  { %v3246_v33 = vpop.eup %3245 }
 0xb5e   :  { %v2815_v63 = vadd.f32 %v2814_v28, %v2813_v35 }
 0xb60   :  { %3247 = vtanh.f32 %v2815_v63 }
 0xb6a   :  { %v3248_v7 = vpop.eup %3247 }
 0xb6b   :  { %v2817_v10 = vmul.f32 %v3248_v7, %v3246_v33 }
 0xb6d   :  { %v2819_v12 = vmul.f32 %v2818_v42, %v2817_v10 }
 0xb6f   :  { %v2821_v26 = vsel %vm2820_vm2, %v2819_v12, 0.0 }
 0xb70   :  { %2822 = vadd.xlane.f32.xlu0 %v2821_v26 }
 0xbfd   :  { %v2823_v59 = vpop.xlane.xlu0 %2822 }
 0xbfe   :  { %v2825_v1 = vadd.f32 %v2824_v21, %v2823_v59 }
 0xc00   :  { %2826 = vst [vmem:[#allocation10] sm:$0x1] %v2825_v1 }
 0xc01   :  { %3348 = shalt.err (!%p3345_p8)
}
 0xc02   :  { %s3349_s14 = scalar_lea.hbm %s4885_s4, 16 }
 0xc03   :  { %p3350_p9 = scmp.ne.s32.totalorder %s4885_s4, %s3349_s14  ;;  %p3353_p10 = scmp.lt.u32.totalorder %s3349_s14, %s4885_s4 }
 0xc05   :  { %p3355_p11 = pnand %p3353_p10, %p3350_p9 }
 0xc07   :  { %3358 = shalt.err (!%p3355_p11)
}
 0xc08   :  { %2836 = dma.vmem_to_hbm [thread:$0]  %s2834_s10, 16, %s4885_s4, [#allocation4]  }
 0xc09   :  { %3365 = dma.done.wait [#allocation4], 16  }
 0xc0a   :  { %3366 = vsyncadd [#allocation4], 4294967280 }
 0xc0b   :  { %2840 = vsyncpa [#allocation3], 1 }
 0xc0c   :  { %2841 = vsyncpa [#allocation6], 1 }
 0xc0d   :  { %2842 = vsyncpa [#allocation9], 1 }
 0xc0e   :  { %2843 = vsyncpa [#allocation4], 1 }

</bundles_post_ra>
